<compile_context>
chip_gen: v7x
topology: tpu7x:2x2x1
jax: 0.10.0
libtpu: 0.0.40
codegen_flags: <defaults>
</compile_context>

<pallas_src>
import numpy as np
import jax
import jax.numpy as jnp
from jax.experimental import pallas as pl
from jax.experimental.pallas import tpu as pltpu

EPS = 1e-5          # nn.InstanceNorm2d default
NEG_SLOPE = 0.2     # LeakyReLU slope
K = 3               # conv kernel size
STRIDE = 2          # conv stride
IMG = 28            # MNIST spatial size
SIZES = [28, 13, 6, 2]   # spatial size before/after each valid stride-2 conv


# ----------------------------------------------------------------------------
# In-kernel helpers (pure functions on values; only 2-D dots / elementwise ops)
# ----------------------------------------------------------------------------
def _group_matrices(batch, rows, dtype):
    """S: (batch, batch*rows) sums the rows of one sample; St: its transpose."""
    n = batch * rows
    b_i = jax.lax.broadcasted_iota(jnp.int32, (batch, n), 0)
    r_i = jax.lax.broadcasted_iota(jnp.int32, (batch, n), 1)
    S = jnp.logical_and(r_i >= b_i * rows, r_i < b_i * rows + rows).astype(dtype)
    b_j = jax.lax.broadcasted_iota(jnp.int32, (n, batch), 1)
    r_j = jax.lax.broadcasted_iota(jnp.int32, (n, batch), 0)
    St = jnp.logical_and(r_j >= b_j * rows, r_j < b_j * rows + rows).astype(dtype)
    return S, St


def _conv_block(x_bf16, r_ref, a_ref, p_ref, e_ref, g_ref, bl_ref, batch, oh):
    """Conv2d(k=3, s=2, valid) + InstanceNorm2d(affine) + LeakyReLU(0.2).

    x_bf16: (batch*ih, iw*cin) bf16, rows = b*ih + ih_idx, lanes = iw*cin + ci
    returns (batch*oh, ow*cout) f32, rows = b*oh + oh_idx, lanes = ow*cout + co
    Conv bias omitted: it is exactly cancelled by the InstanceNorm mean subtraction.
    """
    acc = None
    for kh in range(K):
        # 0/1 block-diagonal row selection (rows 2*oh + kh of every sample) ...
        sel = jnp.dot(r_ref[kh], x_bf16,
                      preferred_element_type=jnp.float32).astype(jnp.bfloat16)
        # ... then the width-conv as one matmul against the inflated weight A_kh.
        part = jnp.dot(sel, a_ref[kh], preferred_element_type=jnp.float32)
        acc = part if acc is None else acc + part

    # InstanceNorm: per-sample (S/St) and per-channel (P/E) stats, two-pass variance.
    S, St = _group_matrices(batch, oh, jnp.float32)
    mean_c = jnp.dot(jnp.dot(S, acc), p_ref[...])            # (B, Cout), P holds 1/(OH*OW)
    xc = acc - jnp.dot(St, jnp.dot(mean_c, e_ref[...]))      # centered
    var_c = jnp.dot(jnp.dot(S, xc * xc), p_ref[...])         # biased variance
    scale_c = jax.lax.rsqrt(var_c + EPS) * g_ref[...]        # * gamma
    y = xc * jnp.dot(St, jnp.dot(scale_c, e_ref[...])) + bl_ref[...]   # + beta (pre-expanded)
    return jnp.where(y > 0, y, NEG_SLOPE * y)                # LeakyReLU(0.2)


# ----------------------------------------------------------------------------
# The single fused kernel
# ----------------------------------------------------------------------------
def critic_kernel(img_ref, cond_ref,
                  r1, a1, p1, e1, g1, bl1,
                  r2, a2, p2, e2, g2, bl2,
                  r3, a3, p3, e3, g3, bl3,
                  we_ref, be_ref, wfa_ref, wfb_ref, bf1_ref, wf2_ref, bf2_ref,
                  o_ref):
    batch = cond_ref.shape[0]

    # cnn_net: three fused conv + InstanceNorm + LeakyReLU stages, all in VMEM.
    y = _conv_block(img_ref[...], r1, a1, p1, e1, g1, bl1, batch, SIZES[1])
    y = _conv_block(y.astype(jnp.bfloat16), r2, a2, p2, e2, g2, bl2, batch, SIZES[2])
    y = _conv_block(y.astype(jnp.bfloat16), r3, a3, p3, e3, g3, bl3, batch, SIZES[3])
    # y: (batch*2, 2*C) f32, rows = b*2 + h, lanes = w*C + c

    # Head.  The PyTorch (c, h, w) Flatten order is folded into wfa's row layout, so
    # the flatten is just two accumulating dots over the spatial rows (batch stays in M).
    oh3 = SIZES[3]
    n3 = batch * oh3
    h_cnn = None
    for hrow in range(oh3):
        b_i = jax.lax.broadcasted_iota(jnp.int32, (batch, n3), 0)
        r_i = jax.lax.broadcasted_iota(jnp.int32, (batch, n3), 1)
        g_h = (r_i == b_i * oh3 + hrow).astype(jnp.float32)      # picks row h of each sample
        rows = jnp.dot(g_h, y).astype(jnp.bfloat16)              # (batch, 2*C)
        part = jnp.dot(rows, wfa_ref[hrow], preferred_element_type=jnp.float32)
        h_cnn = part if h_cnn is None else h_cnn + part          # (batch, H)

    # condition embedding + implicit concat (split Linear weight) + MLP
    vec_cond = jnp.dot(cond_ref[...], we_ref[...],
                       preferred_element_type=jnp.float32) + be_ref[...]
    h = h_cnn + jnp.dot(vec_cond.astype(jnp.bfloat16), wfb_ref[...],
                        preferred_element_type=jnp.float32) + bf1_ref[...]
    h = jnp.where(h > 0, h, NEG_SLOPE * h)
    o_ref[...] = (jnp.dot(h.astype(jnp.bfloat16), wf2_ref[...],
                          preferred_element_type=jnp.float32) + bf2_ref[...])


# ----------------------------------------------------------------------------
# Wrapper: one pallas_call, everything in VMEM, no grid
# ----------------------------------------------------------------------------
def critic_forward(params, image_nchw, condition):
    B = image_nchw.shape[0]
    img = image_nchw.reshape(B * IMG, IMG).astype(jnp.bfloat16)   # Cin=1: pure reshape
    cond = condition.astype(jnp.bfloat16)

    args = (
        img, cond,
        params["R1"], params["A1"], params["P1"], params["E1"], params["g1"], params["bl1"],
        params["R2"], params["A2"], params["P2"], params["E2"], params["g2"], params["bl2"],
        params["R3"], params["A3"], params["P3"], params["E3"], params["g3"], params["bl3"],
        params["We"], params["be"], params["Wfa"], params["Wfb"],
        params["bf1"], params["Wf2"], params["bf2"],
    )
    vmem = pltpu.MemorySpace.VMEM
    return pl.pallas_call(
        critic_kernel,
        out_shape=jax.ShapeDtypeStruct((B, 1), jnp.float32),
        in_specs=[pl.BlockSpec(memory_space=vmem) for _ in args],
        out_specs=pl.BlockSpec(memory_space=vmem),
    )(*args)


# ----------------------------------------------------------------------------
# Parameter init (deterministic, synthetic) with TPU-friendly weight layouts
# ----------------------------------------------------------------------------
def init_params(key, C, Hh, num_classes, B):
    ks = jax.random.split(key, 8)

    def randn(k, shape, fan_in):
        return np.asarray(jax.random.normal(k, shape, jnp.float32)) / np.sqrt(float(fan_in))

    C1, C2, C3 = C // 4, C // 2, C
    p = {}

    def conv_layer(idx, k, cin, cout, ih, oh):
        w = randn(k, (cout, cin, K, K), cin * K * K)           # PyTorch OIHW
        # Inflated width-conv weights: A[kh, iw*cin+ci, ow*cout+co] = w[co, ci, kh, iw-2ow]
        A = np.zeros((K, ih * cin, oh * cout), np.float32)
        for kh in range(K):
            for ow in range(oh):
                for kw in range(K):
                    iw = STRIDE * ow + kw
                    A[kh, iw * cin:(iw + 1) * cin, ow * cout:(ow + 1) * cout] = w[:, :, kh, kw].T
        # Block-diagonal (over the batch) stride-2 row selection matrices.
        R = np.zeros((K, B * oh, B * ih), np.float32)
        for kh in range(K):
            for b in range(B):
                for o in range(oh):
                    R[kh, b * oh + o, b * ih + STRIDE * o + kh] = 1.0
        gamma = np.ones((cout,), np.float32)                   # InstanceNorm affine defaults
        beta = np.zeros((cout,), np.float32)
        p[f"R{idx}"] = jnp.asarray(R, jnp.bfloat16)
        p[f"A{idx}"] = jnp.asarray(A, jnp.bfloat16)
        p[f"P{idx}"] = jnp.asarray(np.tile(np.eye(cout, dtype=np.float32), (oh, 1)) / (oh * oh))
        p[f"E{idx}"] = jnp.asarray(np.tile(np.eye(cout, dtype=np.float32), (1, oh)))
        p[f"g{idx}"] = jnp.asarray(gamma.reshape(1, cout))
        p[f"bl{idx}"] = jnp.asarray(np.tile(beta, oh).reshape(1, oh * cout))

    conv_layer(1, ks[0], 1, C1, SIZES[0], SIZES[1])
    conv_layer(2, ks[1], C1, C2, SIZES[1], SIZES[2])
    conv_layer(3, ks[2], C2, C3, SIZES[2], SIZES[3])

    # condition_embedding: Linear(num_classes, 4C)
    p["We"] = jnp.asarray(randn(ks[3], (num_classes, 4 * C), num_classes), jnp.bfloat16)
    p["be"] = jnp.zeros((1, 4 * C), jnp.float32)

    # Critic_net: Linear(8C, Hh) split into [cnn | condition] halves, LeakyReLU, Linear(Hh, 1).
    Wfc1 = randn(ks[4], (8 * C, Hh), 8 * C)
    Wa, Wb = Wfc1[:4 * C], Wfc1[4 * C:]
    # Fold the PyTorch (c, h, w) Flatten order into the weight: kernel features live at
    # (row h, lane w*C3 + c), PyTorch flatten index is c*4 + h*2 + w.
    oh3 = SIZES[3]
    Wfa = np.zeros((oh3, oh3 * C3, Hh), np.float32)
    for c in range(C3):
        for hh in range(oh3):
            for ww in range(oh3):
                Wfa[hh, ww * C3 + c, :] = Wa[c * (oh3 * oh3) + hh * oh3 + ww, :]
    p["Wfa"] = jnp.asarray(Wfa, jnp.bfloat16)
    p["Wfb"] = jnp.asarray(Wb, jnp.bfloat16)
    p["bf1"] = jnp.zeros((1, Hh), jnp.float32)
    p["Wf2"] = jnp.asarray(randn(ks[5], (Hh, 1), Hh), jnp.bfloat16)
    p["bf2"] = jnp.zeros((1, 1), jnp.float32)
    return p


if __name__ == "__main__":
    key = jax.random.PRNGKey(0)
    kp, ki, kc = jax.random.split(key, 3)

    # Small, module-consistent sizes: MNIST image 1x28x28, num_classes=10,
    # critic_size / critic_hidden_size scaled 1024 -> 64, batch=2.
    C, Hh, B, NCLS = 64, 64, 2, 10

    params = init_params(kp, C, Hh, NCLS, B)
    image = jax.random.normal(ki, (B, 1, 28, 28), jnp.float32)
    labels = jax.random.randint(kc, (B,), 0, NCLS)
    condition = jax.nn.one_hot(labels, NCLS, dtype=jnp.float32)

    out = critic_forward(params, image, condition)
    out = jax.block_until_ready(out)

    assert out.shape == (B, 1), out.shape
    assert out.dtype == jnp.float32
    assert bool(jnp.all(jnp.isfinite(out)))
    print("KERNEL_OK")
</pallas_src>

<mosaic_0001>
module attributes {stable_mosaic.version = 11 : i64} {
  func.func @critic_kernel(%arg0: memref<56x28xbf16, #tpu.memory_space<vmem>>, %arg1: memref<2x10xbf16, #tpu.memory_space<vmem>>, %arg2: memref<3x26x56xbf16, #tpu.memory_space<vmem>>, %arg3: memref<3x28x208xbf16, #tpu.memory_space<vmem>>, %arg4: memref<208x16xf32, #tpu.memory_space<vmem>>, %arg5: memref<16x208xf32, #tpu.memory_space<vmem>>, %arg6: memref<1x16xf32, #tpu.memory_space<vmem>>, %arg7: memref<1x208xf32, #tpu.memory_space<vmem>>, %arg8: memref<3x12x26xbf16, #tpu.memory_space<vmem>>, %arg9: memref<3x208x192xbf16, #tpu.memory_space<vmem>>, %arg10: memref<192x32xf32, #tpu.memory_space<vmem>>, %arg11: memref<32x192xf32, #tpu.memory_space<vmem>>, %arg12: memref<1x32xf32, #tpu.memory_space<vmem>>, %arg13: memref<1x192xf32, #tpu.memory_space<vmem>>, %arg14: memref<3x4x12xbf16, #tpu.memory_space<vmem>>, %arg15: memref<3x192x128xbf16, #tpu.memory_space<vmem>>, %arg16: memref<128x64xf32, #tpu.memory_space<vmem>>, %arg17: memref<64x128xf32, #tpu.memory_space<vmem>>, %arg18: memref<1x64xf32, #tpu.memory_space<vmem>>, %arg19: memref<1x128xf32, #tpu.memory_space<vmem>>, %arg20: memref<10x256xbf16, #tpu.memory_space<vmem>>, %arg21: memref<1x256xf32, #tpu.memory_space<vmem>>, %arg22: memref<2x128x64xbf16, #tpu.memory_space<vmem>>, %arg23: memref<256x64xbf16, #tpu.memory_space<vmem>>, %arg24: memref<1x64xf32, #tpu.memory_space<vmem>>, %arg25: memref<64x1xbf16, #tpu.memory_space<vmem>>, %arg26: memref<1x1xf32, #tpu.memory_space<vmem>>, %arg27: memref<2x1xf32, #tpu.memory_space<vmem>>) attributes {dimension_semantics = [], scalar_prefetch = 0 : i64, scratch_operands = 0 : i64, tpu.core_type = #tpu.core_type<tc>} {
    %c0 = arith.constant 0 : index
    %c0_0 = arith.constant 0 : index
    %0 = vector.load %arg0[%c0, %c0_0] : memref<56x28xbf16, #tpu.memory_space<vmem>>, vector<56x28xbf16>
    %c0_1 = arith.constant 0 : index
    %c0_2 = arith.constant 0 : index
    %c0_3 = arith.constant 0 : index
    %1 = vector.load %arg2[%c0_1, %c0_2, %c0_3] : memref<3x26x56xbf16, #tpu.memory_space<vmem>>, vector<1x26x56xbf16>
    %2 = vector.shape_cast %1 : vector<1x26x56xbf16> to vector<26x56xbf16>
    %cst = arith.constant dense<0.000000e+00> : vector<26x28xf32>
    %3 = tpu.matmul %2, %0, %cst {dimension_numbers = #tpu.dot_dimension_numbers<[1], [0], [0], [1], [0, 0, 1, 1], [], []>} : vector<26x56xbf16>, vector<56x28xbf16>, vector<26x28xf32> -> vector<26x28xf32>
    %4 = arith.truncf %3 : vector<26x28xf32> to vector<26x28xbf16>
    %c0_4 = arith.constant 0 : index
    %c0_5 = arith.constant 0 : index
    %c0_6 = arith.constant 0 : index
    %5 = vector.load %arg3[%c0_4, %c0_5, %c0_6] : memref<3x28x208xbf16, #tpu.memory_space<vmem>>, vector<1x28x208xbf16>
    %6 = vector.shape_cast %5 : vector<1x28x208xbf16> to vector<28x208xbf16>
    %cst_7 = arith.constant dense<0.000000e+00> : vector<26x208xf32>
    %7 = tpu.matmul %4, %6, %cst_7 {dimension_numbers = #tpu.dot_dimension_numbers<[1], [0], [0], [1], [0, 0, 1, 1], [], []>} : vector<26x28xbf16>, vector<28x208xbf16>, vector<26x208xf32> -> vector<26x208xf32>
    %c1 = arith.constant 1 : index
    %c0_8 = arith.constant 0 : index
    %c0_9 = arith.constant 0 : index
    %8 = vector.load %arg2[%c1, %c0_8, %c0_9] : memref<3x26x56xbf16, #tpu.memory_space<vmem>>, vector<1x26x56xbf16>
    %9 = vector.shape_cast %8 : vector<1x26x56xbf16> to vector<26x56xbf16>
    %cst_10 = arith.constant dense<0.000000e+00> : vector<26x28xf32>
    %10 = tpu.matmul %9, %0, %cst_10 {dimension_numbers = #tpu.dot_dimension_numbers<[1], [0], [0], [1], [0, 0, 1, 1], [], []>} : vector<26x56xbf16>, vector<56x28xbf16>, vector<26x28xf32> -> vector<26x28xf32>
    %11 = arith.truncf %10 : vector<26x28xf32> to vector<26x28xbf16>
    %c1_11 = arith.constant 1 : index
    %c0_12 = arith.constant 0 : index
    %c0_13 = arith.constant 0 : index
    %12 = vector.load %arg3[%c1_11, %c0_12, %c0_13] : memref<3x28x208xbf16, #tpu.memory_space<vmem>>, vector<1x28x208xbf16>
    %13 = vector.shape_cast %12 : vector<1x28x208xbf16> to vector<28x208xbf16>
    %cst_14 = arith.constant dense<0.000000e+00> : vector<26x208xf32>
    %14 = tpu.matmul %11, %13, %cst_14 {dimension_numbers = #tpu.dot_dimension_numbers<[1], [0], [0], [1], [0, 0, 1, 1], [], []>} : vector<26x28xbf16>, vector<28x208xbf16>, vector<26x208xf32> -> vector<26x208xf32>
    %15 = arith.addf %7, %14 : vector<26x208xf32>
    %c2 = arith.constant 2 : index
    %c0_15 = arith.constant 0 : index
    %c0_16 = arith.constant 0 : index
    %16 = vector.load %arg2[%c2, %c0_15, %c0_16] : memref<3x26x56xbf16, #tpu.memory_space<vmem>>, vector<1x26x56xbf16>
    %17 = vector.shape_cast %16 : vector<1x26x56xbf16> to vector<26x56xbf16>
    %cst_17 = arith.constant dense<0.000000e+00> : vector<26x28xf32>
    %18 = tpu.matmul %17, %0, %cst_17 {dimension_numbers = #tpu.dot_dimension_numbers<[1], [0], [0], [1], [0, 0, 1, 1], [], []>} : vector<26x56xbf16>, vector<56x28xbf16>, vector<26x28xf32> -> vector<26x28xf32>
    %19 = arith.truncf %18 : vector<26x28xf32> to vector<26x28xbf16>
    %c2_18 = arith.constant 2 : index
    %c0_19 = arith.constant 0 : index
    %c0_20 = arith.constant 0 : index
    %20 = vector.load %arg3[%c2_18, %c0_19, %c0_20] : memref<3x28x208xbf16, #tpu.memory_space<vmem>>, vector<1x28x208xbf16>
    %21 = vector.shape_cast %20 : vector<1x28x208xbf16> to vector<28x208xbf16>
    %cst_21 = arith.constant dense<0.000000e+00> : vector<26x208xf32>
    %22 = tpu.matmul %19, %21, %cst_21 {dimension_numbers = #tpu.dot_dimension_numbers<[1], [0], [0], [1], [0, 0, 1, 1], [], []>} : vector<26x28xbf16>, vector<28x208xbf16>, vector<26x208xf32> -> vector<26x208xf32>
    %23 = arith.addf %15, %22 : vector<26x208xf32>
    %24 = tpu.iota {dimensions = array<i32: 0>} : vector<2x26xi32>
    %25 = tpu.iota {dimensions = array<i32: 1>} : vector<2x26xi32>
    %c13_i32 = arith.constant 13 : i32
    %26 = vector.broadcast %c13_i32 : i32 to vector<2x26xi32>
    %27 = arith.muli %24, %26 : vector<2x26xi32>
    %28 = arith.cmpi sge, %25, %27 : vector<2x26xi32>
    %c13_i32_22 = arith.constant 13 : i32
    %29 = vector.broadcast %c13_i32_22 : i32 to vector<2x26xi32>
    %30 = arith.muli %24, %29 : vector<2x26xi32>
    %c13_i32_23 = arith.constant 13 : i32
    %31 = vector.broadcast %c13_i32_23 : i32 to vector<2x26xi32>
    %32 = arith.addi %30, %31 : vector<2x26xi32>
    %33 = arith.cmpi slt, %25, %32 : vector<2x26xi32>
    %34 = arith.andi %28, %33 : vector<2x26xi1>
    %35 = arith.extui %34 : vector<2x26xi1> to vector<2x26xi32>
    %36 = arith.sitofp %35 : vector<2x26xi32> to vector<2x26xf32>
    %37 = tpu.iota {dimensions = array<i32: 1>} : vector<26x2xi32>
    %38 = tpu.iota {dimensions = array<i32: 0>} : vector<26x2xi32>
    %c13_i32_24 = arith.constant 13 : i32
    %39 = vector.broadcast %c13_i32_24 : i32 to vector<26x2xi32>
    %40 = arith.muli %37, %39 : vector<26x2xi32>
    %41 = arith.cmpi sge, %38, %40 : vector<26x2xi32>
    %c13_i32_25 = arith.constant 13 : i32
    %42 = vector.broadcast %c13_i32_25 : i32 to vector<26x2xi32>
    %43 = arith.muli %37, %42 : vector<26x2xi32>
    %c13_i32_26 = arith.constant 13 : i32
    %44 = vector.broadcast %c13_i32_26 : i32 to vector<26x2xi32>
    %45 = arith.addi %43, %44 : vector<26x2xi32>
    %46 = arith.cmpi slt, %38, %45 : vector<26x2xi32>
    %47 = arith.andi %41, %46 : vector<26x2xi1>
    %48 = arith.extui %47 : vector<26x2xi1> to vector<26x2xi32>
    %49 = arith.sitofp %48 : vector<26x2xi32> to vector<26x2xf32>
    %cst_27 = arith.constant dense<0.000000e+00> : vector<2x208xf32>
    %50 = tpu.matmul %36, %23, %cst_27 {dimension_numbers = #tpu.dot_dimension_numbers<[1], [0], [0], [1], [0, 0, 1, 1], [], []>} : vector<2x26xf32>, vector<26x208xf32>, vector<2x208xf32> -> vector<2x208xf32>
    %c0_28 = arith.constant 0 : index
    %c0_29 = arith.constant 0 : index
    %51 = vector.load %arg4[%c0_28, %c0_29] : memref<208x16xf32, #tpu.memory_space<vmem>>, vector<208x16xf32>
    %cst_30 = arith.constant dense<0.000000e+00> : vector<2x16xf32>
    %52 = tpu.matmul %50, %51, %cst_30 {dimension_numbers = #tpu.dot_dimension_numbers<[1], [0], [0], [1], [0, 0, 1, 1], [], []>} : vector<2x208xf32>, vector<208x16xf32>, vector<2x16xf32> -> vector<2x16xf32>
    %c0_31 = arith.constant 0 : index
    %c0_32 = arith.constant 0 : index
    %53 = vector.load %arg5[%c0_31, %c0_32] : memref<16x208xf32, #tpu.memory_space<vmem>>, vector<16x208xf32>
    %cst_33 = arith.constant dense<0.000000e+00> : vector<2x208xf32>
    %54 = tpu.matmul %52, %53, %cst_33 {dimension_numbers = #tpu.dot_dimension_numbers<[1], [0], [0], [1], [0, 0, 1, 1], [], []>} : vector<2x16xf32>, vector<16x208xf32>, vector<2x208xf32> -> vector<2x208xf32>
    %cst_34 = arith.constant dense<0.000000e+00> : vector<26x208xf32>
    %55 = tpu.matmul %49, %54, %cst_34 {dimension_numbers = #tpu.dot_dimension_numbers<[1], [0], [0], [1], [0, 0, 1, 1], [], []>} : vector<26x2xf32>, vector<2x208xf32>, vector<26x208xf32> -> vector<26x208xf32>
    %56 = arith.subf %23, %55 : vector<26x208xf32>
    %57 = arith.mulf %56, %56 : vector<26x208xf32>
    %cst_35 = arith.constant dense<0.000000e+00> : vector<2x208xf32>
    %58 = tpu.matmul %36, %57, %cst_35 {dimension_numbers = #tpu.dot_dimension_numbers<[1], [0], [0], [1], [0, 0, 1, 1], [], []>} : vector<2x26xf32>, vector<26x208xf32>, vector<2x208xf32> -> vector<2x208xf32>
    %c0_36 = arith.constant 0 : index
    %c0_37 = arith.constant 0 : index
    %59 = vector.load %arg4[%c0_36, %c0_37] : memref<208x16xf32, #tpu.memory_space<vmem>>, vector<208x16xf32>
    %cst_38 = arith.constant dense<0.000000e+00> : vector<2x16xf32>
    %60 = tpu.matmul %58, %59, %cst_38 {dimension_numbers = #tpu.dot_dimension_numbers<[1], [0], [0], [1], [0, 0, 1, 1], [], []>} : vector<2x208xf32>, vector<208x16xf32>, vector<2x16xf32> -> vector<2x16xf32>
    %cst_39 = arith.constant 9.99999974E-6 : f32
    %61 = vector.broadcast %cst_39 : f32 to vector<2x16xf32>
    %62 = arith.addf %60, %61 : vector<2x16xf32>
    %63 = math.rsqrt %62 : vector<2x16xf32>
    %c0_40 = arith.constant 0 : index
    %c0_41 = arith.constant 0 : index
    %64 = vector.load %arg6[%c0_40, %c0_41] : memref<1x16xf32, #tpu.memory_space<vmem>>, vector<1x16xf32>
    %65 = vector.broadcast %64 : vector<1x16xf32> to vector<2x16xf32>
    %66 = arith.mulf %63, %65 : vector<2x16xf32>
    %c0_42 = arith.constant 0 : index
    %c0_43 = arith.constant 0 : index
    %67 = vector.load %arg5[%c0_42, %c0_43] : memref<16x208xf32, #tpu.memory_space<vmem>>, vector<16x208xf32>
    %cst_44 = arith.constant dense<0.000000e+00> : vector<2x208xf32>
    %68 = tpu.matmul %66, %67, %cst_44 {dimension_numbers = #tpu.dot_dimension_numbers<[1], [0], [0], [1], [0, 0, 1, 1], [], []>} : vector<2x16xf32>, vector<16x208xf32>, vector<2x208xf32> -> vector<2x208xf32>
    %cst_45 = arith.constant dense<0.000000e+00> : vector<26x208xf32>
    %69 = tpu.matmul %49, %68, %cst_45 {dimension_numbers = #tpu.dot_dimension_numbers<[1], [0], [0], [1], [0, 0, 1, 1], [], []>} : vector<26x2xf32>, vector<2x208xf32>, vector<26x208xf32> -> vector<26x208xf32>
    %70 = arith.mulf %56, %69 : vector<26x208xf32>
    %c0_46 = arith.constant 0 : index
    %c0_47 = arith.constant 0 : index
    %71 = vector.load %arg7[%c0_46, %c0_47] : memref<1x208xf32, #tpu.memory_space<vmem>>, vector<1x208xf32>
    %72 = vector.broadcast %71 : vector<1x208xf32> to vector<26x208xf32>
    %73 = arith.addf %70, %72 : vector<26x208xf32>
    %cst_48 = arith.constant 0.000000e+00 : f32
    %74 = vector.broadcast %cst_48 : f32 to vector<26x208xf32>
    %75 = arith.cmpf ogt, %73, %74 : vector<26x208xf32>
    %cst_49 = arith.constant 2.000000e-01 : f32
    %76 = vector.broadcast %cst_49 : f32 to vector<26x208xf32>
    %77 = arith.mulf %76, %73 : vector<26x208xf32>
    %78 = arith.select %75, %73, %77 : vector<26x208xi1>, vector<26x208xf32>
    %79 = arith.truncf %78 : vector<26x208xf32> to vector<26x208xbf16>
    %c0_50 = arith.constant 0 : index
    %c0_51 = arith.constant 0 : index
    %c0_52 = arith.constant 0 : index
    %80 = vector.load %arg8[%c0_50, %c0_51, %c0_52] : memref<3x12x26xbf16, #tpu.memory_space<vmem>>, vector<1x12x26xbf16>
    %81 = vector.shape_cast %80 : vector<1x12x26xbf16> to vector<12x26xbf16>
    %cst_53 = arith.constant dense<0.000000e+00> : vector<12x208xf32>
    %82 = tpu.matmul %81, %79, %cst_53 {dimension_numbers = #tpu.dot_dimension_numbers<[1], [0], [0], [1], [0, 0, 1, 1], [], []>} : vector<12x26xbf16>, vector<26x208xbf16>, vector<12x208xf32> -> vector<12x208xf32>
    %83 = arith.truncf %82 : vector<12x208xf32> to vector<12x208xbf16>
    %c0_54 = arith.constant 0 : index
    %c0_55 = arith.constant 0 : index
    %c0_56 = arith.constant 0 : index
    %84 = vector.load %arg9[%c0_54, %c0_55, %c0_56] : memref<3x208x192xbf16, #tpu.memory_space<vmem>>, vector<1x208x192xbf16>
    %85 = vector.shape_cast %84 : vector<1x208x192xbf16> to vector<208x192xbf16>
    %cst_57 = arith.constant dense<0.000000e+00> : vector<12x192xf32>
    %86 = tpu.matmul %83, %85, %cst_57 {dimension_numbers = #tpu.dot_dimension_numbers<[1], [0], [0], [1], [0, 0, 1, 1], [], []>} : vector<12x208xbf16>, vector<208x192xbf16>, vector<12x192xf32> -> vector<12x192xf32>
    %c1_58 = arith.constant 1 : index
    %c0_59 = arith.constant 0 : index
    %c0_60 = arith.constant 0 : index
    %87 = vector.load %arg8[%c1_58, %c0_59, %c0_60] : memref<3x12x26xbf16, #tpu.memory_space<vmem>>, vector<1x12x26xbf16>
    %88 = vector.shape_cast %87 : vector<1x12x26xbf16> to vector<12x26xbf16>
    %cst_61 = arith.constant dense<0.000000e+00> : vector<12x208xf32>
    %89 = tpu.matmul %88, %79, %cst_61 {dimension_numbers = #tpu.dot_dimension_numbers<[1], [0], [0], [1], [0, 0, 1, 1], [], []>} : vector<12x26xbf16>, vector<26x208xbf16>, vector<12x208xf32> -> vector<12x208xf32>
    %90 = arith.truncf %89 : vector<12x208xf32> to vector<12x208xbf16>
    %c1_62 = arith.constant 1 : index
    %c0_63 = arith.constant 0 : index
    %c0_64 = arith.constant 0 : index
    %91 = vector.load %arg9[%c1_62, %c0_63, %c0_64] : memref<3x208x192xbf16, #tpu.memory_space<vmem>>, vector<1x208x192xbf16>
    %92 = vector.shape_cast %91 : vector<1x208x192xbf16> to vector<208x192xbf16>
    %cst_65 = arith.constant dense<0.000000e+00> : vector<12x192xf32>
    %93 = tpu.matmul %90, %92, %cst_65 {dimension_numbers = #tpu.dot_dimension_numbers<[1], [0], [0], [1], [0, 0, 1, 1], [], []>} : vector<12x208xbf16>, vector<208x192xbf16>, vector<12x192xf32> -> vector<12x192xf32>
    %94 = arith.addf %86, %93 : vector<12x192xf32>
    %c2_66 = arith.constant 2 : index
    %c0_67 = arith.constant 0 : index
    %c0_68 = arith.constant 0 : index
    %95 = vector.load %arg8[%c2_66, %c0_67, %c0_68] : memref<3x12x26xbf16, #tpu.memory_space<vmem>>, vector<1x12x26xbf16>
    %96 = vector.shape_cast %95 : vector<1x12x26xbf16> to vector<12x26xbf16>
    %cst_69 = arith.constant dense<0.000000e+00> : vector<12x208xf32>
    %97 = tpu.matmul %96, %79, %cst_69 {dimension_numbers = #tpu.dot_dimension_numbers<[1], [0], [0], [1], [0, 0, 1, 1], [], []>} : vector<12x26xbf16>, vector<26x208xbf16>, vector<12x208xf32> -> vector<12x208xf32>
    %98 = arith.truncf %97 : vector<12x208xf32> to vector<12x208xbf16>
    %c2_70 = arith.constant 2 : index
    %c0_71 = arith.constant 0 : index
    %c0_72 = arith.constant 0 : index
    %99 = vector.load %arg9[%c2_70, %c0_71, %c0_72] : memref<3x208x192xbf16, #tpu.memory_space<vmem>>, vector<1x208x192xbf16>
    %100 = vector.shape_cast %99 : vector<1x208x192xbf16> to vector<208x192xbf16>
    %cst_73 = arith.constant dense<0.000000e+00> : vector<12x192xf32>
    %101 = tpu.matmul %98, %100, %cst_73 {dimension_numbers = #tpu.dot_dimension_numbers<[1], [0], [0], [1], [0, 0, 1, 1], [], []>} : vector<12x208xbf16>, vector<208x192xbf16>, vector<12x192xf32> -> vector<12x192xf32>
    %102 = arith.addf %94, %101 : vector<12x192xf32>
    %103 = tpu.iota {dimensions = array<i32: 0>} : vector<2x12xi32>
    %104 = tpu.iota {dimensions = array<i32: 1>} : vector<2x12xi32>
    %c6_i32 = arith.constant 6 : i32
    %105 = vector.broadcast %c6_i32 : i32 to vector<2x12xi32>
    %106 = arith.muli %103, %105 : vector<2x12xi32>
    %107 = arith.cmpi sge, %104, %106 : vector<2x12xi32>
    %c6_i32_74 = arith.constant 6 : i32
    %108 = vector.broadcast %c6_i32_74 : i32 to vector<2x12xi32>
    %109 = arith.muli %103, %108 : vector<2x12xi32>
    %c6_i32_75 = arith.constant 6 : i32
    %110 = vector.broadcast %c6_i32_75 : i32 to vector<2x12xi32>
    %111 = arith.addi %109, %110 : vector<2x12xi32>
    %112 = arith.cmpi slt, %104, %111 : vector<2x12xi32>
    %113 = arith.andi %107, %112 : vector<2x12xi1>
    %114 = arith.extui %113 : vector<2x12xi1> to vector<2x12xi32>
    %115 = arith.sitofp %114 : vector<2x12xi32> to vector<2x12xf32>
    %116 = tpu.iota {dimensions = array<i32: 1>} : vector<12x2xi32>
    %117 = tpu.iota {dimensions = array<i32: 0>} : vector<12x2xi32>
    %c6_i32_76 = arith.constant 6 : i32
    %118 = vector.broadcast %c6_i32_76 : i32 to vector<12x2xi32>
    %119 = arith.muli %116, %118 : vector<12x2xi32>
    %120 = arith.cmpi sge, %117, %119 : vector<12x2xi32>
    %c6_i32_77 = arith.constant 6 : i32
    %121 = vector.broadcast %c6_i32_77 : i32 to vector<12x2xi32>
    %122 = arith.muli %116, %121 : vector<12x2xi32>
    %c6_i32_78 = arith.constant 6 : i32
    %123 = vector.broadcast %c6_i32_78 : i32 to vector<12x2xi32>
    %124 = arith.addi %122, %123 : vector<12x2xi32>
    %125 = arith.cmpi slt, %117, %124 : vector<12x2xi32>
    %126 = arith.andi %120, %125 : vector<12x2xi1>
    %127 = arith.extui %126 : vector<12x2xi1> to vector<12x2xi32>
    %128 = arith.sitofp %127 : vector<12x2xi32> to vector<12x2xf32>
    %cst_79 = arith.constant dense<0.000000e+00> : vector<2x192xf32>
    %129 = tpu.matmul %115, %102, %cst_79 {dimension_numbers = #tpu.dot_dimension_numbers<[1], [0], [0], [1], [0, 0, 1, 1], [], []>} : vector<2x12xf32>, vector<12x192xf32>, vector<2x192xf32> -> vector<2x192xf32>
    %c0_80 = arith.constant 0 : index
    %c0_81 = arith.constant 0 : index
    %130 = vector.load %arg10[%c0_80, %c0_81] : memref<192x32xf32, #tpu.memory_space<vmem>>, vector<192x32xf32>
    %cst_82 = arith.constant dense<0.000000e+00> : vector<2x32xf32>
    %131 = tpu.matmul %129, %130, %cst_82 {dimension_numbers = #tpu.dot_dimension_numbers<[1], [0], [0], [1], [0, 0, 1, 1], [], []>} : vector<2x192xf32>, vector<192x32xf32>, vector<2x32xf32> -> vector<2x32xf32>
    %c0_83 = arith.constant 0 : index
    %c0_84 = arith.constant 0 : index
    %132 = vector.load %arg11[%c0_83, %c0_84] : memref<32x192xf32, #tpu.memory_space<vmem>>, vector<32x192xf32>
    %cst_85 = arith.constant dense<0.000000e+00> : vector<2x192xf32>
    %133 = tpu.matmul %131, %132, %cst_85 {dimension_numbers = #tpu.dot_dimension_numbers<[1], [0], [0], [1], [0, 0, 1, 1], [], []>} : vector<2x32xf32>, vector<32x192xf32>, vector<2x192xf32> -> vector<2x192xf32>
    %cst_86 = arith.constant dense<0.000000e+00> : vector<12x192xf32>
    %134 = tpu.matmul %128, %133, %cst_86 {dimension_numbers = #tpu.dot_dimension_numbers<[1], [0], [0], [1], [0, 0, 1, 1], [], []>} : vector<12x2xf32>, vector<2x192xf32>, vector<12x192xf32> -> vector<12x192xf32>
    %135 = arith.subf %102, %134 : vector<12x192xf32>
    %136 = arith.mulf %135, %135 : vector<12x192xf32>
    %cst_87 = arith.constant dense<0.000000e+00> : vector<2x192xf32>
    %137 = tpu.matmul %115, %136, %cst_87 {dimension_numbers = #tpu.dot_dimension_numbers<[1], [0], [0], [1], [0, 0, 1, 1], [], []>} : vector<2x12xf32>, vector<12x192xf32>, vector<2x192xf32> -> vector<2x192xf32>
    %c0_88 = arith.constant 0 : index
    %c0_89 = arith.constant 0 : index
    %138 = vector.load %arg10[%c0_88, %c0_89] : memref<192x32xf32, #tpu.memory_space<vmem>>, vector<192x32xf32>
    %cst_90 = arith.constant dense<0.000000e+00> : vector<2x32xf32>
    %139 = tpu.matmul %137, %138, %cst_90 {dimension_numbers = #tpu.dot_dimension_numbers<[1], [0], [0], [1], [0, 0, 1, 1], [], []>} : vector<2x192xf32>, vector<192x32xf32>, vector<2x32xf32> -> vector<2x32xf32>
    %cst_91 = arith.constant 9.99999974E-6 : f32
    %140 = vector.broadcast %cst_91 : f32 to vector<2x32xf32>
    %141 = arith.addf %139, %140 : vector<2x32xf32>
    %142 = math.rsqrt %141 : vector<2x32xf32>
    %c0_92 = arith.constant 0 : index
    %c0_93 = arith.constant 0 : index
    %143 = vector.load %arg12[%c0_92, %c0_93] : memref<1x32xf32, #tpu.memory_space<vmem>>, vector<1x32xf32>
    %144 = vector.broadcast %143 : vector<1x32xf32> to vector<2x32xf32>
    %145 = arith.mulf %142, %144 : vector<2x32xf32>
    %c0_94 = arith.constant 0 : index
    %c0_95 = arith.constant 0 : index
    %146 = vector.load %arg11[%c0_94, %c0_95] : memref<32x192xf32, #tpu.memory_space<vmem>>, vector<32x192xf32>
    %cst_96 = arith.constant dense<0.000000e+00> : vector<2x192xf32>
    %147 = tpu.matmul %145, %146, %cst_96 {dimension_numbers = #tpu.dot_dimension_numbers<[1], [0], [0], [1], [0, 0, 1, 1], [], []>} : vector<2x32xf32>, vector<32x192xf32>, vector<2x192xf32> -> vector<2x192xf32>
    %cst_97 = arith.constant dense<0.000000e+00> : vector<12x192xf32>
    %148 = tpu.matmul %128, %147, %cst_97 {dimension_numbers = #tpu.dot_dimension_numbers<[1], [0], [0], [1], [0, 0, 1, 1], [], []>} : vector<12x2xf32>, vector<2x192xf32>, vector<12x192xf32> -> vector<12x192xf32>
    %149 = arith.mulf %135, %148 : vector<12x192xf32>
    %c0_98 = arith.constant 0 : index
    %c0_99 = arith.constant 0 : index
    %150 = vector.load %arg13[%c0_98, %c0_99] : memref<1x192xf32, #tpu.memory_space<vmem>>, vector<1x192xf32>
    %151 = vector.broadcast %150 : vector<1x192xf32> to vector<12x192xf32>
    %152 = arith.addf %149, %151 : vector<12x192xf32>
    %cst_100 = arith.constant 0.000000e+00 : f32
    %153 = vector.broadcast %cst_100 : f32 to vector<12x192xf32>
    %154 = arith.cmpf ogt, %152, %153 : vector<12x192xf32>
    %cst_101 = arith.constant 2.000000e-01 : f32
    %155 = vector.broadcast %cst_101 : f32 to vector<12x192xf32>
    %156 = arith.mulf %155, %152 : vector<12x192xf32>
    %157 = arith.select %154, %152, %156 : vector<12x192xi1>, vector<12x192xf32>
    %158 = arith.truncf %157 : vector<12x192xf32> to vector<12x192xbf16>
    %c0_102 = arith.constant 0 : index
    %c0_103 = arith.constant 0 : index
    %c0_104 = arith.constant 0 : index
    %159 = vector.load %arg14[%c0_102, %c0_103, %c0_104] : memref<3x4x12xbf16, #tpu.memory_space<vmem>>, vector<1x4x12xbf16>
    %160 = vector.shape_cast %159 : vector<1x4x12xbf16> to vector<4x12xbf16>
    %cst_105 = arith.constant dense<0.000000e+00> : vector<4x192xf32>
    %161 = tpu.matmul %160, %158, %cst_105 {dimension_numbers = #tpu.dot_dimension_numbers<[1], [0], [0], [1], [0, 0, 1, 1], [], []>} : vector<4x12xbf16>, vector<12x192xbf16>, vector<4x192xf32> -> vector<4x192xf32>
    %162 = arith.truncf %161 : vector<4x192xf32> to vector<4x192xbf16>
    %c0_106 = arith.constant 0 : index
    %c0_107 = arith.constant 0 : index
    %c0_108 = arith.constant 0 : index
    %163 = vector.load %arg15[%c0_106, %c0_107, %c0_108] : memref<3x192x128xbf16, #tpu.memory_space<vmem>>, vector<1x192x128xbf16>
    %164 = vector.shape_cast %163 : vector<1x192x128xbf16> to vector<192x128xbf16>
    %cst_109 = arith.constant dense<0.000000e+00> : vector<4x128xf32>
    %165 = tpu.matmul %162, %164, %cst_109 {dimension_numbers = #tpu.dot_dimension_numbers<[1], [0], [0], [1], [0, 0, 1, 1], [], []>} : vector<4x192xbf16>, vector<192x128xbf16>, vector<4x128xf32> -> vector<4x128xf32>
    %c1_110 = arith.constant 1 : index
    %c0_111 = arith.constant 0 : index
    %c0_112 = arith.constant 0 : index
    %166 = vector.load %arg14[%c1_110, %c0_111, %c0_112] : memref<3x4x12xbf16, #tpu.memory_space<vmem>>, vector<1x4x12xbf16>
    %167 = vector.shape_cast %166 : vector<1x4x12xbf16> to vector<4x12xbf16>
    %cst_113 = arith.constant dense<0.000000e+00> : vector<4x192xf32>
    %168 = tpu.matmul %167, %158, %cst_113 {dimension_numbers = #tpu.dot_dimension_numbers<[1], [0], [0], [1], [0, 0, 1, 1], [], []>} : vector<4x12xbf16>, vector<12x192xbf16>, vector<4x192xf32> -> vector<4x192xf32>
    %169 = arith.truncf %168 : vector<4x192xf32> to vector<4x192xbf16>
    %c1_114 = arith.constant 1 : index
    %c0_115 = arith.constant 0 : index
    %c0_116 = arith.constant 0 : index
    %170 = vector.load %arg15[%c1_114, %c0_115, %c0_116] : memref<3x192x128xbf16, #tpu.memory_space<vmem>>, vector<1x192x128xbf16>
    %171 = vector.shape_cast %170 : vector<1x192x128xbf16> to vector<192x128xbf16>
    %cst_117 = arith.constant dense<0.000000e+00> : vector<4x128xf32>
    %172 = tpu.matmul %169, %171, %cst_117 {dimension_numbers = #tpu.dot_dimension_numbers<[1], [0], [0], [1], [0, 0, 1, 1], [], []>} : vector<4x192xbf16>, vector<192x128xbf16>, vector<4x128xf32> -> vector<4x128xf32>
    %173 = arith.addf %165, %172 : vector<4x128xf32>
    %c2_118 = arith.constant 2 : index
    %c0_119 = arith.constant 0 : index
    %c0_120 = arith.constant 0 : index
    %174 = vector.load %arg14[%c2_118, %c0_119, %c0_120] : memref<3x4x12xbf16, #tpu.memory_space<vmem>>, vector<1x4x12xbf16>
    %175 = vector.shape_cast %174 : vector<1x4x12xbf16> to vector<4x12xbf16>
    %cst_121 = arith.constant dense<0.000000e+00> : vector<4x192xf32>
    %176 = tpu.matmul %175, %158, %cst_121 {dimension_numbers = #tpu.dot_dimension_numbers<[1], [0], [0], [1], [0, 0, 1, 1], [], []>} : vector<4x12xbf16>, vector<12x192xbf16>, vector<4x192xf32> -> vector<4x192xf32>
    %177 = arith.truncf %176 : vector<4x192xf32> to vector<4x192xbf16>
    %c2_122 = arith.constant 2 : index
    %c0_123 = arith.constant 0 : index
    %c0_124 = arith.constant 0 : index
    %178 = vector.load %arg15[%c2_122, %c0_123, %c0_124] : memref<3x192x128xbf16, #tpu.memory_space<vmem>>, vector<1x192x128xbf16>
    %179 = vector.shape_cast %178 : vector<1x192x128xbf16> to vector<192x128xbf16>
    %cst_125 = arith.constant dense<0.000000e+00> : vector<4x128xf32>
    %180 = tpu.matmul %177, %179, %cst_125 {dimension_numbers = #tpu.dot_dimension_numbers<[1], [0], [0], [1], [0, 0, 1, 1], [], []>} : vector<4x192xbf16>, vector<192x128xbf16>, vector<4x128xf32> -> vector<4x128xf32>
    %181 = arith.addf %173, %180 : vector<4x128xf32>
    %182 = tpu.iota {dimensions = array<i32: 0>} : vector<2x4xi32>
    %183 = tpu.iota {dimensions = array<i32: 1>} : vector<2x4xi32>
    %c2_i32 = arith.constant 2 : i32
    %184 = vector.broadcast %c2_i32 : i32 to vector<2x4xi32>
    %185 = arith.muli %182, %184 : vector<2x4xi32>
    %186 = arith.cmpi sge, %183, %185 : vector<2x4xi32>
    %c2_i32_126 = arith.constant 2 : i32
    %187 = vector.broadcast %c2_i32_126 : i32 to vector<2x4xi32>
    %188 = arith.muli %182, %187 : vector<2x4xi32>
    %c2_i32_127 = arith.constant 2 : i32
    %189 = vector.broadcast %c2_i32_127 : i32 to vector<2x4xi32>
    %190 = arith.addi %188, %189 : vector<2x4xi32>
    %191 = arith.cmpi slt, %183, %190 : vector<2x4xi32>
    %192 = arith.andi %186, %191 : vector<2x4xi1>
    %193 = arith.extui %192 : vector<2x4xi1> to vector<2x4xi32>
    %194 = arith.sitofp %193 : vector<2x4xi32> to vector<2x4xf32>
    %195 = tpu.iota {dimensions = array<i32: 1>} : vector<4x2xi32>
    %196 = tpu.iota {dimensions = array<i32: 0>} : vector<4x2xi32>
    %c2_i32_128 = arith.constant 2 : i32
    %197 = vector.broadcast %c2_i32_128 : i32 to vector<4x2xi32>
    %198 = arith.muli %195, %197 : vector<4x2xi32>
    %199 = arith.cmpi sge, %196, %198 : vector<4x2xi32>
    %c2_i32_129 = arith.constant 2 : i32
    %200 = vector.broadcast %c2_i32_129 : i32 to vector<4x2xi32>
    %201 = arith.muli %195, %200 : vector<4x2xi32>
    %c2_i32_130 = arith.constant 2 : i32
    %202 = vector.broadcast %c2_i32_130 : i32 to vector<4x2xi32>
    %203 = arith.addi %201, %202 : vector<4x2xi32>
    %204 = arith.cmpi slt, %196, %203 : vector<4x2xi32>
    %205 = arith.andi %199, %204 : vector<4x2xi1>
    %206 = arith.extui %205 : vector<4x2xi1> to vector<4x2xi32>
    %207 = arith.sitofp %206 : vector<4x2xi32> to vector<4x2xf32>
    %cst_131 = arith.constant dense<0.000000e+00> : vector<2x128xf32>
    %208 = tpu.matmul %194, %181, %cst_131 {dimension_numbers = #tpu.dot_dimension_numbers<[1], [0], [0], [1], [0, 0, 1, 1], [], []>} : vector<2x4xf32>, vector<4x128xf32>, vector<2x128xf32> -> vector<2x128xf32>
    %c0_132 = arith.constant 0 : index
    %c0_133 = arith.constant 0 : index
    %209 = vector.load %arg16[%c0_132, %c0_133] : memref<128x64xf32, #tpu.memory_space<vmem>>, vector<128x64xf32>
    %cst_134 = arith.constant dense<0.000000e+00> : vector<2x64xf32>
    %210 = tpu.matmul %208, %209, %cst_134 {dimension_numbers = #tpu.dot_dimension_numbers<[1], [0], [0], [1], [0, 0, 1, 1], [], []>} : vector<2x128xf32>, vector<128x64xf32>, vector<2x64xf32> -> vector<2x64xf32>
    %c0_135 = arith.constant 0 : index
    %c0_136 = arith.constant 0 : index
    %211 = vector.load %arg17[%c0_135, %c0_136] : memref<64x128xf32, #tpu.memory_space<vmem>>, vector<64x128xf32>
    %cst_137 = arith.constant dense<0.000000e+00> : vector<2x128xf32>
    %212 = tpu.matmul %210, %211, %cst_137 {dimension_numbers = #tpu.dot_dimension_numbers<[1], [0], [0], [1], [0, 0, 1, 1], [], []>} : vector<2x64xf32>, vector<64x128xf32>, vector<2x128xf32> -> vector<2x128xf32>
    %cst_138 = arith.constant dense<0.000000e+00> : vector<4x128xf32>
    %213 = tpu.matmul %207, %212, %cst_138 {dimension_numbers = #tpu.dot_dimension_numbers<[1], [0], [0], [1], [0, 0, 1, 1], [], []>} : vector<4x2xf32>, vector<2x128xf32>, vector<4x128xf32> -> vector<4x128xf32>
    %214 = arith.subf %181, %213 : vector<4x128xf32>
    %215 = arith.mulf %214, %214 : vector<4x128xf32>
    %cst_139 = arith.constant dense<0.000000e+00> : vector<2x128xf32>
    %216 = tpu.matmul %194, %215, %cst_139 {dimension_numbers = #tpu.dot_dimension_numbers<[1], [0], [0], [1], [0, 0, 1, 1], [], []>} : vector<2x4xf32>, vector<4x128xf32>, vector<2x128xf32> -> vector<2x128xf32>
    %c0_140 = arith.constant 0 : index
    %c0_141 = arith.constant 0 : index
    %217 = vector.load %arg16[%c0_140, %c0_141] : memref<128x64xf32, #tpu.memory_space<vmem>>, vector<128x64xf32>
    %cst_142 = arith.constant dense<0.000000e+00> : vector<2x64xf32>
    %218 = tpu.matmul %216, %217, %cst_142 {dimension_numbers = #tpu.dot_dimension_numbers<[1], [0], [0], [1], [0, 0, 1, 1], [], []>} : vector<2x128xf32>, vector<128x64xf32>, vector<2x64xf32> -> vector<2x64xf32>
    %cst_143 = arith.constant 9.99999974E-6 : f32
    %219 = vector.broadcast %cst_143 : f32 to vector<2x64xf32>
    %220 = arith.addf %218, %219 : vector<2x64xf32>
    %221 = math.rsqrt %220 : vector<2x64xf32>
    %c0_144 = arith.constant 0 : index
    %c0_145 = arith.constant 0 : index
    %222 = vector.load %arg18[%c0_144, %c0_145] : memref<1x64xf32, #tpu.memory_space<vmem>>, vector<1x64xf32>
    %223 = vector.broadcast %222 : vector<1x64xf32> to vector<2x64xf32>
    %224 = arith.mulf %221, %223 : vector<2x64xf32>
    %c0_146 = arith.constant 0 : index
    %c0_147 = arith.constant 0 : index
    %225 = vector.load %arg17[%c0_146, %c0_147] : memref<64x128xf32, #tpu.memory_space<vmem>>, vector<64x128xf32>
    %cst_148 = arith.constant dense<0.000000e+00> : vector<2x128xf32>
    %226 = tpu.matmul %224, %225, %cst_148 {dimension_numbers = #tpu.dot_dimension_numbers<[1], [0], [0], [1], [0, 0, 1, 1], [], []>} : vector<2x64xf32>, vector<64x128xf32>, vector<2x128xf32> -> vector<2x128xf32>
    %cst_149 = arith.constant dense<0.000000e+00> : vector<4x128xf32>
    %227 = tpu.matmul %207, %226, %cst_149 {dimension_numbers = #tpu.dot_dimension_numbers<[1], [0], [0], [1], [0, 0, 1, 1], [], []>} : vector<4x2xf32>, vector<2x128xf32>, vector<4x128xf32> -> vector<4x128xf32>
    %228 = arith.mulf %214, %227 : vector<4x128xf32>
    %c0_150 = arith.constant 0 : index
    %c0_151 = arith.constant 0 : index
    %229 = vector.load %arg19[%c0_150, %c0_151] : memref<1x128xf32, #tpu.memory_space<vmem>>, vector<1x128xf32>
    %230 = vector.broadcast %229 : vector<1x128xf32> to vector<4x128xf32>
    %231 = arith.addf %228, %230 : vector<4x128xf32>
    %cst_152 = arith.constant 0.000000e+00 : f32
    %232 = vector.broadcast %cst_152 : f32 to vector<4x128xf32>
    %233 = arith.cmpf ogt, %231, %232 : vector<4x128xf32>
    %cst_153 = arith.constant 2.000000e-01 : f32
    %234 = vector.broadcast %cst_153 : f32 to vector<4x128xf32>
    %235 = arith.mulf %234, %231 : vector<4x128xf32>
    %236 = arith.select %233, %231, %235 : vector<4x128xi1>, vector<4x128xf32>
    %237 = tpu.iota {dimensions = array<i32: 0>} : vector<2x4xi32>
    %238 = tpu.iota {dimensions = array<i32: 1>} : vector<2x4xi32>
    %c2_i32_154 = arith.constant 2 : i32
    %239 = vector.broadcast %c2_i32_154 : i32 to vector<2x4xi32>
    %240 = arith.muli %237, %239 : vector<2x4xi32>
    %c0_i32 = arith.constant 0 : i32
    %241 = vector.broadcast %c0_i32 : i32 to vector<2x4xi32>
    %242 = arith.addi %240, %241 : vector<2x4xi32>
    %243 = arith.cmpi eq, %238, %242 : vector<2x4xi32>
    %244 = arith.extui %243 : vector<2x4xi1> to vector<2x4xi32>
    %245 = arith.sitofp %244 : vector<2x4xi32> to vector<2x4xf32>
    %cst_155 = arith.constant dense<0.000000e+00> : vector<2x128xf32>
    %246 = tpu.matmul %245, %236, %cst_155 {dimension_numbers = #tpu.dot_dimension_numbers<[1], [0], [0], [1], [0, 0, 1, 1], [], []>} : vector<2x4xf32>, vector<4x128xf32>, vector<2x128xf32> -> vector<2x128xf32>
    %247 = arith.truncf %246 : vector<2x128xf32> to vector<2x128xbf16>
    %c0_156 = arith.constant 0 : index
    %c0_157 = arith.constant 0 : index
    %c0_158 = arith.constant 0 : index
    %248 = vector.load %arg22[%c0_156, %c0_157, %c0_158] : memref<2x128x64xbf16, #tpu.memory_space<vmem>>, vector<1x128x64xbf16>
    %249 = vector.shape_cast %248 : vector<1x128x64xbf16> to vector<128x64xbf16>
    %cst_159 = arith.constant dense<0.000000e+00> : vector<2x64xf32>
    %250 = tpu.matmul %247, %249, %cst_159 {dimension_numbers = #tpu.dot_dimension_numbers<[1], [0], [0], [1], [0, 0, 1, 1], [], []>} : vector<2x128xbf16>, vector<128x64xbf16>, vector<2x64xf32> -> vector<2x64xf32>
    %251 = tpu.iota {dimensions = array<i32: 0>} : vector<2x4xi32>
    %252 = tpu.iota {dimensions = array<i32: 1>} : vector<2x4xi32>
    %c2_i32_160 = arith.constant 2 : i32
    %253 = vector.broadcast %c2_i32_160 : i32 to vector<2x4xi32>
    %254 = arith.muli %251, %253 : vector<2x4xi32>
    %c1_i32 = arith.constant 1 : i32
    %255 = vector.broadcast %c1_i32 : i32 to vector<2x4xi32>
    %256 = arith.addi %254, %255 : vector<2x4xi32>
    %257 = arith.cmpi eq, %252, %256 : vector<2x4xi32>
    %258 = arith.extui %257 : vector<2x4xi1> to vector<2x4xi32>
    %259 = arith.sitofp %258 : vector<2x4xi32> to vector<2x4xf32>
    %cst_161 = arith.constant dense<0.000000e+00> : vector<2x128xf32>
    %260 = tpu.matmul %259, %236, %cst_161 {dimension_numbers = #tpu.dot_dimension_numbers<[1], [0], [0], [1], [0, 0, 1, 1], [], []>} : vector<2x4xf32>, vector<4x128xf32>, vector<2x128xf32> -> vector<2x128xf32>
    %261 = arith.truncf %260 : vector<2x128xf32> to vector<2x128xbf16>
    %c1_162 = arith.constant 1 : index
    %c0_163 = arith.constant 0 : index
    %c0_164 = arith.constant 0 : index
    %262 = vector.load %arg22[%c1_162, %c0_163, %c0_164] : memref<2x128x64xbf16, #tpu.memory_space<vmem>>, vector<1x128x64xbf16>
    %263 = vector.shape_cast %262 : vector<1x128x64xbf16> to vector<128x64xbf16>
    %cst_165 = arith.constant dense<0.000000e+00> : vector<2x64xf32>
    %264 = tpu.matmul %261, %263, %cst_165 {dimension_numbers = #tpu.dot_dimension_numbers<[1], [0], [0], [1], [0, 0, 1, 1], [], []>} : vector<2x128xbf16>, vector<128x64xbf16>, vector<2x64xf32> -> vector<2x64xf32>
    %265 = arith.addf %250, %264 : vector<2x64xf32>
    %c0_166 = arith.constant 0 : index
    %c0_167 = arith.constant 0 : index
    %266 = vector.load %arg1[%c0_166, %c0_167] : memref<2x10xbf16, #tpu.memory_space<vmem>>, vector<2x10xbf16>
    %c0_168 = arith.constant 0 : index
    %c0_169 = arith.constant 0 : index
    %267 = vector.load %arg20[%c0_168, %c0_169] : memref<10x256xbf16, #tpu.memory_space<vmem>>, vector<10x256xbf16>
    %cst_170 = arith.constant dense<0.000000e+00> : vector<2x256xf32>
    %268 = tpu.matmul %266, %267, %cst_170 {dimension_numbers = #tpu.dot_dimension_numbers<[1], [0], [0], [1], [0, 0, 1, 1], [], []>} : vector<2x10xbf16>, vector<10x256xbf16>, vector<2x256xf32> -> vector<2x256xf32>
    %c0_171 = arith.constant 0 : index
    %c0_172 = arith.constant 0 : index
    %269 = vector.load %arg21[%c0_171, %c0_172] : memref<1x256xf32, #tpu.memory_space<vmem>>, vector<1x256xf32>
    %270 = vector.broadcast %269 : vector<1x256xf32> to vector<2x256xf32>
    %271 = arith.addf %268, %270 : vector<2x256xf32>
    %272 = arith.truncf %271 : vector<2x256xf32> to vector<2x256xbf16>
    %c0_173 = arith.constant 0 : index
    %c0_174 = arith.constant 0 : index
    %273 = vector.load %arg23[%c0_173, %c0_174] : memref<256x64xbf16, #tpu.memory_space<vmem>>, vector<256x64xbf16>
    %cst_175 = arith.constant dense<0.000000e+00> : vector<2x64xf32>
    %274 = tpu.matmul %272, %273, %cst_175 {dimension_numbers = #tpu.dot_dimension_numbers<[1], [0], [0], [1], [0, 0, 1, 1], [], []>} : vector<2x256xbf16>, vector<256x64xbf16>, vector<2x64xf32> -> vector<2x64xf32>
    %275 = arith.addf %265, %274 : vector<2x64xf32>
    %c0_176 = arith.constant 0 : index
    %c0_177 = arith.constant 0 : index
    %276 = vector.load %arg24[%c0_176, %c0_177] : memref<1x64xf32, #tpu.memory_space<vmem>>, vector<1x64xf32>
    %277 = vector.broadcast %276 : vector<1x64xf32> to vector<2x64xf32>
    %278 = arith.addf %275, %277 : vector<2x64xf32>
    %cst_178 = arith.constant 0.000000e+00 : f32
    %279 = vector.broadcast %cst_178 : f32 to vector<2x64xf32>
    %280 = arith.cmpf ogt, %278, %279 : vector<2x64xf32>
    %cst_179 = arith.constant 2.000000e-01 : f32
    %281 = vector.broadcast %cst_179 : f32 to vector<2x64xf32>
    %282 = arith.mulf %281, %278 : vector<2x64xf32>
    %283 = arith.select %280, %278, %282 : vector<2x64xi1>, vector<2x64xf32>
    %284 = arith.truncf %283 : vector<2x64xf32> to vector<2x64xbf16>
    %c0_180 = arith.constant 0 : index
    %c0_181 = arith.constant 0 : index
    %285 = vector.load %arg25[%c0_180, %c0_181] : memref<64x1xbf16, #tpu.memory_space<vmem>>, vector<64x1xbf16>
    %cst_182 = arith.constant dense<0.000000e+00> : vector<2x1xf32>
    %286 = tpu.matmul %284, %285, %cst_182 {dimension_numbers = #tpu.dot_dimension_numbers<[1], [0], [0], [1], [0, 0, 1, 1], [], []>} : vector<2x64xbf16>, vector<64x1xbf16>, vector<2x1xf32> -> vector<2x1xf32>
    %c0_183 = arith.constant 0 : index
    %c0_184 = arith.constant 0 : index
    %287 = vector.load %arg26[%c0_183, %c0_184] : memref<1x1xf32, #tpu.memory_space<vmem>>, vector<1x1xf32>
    %288 = vector.broadcast %287 : vector<1x1xf32> to vector<2x1xf32>
    %289 = arith.addf %286, %288 : vector<2x1xf32>
    %c0_185 = arith.constant 0 : index
    %c0_186 = arith.constant 0 : index
    %290 = vector.load %arg27[%c0_185, %c0_186] : memref<2x1xf32, #tpu.memory_space<vmem>>, vector<2x1xf32>
    tpu.vector_store %arg27[%c0_185, %c0_186], %289 {strides = array<i32>} : memref<2x1xf32, #tpu.memory_space<vmem>>, vector<2x1xf32>,
    return
  }
}

</mosaic_0001>

<bundles_post_ra>
// kernel: tpu_custom_call.1
= control target key start
LH: loop header
LB: loop body
LE: loop exit
PB: predicated region body
PF: predicated region fallthrough
CT: control target
= control target key end

     0   :  { %vm131_vm0 = vcmask 457728   ;;  %vm138_vm1 = vcmask 1043456   ;;  %vm7905_vm2 = vcmask 1045504   ;;  %v6179_v16 = vmov 0   ;;  %s7868_s0 = inlined_call_operand.vmem [shape: bf16[56,28], index: 0, kind: input, shape index: {}]   ;;  %s7869_s2 = inlined_call_operand.vmem [shape: bf16[3,26,56], index: 2, kind: input, shape index: {}]   ;;  %s7870_s3 = inlined_call_operand.vmem [shape: bf16[3,28,208], index: 3, kind: input, shape index: {}]   ;;  %s7871_s4 = inlined_call_operand.vmem [shape: f32[208,16], index: 4, kind: input, shape index: {}]   ;;  %s7872_s5 = inlined_call_operand.vmem [shape: f32[16,208], index: 5, kind: input, shape index: {}]   ;;  %s7873_s6 = inlined_call_operand.vmem [shape: f32[1,16], index: 6, kind: input, shape index: {}]   ;;  %s7874_s8 = inlined_call_operand.vmem [shape: bf16[3,12,26], index: 8, kind: input, shape index: {}]   ;;  %s7875_s9 = inlined_call_operand.vmem [shape: bf16[3,208,192], index: 9, kind: input, shape index: {}]   ;;  %s7876_s7 = inlined_call_operand.vmem [shape: f32[1,208], index: 7, kind: input, shape index: {}]   ;;  %s7877_s10 = inlined_call_operand.vmem [shape: f32[192,32], index: 10, kind: input, shape index: {}]   ;;  %s7878_s11 = inlined_call_operand.vmem [shape: f32[32,192], index: 11, kind: input, shape index: {}]   ;;  %s7879_s12 = inlined_call_operand.vmem [shape: f32[1,32], index: 12, kind: input, shape index: {}]   ;;  %s7880_s15 = inlined_call_operand.vmem [shape: bf16[3,192,128], index: 15, kind: input, shape index: {}]   ;;  %s7881_s13 = inlined_call_operand.vmem [shape: f32[1,192], index: 13, kind: input, shape index: {}]   ;;  %s7882_s14 = inlined_call_operand.vmem [shape: bf16[3,4,12], index: 14, kind: input, shape index: {}]   ;;  %s7883_s16 = inlined_call_operand.vmem [shape: f32[128,64], index: 16, kind: input, shape index: {}]   ;;  %s7884_s17 = inlined_call_operand.vmem [shape: f32[64,128], index: 17, kind: input, shape index: {}]   ;;  %s7885_s18 = inlined_call_operand.vmem [shape: f32[1,64], index: 18, kind: input, shape index: {}]   ;;  %s7886_s22 = inlined_call_operand.vmem [shape: bf16[2,128,64], index: 22, kind: input, shape index: {}]   ;;  %s7887_s19 = inlined_call_operand.vmem [shape: f32[1,128], index: 19, kind: input, shape index: {}]   ;;  %s7888_s20 = inlined_call_operand.vmem [shape: bf16[10,256], index: 20, kind: input, shape index: {}]   ;;  %s7889_s23 = inlined_call_operand.vmem [shape: bf16[256,64], index: 23, kind: input, shape index: {}]   ;;  %s7890_s1 = inlined_call_operand.vmem [shape: bf16[2,10], index: 1, kind: input, shape index: {}]   ;;  %s7891_s25 = inlined_call_operand.vmem [shape: bf16[64,1], index: 25, kind: input, shape index: {}]   ;;  %s7892_s21 = inlined_call_operand.vmem [shape: f32[1,256], index: 21, kind: input, shape index: {}]   ;;  %s7893_s26 = inlined_call_operand.<no memory space> [shape: f32[1,1], index: 26, kind: input, shape index: {}]   ;;  %s7894_s24 = inlined_call_operand.vmem [shape: f32[1,64], index: 24, kind: input, shape index: {}]   ;;  %s7895_s27 = inlined_call_operand.vmem [shape: f32[2,1], index: 27, kind: output, shape index: {}]  }
   0x1   :  { %7906 = sst [smem:[#allocation3_spill]] %s7868_s0  ;;  %vm292_vm3 = vcmask 228352   ;;  %v6180_v45 = vmov 0.0   ;;  %v6181_v46 = vmov 0.0|0.0   ;;  %vm650_vm4 = vcmask 1041408  }
   0x2   :  { %7907 = sst [smem:[#allocation4_spill]] %s7869_s2  ;;  %vm6182_vm7 = vmmov 1   ;;  %vm646_vm10 = vcmask 211968   ;;  %vm754_vm11 = vcmask 654336   ;;  %vm832_vm12 = vcmask 130048  }
   0x3   :  { %7908 = sst [smem:[#allocation5_spill]] %s7870_s3  ;;  %s7919_s29 = sld [smem:[#allocation4_spill]]  ;;  %vm6571_vm8 = vmpackc.low %vm650_vm4, %vm6182_vm7 }
   0x4   :  { %7909 = sst [smem:[#allocation6_spill]] %s7871_s4 }
   0x5   :  { %7910 = sst [smem:[#allocation7_spill]] %s7872_s5  ;;  %s7920_s5 = sld [smem:[#allocation5_spill]] }
   0x6   :  { %7911 = sst [smem:[#allocation8_spill]] %s7873_s6  ;;  %s7921_s6 = sld [smem:[#allocation6_spill]] }
   0x7   :  { %7912 = sst [smem:[#allocation9_spill]] %s7874_s8  ;;  %s7925_s8 = sld [smem:[#allocation8_spill]] }
   0x8   :  { %7913 = sst [smem:[#allocation10_spill]] %s7875_s9 }
   0x9   :  { %7914 = sst [smem:[#allocation11_spill]] %s7876_s7  ;;  %v5954_v3 = vld [vmem:[%s7919_s29 + $0x10] sm:$0xff]   ;;  %v5956_v4 = vld [vmem:[%s7919_s29] sm:$0xff]   ;;  %v5955_v8 = vld [vmem:[%s7919_s29 + $0x18] sm:$0x1f]   ;;  %s7928_s0 = sld [smem:[#allocation10_spill]] }
   0xa   :  { %7915 = sst [smem:[#allocation12_spill]] %s7877_s10  ;;  %s7918_s7 = sld [smem:[#allocation3_spill]]  ;;  %5426 = vmatprep.mubr.msk.bf16.mxu1 %vm131_vm0, %v5954_v3  ;;  %5414 = vmatprep.mubr.msk.bf16.mxu0 %vm131_vm0, %v5956_v4  ;;  %v5957_v9 = vld [vmem:[%s7919_s29 + $0x8] sm:$0x1f]   ;;  %v5958_v10 = vld [vmem:[%s7919_s29 + $0x20] sm:$0xff]  }
   0xb   :  { %7916 = sst [smem:[#allocation13_spill]] %s7878_s11  ;;  %v5962_v6 = vld [vmem:[%s7920_s5 + $0x24] ss:$8 sps:$4 sm:$0xff]   ;;  %v5960_v11 = vld [vmem:[%s7920_s5 + $0x20] ss:$8 sps:$4 sm:$0xff]   ;;  %s7926_s4 = sld [smem:[#allocation11_spill]] }
   0xc   :  { %7917 = sst [smem:[#allocation14_spill]] %s7879_s12  ;;  %v5959_v12 = vld [vmem:[%s7919_s29 + $0x28] sm:$0x1f]   ;;  %v5963_v13 = vld [vmem:[%s7920_s5 + $0x34] ss:$8 sps:$4 sm:$0x3f]  }
   0xd   :  { %v5965_v14 = vld [vmem:[%s7920_s5 + $0x30] ss:$8 sps:$4 sm:$0x3f]   ;;  %v5968_v17 = vld [vmem:[%s7920_s5 + $0x4] ss:$8 sps:$4 sm:$0xff]   ;;  %s7924_s29 = sld [smem:[#allocation7_spill]] }
   0xe   :  { %v301_v15 = vsel %vm7905_vm2, %v5965_v14, 0  ;;  %v5966_v26 = vld [vmem:[%s7920_s5] ss:$8 sps:$4 sm:$0xff]   ;;  %v5969_v31 = vld [vmem:[%s7920_s5 + $0x14] ss:$8 sps:$4 sm:$0x3f]  }
   0xf   :  { %v5971_v32 = vld [vmem:[%s7920_s5 + $0x10] ss:$8 sps:$4 sm:$0x3f]   ;;  %v5974_v34 = vld [vmem:[%s7920_s5 + $0x44] ss:$8 sps:$4 sm:$0xff]   ;;  %s7932_s10 = sld [smem:[#allocation13_spill]] }
  0x10   :  { %v5950_v0 = vld [vmem:[%s7918_s7] sm:$0xff]   ;;  %v5951_v1 = vld [vmem:[%s7918_s7 + $0x8] sm:$0xff]   ;;  %v5952_v2 = vld [vmem:[%s7918_s7 + $0x10] sm:$0xff]   ;;  %v384_v33 = vsel %vm7905_vm2, %v5971_v32, 0 }
  0x11   :  { %5418 = vmatprep.subr.bf16.mxu1 %v5950_v0  ;;  %5406 = vmatprep.subr.bf16.mxu0 %v5950_v0  ;;  %v5953_v5 = vld [vmem:[%s7918_s7 + $0x18] ss:$0 sps:$4 sm:$0xff]   ;;  %v5972_v38 = vld [vmem:[%s7920_s5 + $0x40] ss:$8 sps:$4 sm:$0xff]   ;;  %v730_v49 = vld [vmem:[%s7921_s6 + $0x10] sm:$0xff]  ;;  %s7933_s7 = sld [smem:[#allocation14_spill]] }
  0x12   :  { %5419 = vmatpush3.bf16.msra.mxu1 %v5950_v0  ;;  %5407 = vmatpush3.bf16.msra.mxu0 %v5950_v0  ;;  %v140_v7 = vsel %vm138_vm1, %v5953_v5, 0  ;;  %v5975_v42 = vld [vmem:[%s7920_s5 + $0x54] ss:$8 sps:$4 sm:$0x3f]   ;;  %v728_v47 = vld [vmem:[%s7921_s6] sm:$0xff]  ;;  %v729_v48 = vld [vmem:[%s7921_s6 + $0x8] sm:$0xff] }
  0x13   :  { %5420 = vmatprep.subr.bf16.mxu1 %v5951_v1  ;;  %5408 = vmatprep.subr.bf16.mxu0 %v5951_v1  ;;  %v5977_v43 = vld [vmem:[%s7920_s5 + $0x50] ss:$8 sps:$4 sm:$0x3f]   ;;  %v6429_v50 = vpack.c.bf16 %v729_v48, %v728_v47  ;;  %v732_v53 = vld [vmem:[%s7921_s6 + $0x20] sm:$0xff]  ;;  %v733_v54 = vld [vmem:[%s7921_s6 + $0x28] sm:$0xff] }
  0x14   :  { %v544_v44 = vsel %vm7905_vm2, %v5977_v43, 0  ;;  %v731_v51 = vld [vmem:[%s7921_s6 + $0x18] sm:$0xff]  ;;  %v6445_v55 = vpack.c.bf16 %v733_v54, %v732_v53  ;;  %v734_v56 = vld [vmem:[%s7921_s6 + $0x30] sm:$0xff]  ;;  %v736_v59 = vld [vmem:[%s7921_s6 + $0x40] sm:$0xff] }
  0x15   :  { %v6435_v52 = vpack.c.bf16 %v731_v51, %v730_v49  ;;  %v735_v57 = vld [vmem:[%s7921_s6 + $0x38] sm:$0xff]  ;;  %v737_v60 = vld [vmem:[%s7921_s6 + $0x48] sm:$0xff]  ;;  %v738_v62 = vld [vmem:[%s7921_s6 + $0x50] sm:$0xff] }
  0x16   :  { %5421 = vmatpush3.bf16.msra.mxu1 %v5951_v1  ;;  %5409 = vmatpush3.bf16.msra.mxu0 %v5951_v1  ;;  %v6455_v58 = vpack.c.bf16 %v735_v57, %v734_v56  ;;  %v6465_v61 = vpack.c.bf16 %v737_v60, %v736_v59  ;;  %v739_v63 = vld [vmem:[%s7921_s6 + $0x58] sm:$0xff]  ;;  %v742_v4 = vld [vmem:[%s7921_s6 + $0x70] sm:$0xff]  ;;  %v749_v14 = vld [vmem:[%s7921_s6 + $0xa8] sm:$0xff] }
  0x17   :  { %5422 = vmatprep.subr.bf16.mxu1 %v5952_v2  ;;  %5410 = vmatprep.subr.bf16.mxu0 %v5952_v2  ;;  %v831_v43 = vld [vmem:[%s7924_s29 + $0x18] sm:$0xff]  ;;  %v830_v48 = vld [vmem:[%s7924_s29 + $0x10] sm:$0xff] }
  0x1a   :  { %5423 = vmatpush3.bf16.msra.mxu1 %v5952_v2  ;;  %5411 = vmatpush3.bf16.msra.mxu0 %v5952_v2 }
  0x1b   :  { %5943 = vmatprep.subr.msk.bf16.mxu1 %vm138_vm1, %v5953_v5  ;;  %5942 = vmatprep.subr.msk.bf16.mxu0 %vm138_vm1, %v5953_v5 }
  0x1e   :  { %5425 = vmatpush3.bf16.msra.mxu1 %v140_v7  ;;  %5413 = vmatpush3.bf16.msra.mxu0 %v140_v7 }
  0x1f   :  { %5430 = vmatprep.subr.bf16.mxu1 %v5950_v0  ;;  %306 = vmatprep.subr.bf16.mxu0 %v5962_v6 }
  0x21   :  { %5427 = vmatmul.mubr.msk.bf16.vlgmr.msra.gmra.mrb[0].mxu1 %vm131_vm0, %v5955_v8  ;;  %5415 = vmatmul.mubr.msk.bf16.vlgmr.msra.gmra.mrb[0].mxu0 %vm131_vm0, %v5957_v9  ;;  %v745_v8 = vld [vmem:[%s7921_s6 + $0x88] sm:$0xff] }
  0x22   :  { %5431 = vmatpush3.bf16.msra.mxu1 %v5950_v0  ;;  %5438 = vmatprep.mubr.msk.bf16.mxu1 %vm131_vm0, %v5958_v10  ;;  %v6475_v0 = vpack.c.bf16 %v739_v63, %v738_v62  ;;  %v746_v10 = vld [vmem:[%s7921_s6 + $0x90] sm:$0xff] }
  0x23   :  { %5432 = vmatprep.subr.bf16.mxu1 %v5951_v1  ;;  %307 = vmatpush1.bf16.msra.mxu0 %v5960_v11  ;;  %v747_v11 = vld [vmem:[%s7921_s6 + $0x98] sm:$0xff] }
  0x24   :  { %4880 = vmatprep.subr.msk.bf16.mxu0 %vm7905_vm2, %v5963_v13  ;;  %338 = vmatprep.mubr.bf16.mxu0 %v6179_v16  ;;  %v748_v13 = vld [vmem:[%s7921_s6 + $0xa0] sm:$0xff] }
  0x26   :  { %5433 = vmatpush3.bf16.msra.mxu1 %v5951_v1  ;;  %v740_v1 = vld [vmem:[%s7921_s6 + $0x60] sm:$0xff] }
  0x27   :  { %5434 = vmatprep.subr.bf16.mxu1 %v5952_v2  ;;  %309 = vmatpush1.bf16.msra.mxu0 %v301_v15  ;;  %v6525_v15 = vpack.c.bf16 %v749_v14, %v748_v13 }
  0x28   :  { %389 = vmatprep.subr.bf16.mxu0 %v5968_v17  ;;  %v750_v17 = vld [vmem:[%s7921_s6 + $0xb0] sm:$0xff] }
  0x2a   :  { %5435 = vmatpush3.bf16.msra.mxu1 %v5952_v2  ;;  %v741_v2 = vld [vmem:[%s7921_s6 + $0x68] sm:$0xff] }
  0x2b   :  { %5944 = vmatprep.subr.msk.bf16.mxu1 %vm138_vm1, %v5953_v5  ;;  %v6485_v3 = vpack.c.bf16 %v741_v2, %v740_v1  ;;  %v743_v5 = vld [vmem:[%s7921_s6 + $0x78] sm:$0xff] }
  0x2c   :  { %v6495_v6 = vpack.c.bf16 %v743_v5, %v742_v4 }
  0x2e   :  { %5437 = vmatpush3.bf16.msra.mxu1 %v140_v7  ;;  %v744_v7 = vld [vmem:[%s7921_s6 + $0x80] sm:$0xff] }
  0x2f   :  { %5642 = vmatprep.subr.bf16.mxu1 %v6181_v46  ;;  %v6505_v9 = vpack.c.bf16 %v745_v8, %v744_v7 }
  0x31   :  { %5439 = vmatmul.mubr.msk.bf16.vlgmr.msra.gmra.mrb[4].mxu1 %vm131_vm0, %v5959_v12  ;;  %v6515_v12 = vpack.c.bf16 %v747_v11, %v746_v10 }
  0x32   :  { %5644 = vmatpush1.bf16.msra.mxu1 %v6429_v50 }
  0x33   :  { %5645 = vmatprep.subr.bf16.mxu1 %v6181_v46 }
  0x36   :  { %5647 = vmatpush1.bf16.msra.mxu1 %v6435_v52 }
  0x37   :  { %5648 = vmatprep.subr.bf16.mxu1 %v6181_v46 }
  0x3a   :  { %5650 = vmatpush1.bf16.msra.mxu1 %v6445_v55 }
  0x3b   :  { %5651 = vmatprep.subr.bf16.mxu1 %v6181_v46 }
  0x3e   :  { %5653 = vmatpush1.bf16.msra.mxu1 %v6455_v58 }
  0x3f   :  { %5654 = vmatprep.subr.bf16.mxu1 %v6181_v46 }
  0x42   :  { %5656 = vmatpush1.bf16.msra.mxu1 %v6465_v61 }
  0x43   :  { %5657 = vmatprep.subr.bf16.mxu1 %v6181_v46 }
  0x46   :  { %5659 = vmatpush1.bf16.msra.mxu1 %v6475_v0 }
  0x47   :  { %5660 = vmatprep.subr.bf16.mxu1 %v6181_v46 }
  0x4a   :  { %5662 = vmatpush1.bf16.msra.mxu1 %v6485_v3 }
  0x4b   :  { %5663 = vmatprep.subr.bf16.mxu1 %v6181_v46 }
  0x4e   :  { %5665 = vmatpush1.bf16.msra.mxu1 %v6495_v6 }
  0x4f   :  { %5666 = vmatprep.subr.bf16.mxu1 %v6181_v46 }
  0x52   :  { %5668 = vmatpush1.bf16.msra.mxu1 %v6505_v9 }
  0x53   :  { %5669 = vmatprep.subr.bf16.mxu1 %v6181_v46 }
  0x56   :  { %5671 = vmatpush1.bf16.msra.mxu1 %v6515_v12 }
  0x57   :  { %5672 = vmatprep.subr.bf16.mxu1 %v6181_v46 }
  0x5a   :  { %5674 = vmatpush1.bf16.msra.mxu1 %v6525_v15 }
  0x5b   :  { %5675 = vmatprep.subr.bf16.mxu1 %v6181_v46 }
  0xf4   :  { %v5428_v18 = vpop.f32.mrb[0].mxu1  ;;  %v5416_v19 = vpop.f32.mrb[0].mxu0 }
  0xf5   :  { %v252_v20 = vpop.f32.mrb[1].mxu1  ;;  %v176_v21 = vpop.f32.mrb[1].mxu0 }
  0xf6   :  { %v5429_v22 = vpop.f32.mrb[2].mxu1  ;;  %v5417_v23 = vpop.f32.mrb[2].mxu0 }
  0xf7   :  { %v268_v24 = vpack.c.bf16 %v5429_v22, %v5428_v18  ;;  %v255_v25 = vpop.f32.mrb[3].mxu1  ;;  %v192_v27 = vpack.c.bf16 %v5417_v23, %v5416_v19  ;;  %v179_v28 = vpop.f32.mrb[3].mxu0  ;;  %v751_v18 = vld [vmem:[%s7921_s6 + $0xb8] sm:$0xff] }
  0xf8   :  { %v267_v29 = vpack.c.bf16 %v255_v25, %v252_v20  ;;  %v191_v30 = vpack.c.bf16 %v179_v28, %v176_v21  ;;  %v6535_v19 = vpack.c.bf16 %v751_v18, %v750_v17  ;;  %v610_v20 = vlaneseq }
  0xfa   :  { %4881 = vmatmul.mubr.msk.bf16.vlgmr.msra.gmra.mrb[4].mxu0 %vm292_vm3, %v267_v29  ;;  %5677 = vmatpush1.bf16.msra.mxu1 %v6535_v19  ;;  %v6540_v21 = vshrl.u32 %v610_v20, 7  ;;  %v6555_v29 = vand.u32 127, %v610_v20 }
  0xfb   :  { %348 = vmatprep.mubr.bf16.mxu0 %v6179_v16  ;;  %390 = vmatpush1.bf16.msra.mxu0 %v5966_v26 }
  0xfc   :  { %4887 = vmatprep.subr.msk.bf16.mxu0 %vm7905_vm2, %v5969_v31  ;;  %5678 = vmatprep.subr.bf16.mxu1 %v6181_v46  ;;  %v624_v57 = vmul.u32 13, %v6555_v29  ;;  %v6616_v60 = vadd.s32 8, %v6540_v21  ;;  %v622_v62 = vadd.s32 16, %v6540_v21  ;;  %v623_v4 = vadd.s32 24, %v6540_v21 }
  0xfe   :  { %v629_v59 = vadd.s32 13, %v624_v57  ;;  %vm625_vm13 = vcmp.ge.s32.totalorder %v6540_v21, %v624_v57  ;;  %vm626_vm0 = vcmp.ge.s32.totalorder %v6616_v60, %v624_v57 }
  0xff   :  { %392 = vmatpush1.bf16.msra.mxu0 %v384_v33 }
 0x100   :  { %549 = vmatprep.subr.bf16.mxu0 %v5974_v34  ;;  %vm630_vm14 = vcmp.lt.s32.totalorder %v6540_v21, %v629_v59 }
 0x101   :  { %vm634_vm15 = vmand %vm625_vm13, %vm630_vm14  ;;  %vm628_vm14 = vcmp.ge.s32.totalorder %v623_v4, %v624_v57 }
 0x102   :  { %4882 = vmatmul.mubr.msk.bf16.gmra.mrb[8].mxu0 %vm292_vm3, %v268_v24  ;;  %v614_v24 = vmul.u32 13, %v6540_v21  ;;  %v6622_v2 = vsel %vm634_vm15, 1.0, %v6180_v45  ;;  %vm633_vm15 = vcmp.lt.s32.totalorder %v623_v4, %v629_v59 }
 0x103   :  { %421 = vmatprep.mubr.bf16.mxu0 %v6179_v16 }
 0x104   :  { %v5440_v35 = vpop.f32.mrb[4].mxu1  ;;  %vm615_vm5 = vcmp.ge.s32.totalorder %v6555_v29, %v614_v24 }
 0x105   :  { %v497_v36 = vpop.f32.mrb[5].mxu1 }
 0x106   :  { %v5441_v37 = vpop.f32.mrb[6].mxu1 }
 0x107   :  { %v513_v39 = vpack.c.bf16 %v5441_v37, %v5440_v35  ;;  %v500_v40 = vpop.f32.mrb[7].mxu1 }
 0x108   :  { %v512_v41 = vpack.c.bf16 %v500_v40, %v497_v36  ;;  %v753_v40 = vld [vmem:[%s7921_s6 + $0xc8] sm:$0xff] }
 0x10a   :  { %4888 = vmatmul.mubr.msk.bf16.vlgmr.msra.gmra.mrb[4].mxu0 %vm292_vm3, %v191_v30  ;;  %v616_v30 = vadd.s32 13, %v614_v24 }
 0x10b   :  { %431 = vmatprep.mubr.bf16.mxu0 %v6179_v16  ;;  %550 = vmatpush1.bf16.msra.mxu0 %v5972_v38 }
 0x10c   :  { %4906 = vmatprep.subr.msk.bf16.mxu0 %vm7905_vm2, %v5975_v42  ;;  %vm617_vm6 = vcmp.lt.s32.totalorder %v6555_v29, %v616_v30  ;;  %v829_v42 = vld [vmem:[%s7924_s29 + $0x8] sm:$0xff]  ;;  %vm632_vm2 = vcmp.lt.s32.totalorder %v622_v62, %v629_v59 }
 0x10d   :  { %vm618_vm9 = vmand %vm615_vm5, %vm617_vm6  ;;  %v5681_v47 = vpack.c.bf16 %v831_v43, %v829_v42  ;;  %vm907_vm5 = vcmask 15360  }
 0x10e   :  { %v6582_v38 = vsel %vm618_vm9, 1.0, %v6180_v45  ;;  %vm627_vm9 = vcmp.ge.s32.totalorder %v622_v62, %v624_v57 }
 0x10f   :  { %552 = vmatpush1.bf16.msra.mxu0 %v544_v44  ;;  %v828_v44 = vld [vmem:[%s7924_s29] sm:$0xff]  ;;  %vm636_vm13 = vmand %vm627_vm9, %vm632_vm2  ;;  %s7927_s29 = sld [smem:[#allocation9_spill]] }
 0x110   :  { %v5683_v49 = vpack.c.bf16 %v830_v48, %v828_v44  ;;  %v6637_v7 = vsel %vm636_vm13, 1.0, %v6180_v45 }
 0x112   :  { %4889 = vmatmul.mubr.msk.bf16.gmra.mrb[8].mxu0 %vm292_vm3, %v192_v27 }
 0x113   :  { %581 = vmatprep.mubr.bf16.mxu0 %v6179_v16 }
 0x11a   :  { %4907 = vmatmul.mubr.msk.bf16.vlgmr.msra.gmra.mrb[4].mxu0 %vm292_vm3, %v512_v41 }
 0x11b   :  { %591 = vmatprep.mubr.bf16.mxu0 %v6179_v16 }
 0x122   :  { %4908 = vmatmul.mubr.msk.bf16.gmra.mrb[8].mxu0 %vm292_vm3, %v513_v39  ;;  %v752_v39 = vld [vmem:[%s7921_s6 + $0xc0] sm:$0xff]  ;;  %vm631_vm3 = vcmp.lt.s32.totalorder %v6616_v60, %v629_v59 }
 0x123   :  { %721 = vmatprep.mubr.f32.mxu0 %v6180_v45  ;;  %v6593_v41 = vpack.c.bf16 %v753_v40, %v752_v39  ;;  %vm635_vm6 = vmand %vm626_vm0, %vm631_vm3 }
 0x124   :  { %v6631_v5 = vsel %vm635_vm6, 1.0, %v6180_v45  ;;  %vm637_vm0 = vmand %vm628_vm14, %vm633_vm15  ;;  %vm1425_vm15 = vcmask 1044480  }
 0x125   :  { %5680 = vmatpush1.bf16.msra.mxu1 %v6593_v41  ;;  %v6643_v8 = vsel %vm637_vm0, 1.0, %v6180_v45  ;;  %vm7058_vm0 = vmpackc.low %vm138_vm1, %vm6182_vm7  ;;  %vm2220_vm7 = vcmask 97280  }
 0x126   :  { %5735 = vmatprep.subr.bf16.mxu1 %v5681_v47 }
 0x1ed   :  { %v6542_v22 = vpop.f32.mrb[4].mxu0 }
 0x1ee   :  { %v6544_v23 = vpop.f32.mrb[5].mxu0 }
 0x1ef   :  { %v6547_v25 = vpop.f32.mrb[6].mxu0 }
 0x1f0   :  { %v5634_v26 = vpack.c.bf16 %v6547_v25, %v6542_v22  ;;  %v6551_v27 = vpop.f32.mrb[7].mxu0 }
 0x1f1   :  { %v5632_v28 = vpack.c.bf16 %v6551_v27, %v6544_v23 }
 0x1f3   :  { %5633 = vmatprep.subr.bf16.mxu0 %v5632_v28 }
 0x1f4   :  { %5635 = vmatpush1.bf16.msra.mxu0 %v5634_v26 }
 0x1f5   :  { %v6557_v31 = vpop.f32.mrb[8].mxu0 }
 0x1f6   :  { %v6559_v32 = vpop.f32.mrb[9].mxu0 }
 0x1f7   :  { %v6563_v33 = vpop.f32.mrb[10].mxu0 }
 0x1f8   :  { %v5639_v34 = vpack.c.bf16 %v6563_v33, %v6557_v31  ;;  %v6567_v35 = vpop.f32.mrb[11].mxu0 }
 0x1f9   :  { %v5636_v37 = vpack.c.bf16 %v6567_v35, %v6559_v32 }
 0x1fb   :  { %5638 = vmatprep.subr.msk.bf16.mxu0 %vm6571_vm8, %v5636_v37 }
 0x1fc   :  { %5641 = vmatpush1.bf16.msk.msra.mxu0 %vm6571_vm8, %v5639_v34 }
 0x1fd   :  { %5682 = vmatprep.subr.bf16.mxu0 %v5681_v47 }
 0x1ff   :  { %4916 = vmatmul.mubr.msk.f32.vlgmr.msra.gmra.mrb[12].mxu0 %vm646_vm10, %v6582_v38 }
 0x200   :  { %900 = vmatprep.mubr.f32.mxu0 %v6180_v45  ;;  %5684 = vmatpush1.bf16.msra.mxu0 %v5683_v49 }
 0x2d2   :  { %v723_v51 = vpop.f32.mrb[12].mxu0 }
 0x2d3   :  { %v725_v53 = vpop.f32.mrb[13].mxu0 }
 0x2d4   :  { %4917 = vmatprep.mubr.msk.f32.mxu1 %vm754_vm11, %v725_v53 }
 0x2d5   :  { %823 = vmatmul.mubr.f32.vlgmr.msra.gmra.mrb[8].mxu1 %v723_v51 }
 0x2d6   :  { %5737 = vmatpush1.bf16.msra.mxu1 %v5683_v49  ;;  %1257 = vmatprep.mubr.f32.mxu1 %v6180_v45 }
 0x3a8   :  { %v824_v54 = vpop.f32.mrb[8].mxu1 }
 0x3a9   :  { %v826_v56 = vpop.f32.mrb[9].mxu1  ;;  %4918 = vmatmul.mubr.msk.f32.vlgmr.msra.gmra.mrb[14].mxu0 %vm832_vm12, %v824_v54 }
 0x3aa   :  { %990 = vmatprep.mubr.f32.mxu0 %v6180_v45 }
 0x47c   :  { %v902_v63 = vpop.f32.mrb[14].mxu0 }
 0x47d   :  { %v904_v1 = vpop.f32.mrb[15].mxu0 }
 0x47e   :  { %4919 = vmatprep.subr.msk.mxu0 %vm650_vm4, %v904_v1 }
 0x47f   :  { %4920 = vmatpush1.msk.msra.mxu0 %vm650_vm4, %v902_v63 }
 0x480   :  { %4921 = vmatmul.mubr.msk.f32.vlgmr.msra.gmra.mrb[16].mxu0 %vm907_vm5, %v6622_v2 }
 0x481   :  { %996 = vmatprep.mubr.f32.mxu0 %v6180_v45 }
 0x484   :  { %4922 = vmatmul.mubr.msk.f32.gmra.mrb[18].mxu0 %vm907_vm5, %v6631_v5 }
 0x485   :  { %1002 = vmatprep.mubr.f32.mxu0 %v6180_v45 }
 0x488   :  { %4923 = vmatmul.mubr.msk.f32.gmra.mrb[20].mxu0 %vm907_vm5, %v6637_v7 }
 0x489   :  { %1008 = vmatprep.mubr.f32.mxu0 %v6180_v45 }
 0x48c   :  { %4924 = vmatmul.mubr.msk.f32.gmra.mrb[22].mxu0 %vm907_vm5, %v6643_v8 }
 0x48d   :  { %1101 = vmatprep.mubr.f32.mxu0 %v6180_v45 }
 0x553   :  { %v992_v10 = vpop.f32.mrb[16].mxu0 }
 0x554   :  { %v6649_v11 = vsub.f32 %v6542_v22, %v992_v10  ;;  %v994_v13 = vpop.f32.mrb[17].mxu0 }
 0x555   :  { %v6652_v14 = vsub.f32 %v6544_v23, %v994_v13 }
 0x556   :  { %v1023_v23 = vmul.f32 %v6649_v11, %v6649_v11 }
 0x557   :  { %v998_v17 = vpop.f32.mrb[18].mxu0  ;;  %v1024_v28 = vmul.f32 %v6652_v14, %v6652_v14 }
 0x558   :  { %v6655_v18 = vsub.f32 %v6547_v25, %v998_v17  ;;  %v1000_v20 = vpop.f32.mrb[19].mxu0 }
 0x559   :  { %v6658_v24 = vsub.f32 %v6551_v27, %v1000_v20 }
 0x55a   :  { %v1025_v26 = vmul.f32 %v6655_v18, %v6655_v18 }
 0x55b   :  { %v1026_v22 = vmul.f32 %v6658_v24, %v6658_v24  ;;  %v1004_v30 = vpop.f32.mrb[20].mxu0 }
 0x55c   :  { %v6669_v25 = vsub.f32 %v6557_v31, %v1004_v30  ;;  %v1006_v34 = vpop.f32.mrb[21].mxu0  ;;  %v5687_v39 = vpack.c.bf16 %v1025_v26, %v1023_v23 }
 0x55d   :  { %v6672_v27 = vsub.f32 %v6559_v32, %v1006_v34  ;;  %v5685_v37 = vpack.c.bf16 %v1026_v22, %v1024_v28 }
 0x55e   :  { %v1027_v48 = vmul.f32 %v6669_v25, %v6669_v25 }
 0x55f   :  { %v1010_v40 = vpop.f32.mrb[22].mxu0  ;;  %5686 = vmatprep.subr.bf16.mxu0 %v5685_v37  ;;  %v1028_v47 = vmul.f32 %v6672_v27, %v6672_v27 }
 0x560   :  { %v6675_v42 = vsub.f32 %v6563_v33, %v1010_v40  ;;  %v1012_v43 = vpop.f32.mrb[23].mxu0  ;;  %5688 = vmatpush1.bf16.msra.mxu0 %v5687_v39 }
 0x561   :  { %v6678_v44 = vsub.f32 %v6567_v35, %v1012_v43  ;;  %v6748_v35 = vsub.s32 1, %v6540_v21 }
 0x562   :  { %v1029_v31 = vmul.f32 %v6675_v42, %v6675_v42 }
 0x563   :  { %v1030_v32 = vmul.f32 %v6678_v44, %v6678_v44 }
 0x564   :  { %v5692_v33 = vpack.c.bf16 %v1029_v31, %v1027_v48 }
 0x565   :  { %v5689_v49 = vpack.c.bf16 %v1030_v32, %v1028_v47 }
 0x567   :  { %5691 = vmatprep.subr.msk.bf16.mxu0 %vm6571_vm8, %v5689_v49 }
 0x568   :  { %5694 = vmatpush1.bf16.msk.msra.mxu0 %vm6571_vm8, %v5692_v33 }
 0x569   :  { %5695 = vmatprep.subr.bf16.mxu0 %v6181_v46 }
 0x56b   :  { %4927 = vmatmul.mubr.msk.f32.vlgmr.msra.gmra.mrb[24].mxu0 %vm646_vm10, %v6582_v38 }
 0x56c   :  { %5697 = vmatpush1.bf16.msra.mxu0 %v6429_v50 }
 0x56d   :  { %5698 = vmatprep.subr.bf16.mxu0 %v6181_v46 }
 0x570   :  { %5700 = vmatpush1.bf16.msra.mxu0 %v6435_v52 }
 0x571   :  { %5701 = vmatprep.subr.bf16.mxu0 %v6181_v46 }
 0x574   :  { %5703 = vmatpush1.bf16.msra.mxu0 %v6445_v55 }
 0x575   :  { %5704 = vmatprep.subr.bf16.mxu0 %v6181_v46 }
 0x578   :  { %5706 = vmatpush1.bf16.msra.mxu0 %v6455_v58 }
 0x579   :  { %5707 = vmatprep.subr.bf16.mxu0 %v6181_v46 }
 0x57c   :  { %5709 = vmatpush1.bf16.msra.mxu0 %v6465_v61 }
 0x57d   :  { %5710 = vmatprep.subr.bf16.mxu0 %v6181_v46 }
 0x580   :  { %5712 = vmatpush1.bf16.msra.mxu0 %v6475_v0  ;;  %v4929_v0 = vld [vmem:[%s7925_s8] ss:$0 sm:$0xff]  ;;  %s7931_s8 = sld [smem:[#allocation12_spill]] }
 0x581   :  { %5713 = vmatprep.subr.bf16.mxu0 %v6181_v46 }
 0x584   :  { %5715 = vmatpush1.bf16.msra.mxu0 %v6485_v3 }
 0x585   :  { %5716 = vmatprep.subr.bf16.mxu0 %v6181_v46 }
 0x588   :  { %5718 = vmatpush1.bf16.msra.mxu0 %v6495_v6 }
 0x589   :  { %5719 = vmatprep.subr.bf16.mxu0 %v6181_v46 }
 0x58c   :  { %5721 = vmatpush1.bf16.msra.mxu0 %v6505_v9 }
 0x58d   :  { %5722 = vmatprep.subr.bf16.mxu0 %v6181_v46 }
 0x590   :  { %5724 = vmatpush1.bf16.msra.mxu0 %v6515_v12 }
 0x591   :  { %5725 = vmatprep.subr.bf16.mxu0 %v6181_v46 }
 0x594   :  { %5727 = vmatpush1.bf16.msra.mxu0 %v6525_v15  ;;  %v6742_v15 = vsub.s32 0, %v6540_v21 }
 0x595   :  { %5728 = vmatprep.subr.bf16.mxu0 %v6181_v46 }
 0x598   :  { %5730 = vmatpush1.bf16.msra.mxu0 %v6535_v19  ;;  %v1367_v19 = vld [vmem:[%s7926_s4] sm:$0x3] }
 0x599   :  { %5731 = vmatprep.subr.bf16.mxu0 %v6181_v46  ;;  %v1372_v36 = vrot.slane %v1367_v19, %v6742_v15 }
 0x59c   :  { %5733 = vmatpush1.bf16.msra.mxu0 %v6593_v41  ;;  %v1376_v41 = vrot.slane %v1367_v19, %v6748_v35  ;;  %v5987_v19 = vld [vmem:[%s7928_s0 + $0xf0] ss:$8 sps:$4 sm:$0xff]  }
 0x63e   :  { %v1103_v50 = vpop.f32.mrb[24].mxu0 }
 0x63f   :  { %v1105_v52 = vpop.f32.mrb[25].mxu0 }
 0x640   :  { %4928 = vmatprep.mubr.msk.f32.mxu0 %vm754_vm11, %v1105_v52 }
 0x641   :  { %1176 = vmatmul.mubr.f32.vlgmr.msra.gmra.mrb[26].mxu0 %v1103_v50 }
 0x642   :  { %1981 = vmatprep.mubr.bf16.mxu0 %v6179_v16 }
 0x714   :  { %v1177_v55 = vpop.f32.mrb[26].mxu0 }
 0x715   :  { %v1178_v58 = vadd.f32 1e-05, %v1177_v55  ;;  %v1179_v61 = vpop.f32.mrb[27].mxu0  ;;  %v5978_v55 = vld [vmem:[%s7927_s29] sm:$0x3f]  }
 0x716   :  { %v5983_v61 = vld [vmem:[%s7928_s0 + $0xd4] ss:$8 sps:$4 sm:$0xff]  }
 0x717   :  { %6173 = vrsqrt.f32 %v1178_v58  ;;  %v5980_v58 = vld [vmem:[%s7927_s29 + $0x10] sm:$0x3f]  }
 0x721   :  { %v6174_v3 = vpop.eup %6173 }
 0x722   :  { %v1189_v6 = vmul.f32 %v6174_v3, %v4929_v0  ;;  %v5979_v0 = vld [vmem:[%s7927_s29 + $0x8] sm:$0x3f]   ;;  %v5981_v3 = vld [vmem:[%s7928_s0 + $0xd0] ss:$8 sps:$4 sm:$0xff]  }
 0x724   :  { %4930 = vmatmul.mubr.msk.f32.vlgmr.msra.gmra.mrb[10].mxu1 %vm832_vm12, %v1189_v6  ;;  %v5986_v6 = vld [vmem:[%s7928_s0 + $0xe4] ss:$8 sps:$4 sm:$0xff]  }
 0x725   :  { %1334 = vmatprep.mubr.f32.mxu1 %v6180_v45 }
 0x7f7   :  { %v1259_v9 = vpop.f32.mrb[10].mxu1 }
 0x7f8   :  { %v1261_v12 = vpop.f32.mrb[11].mxu1 }
 0x7f9   :  { %4931 = vmatprep.subr.msk.mxu1 %vm650_vm4, %v1261_v12  ;;  %v5989_v12 = vld [vmem:[%s7928_s0 + $0xf4] ss:$8 sps:$4 sm:$0xff]  }
 0x7fa   :  { %4932 = vmatpush1.msk.msra.mxu1 %vm650_vm4, %v1259_v9  ;;  %v5984_v9 = vld [vmem:[%s7928_s0 + $0xe0] ss:$8 sps:$4 sm:$0xff]  }
 0x7fb   :  { %4933 = vmatmul.mubr.msk.f32.vlgmr.msra.gmra.mrb[12].mxu1 %vm907_vm5, %v6622_v2 }
 0x7fc   :  { %1340 = vmatprep.mubr.f32.mxu1 %v6180_v45 }
 0x7ff   :  { %4934 = vmatmul.mubr.msk.f32.gmra.mrb[14].mxu1 %vm907_vm5, %v6631_v5 }
 0x800   :  { %1346 = vmatprep.mubr.f32.mxu1 %v6180_v45 }
 0x803   :  { %4935 = vmatmul.mubr.msk.f32.gmra.mrb[16].mxu1 %vm907_vm5, %v6637_v7 }
 0x804   :  { %1352 = vmatprep.mubr.f32.mxu1 %v6180_v45 }
 0x807   :  { %4936 = vmatmul.mubr.msk.f32.gmra.mrb[18].mxu1 %vm907_vm5, %v6643_v8 }
 0x808   :  { %1464 = vmatprep.mubr.bf16.mxu1 %v6179_v16 }
 0x8ce   :  { %v1336_v38 = vpop.f32.mrb[12].mxu1 }
 0x8cf   :  { %v1359_v51 = vmul.f32 %v1336_v38, %v6649_v11  ;;  %v1338_v53 = vpop.f32.mrb[13].mxu1  ;;  %v5990_v38 = vld [vmem:[%s7928_s0 + $0x100] ss:$8 sps:$4 sm:$0xff]  }
 0x8d0   :  { %v1360_v54 = vmul.f32 %v1338_v53, %v6652_v14  ;;  %v5998_v53 = vld [vmem:[%s7928_s0 + $0x124] ss:$8 sps:$4 sm:$0xff]  }
 0x8d1   :  { %v1379_v56 = vadd.f32 %v1372_v36, %v1359_v51  ;;  %v5993_v51 = vld [vmem:[%s7928_s0 + $0x110] ss:$8 sps:$4 sm:$0xff]  }
 0x8d2   :  { %v1380_v57 = vadd.f32 %v1376_v41, %v1360_v54  ;;  %v1342_v59 = vpop.f32.mrb[14].mxu1  ;;  %v5996_v54 = vld [vmem:[%s7928_s0 + $0x120] ss:$8 sps:$4 sm:$0xff]  }
 0x8d3   :  { %v1361_v62 = vmul.f32 %v1342_v59, %v6655_v18  ;;  %v1344_v63 = vpop.f32.mrb[15].mxu1  ;;  %v1395_v2 = vmul.f32 0.2, %v1379_v56  ;;  %vm1387_vm2 = vcmp.gt.f32.partialorder %v1379_v56, 0.0  ;;  %v6004_v59 = vld [vmem:[%s7928_s0 + $0x144] ss:$8 sps:$4 sm:$0xff]  }
 0x8d4   :  { %v1362_v1 = vmul.f32 %v1344_v63, %v6658_v24  ;;  %v1396_v5 = vmul.f32 0.2, %v1380_v57  ;;  %vm1388_vm8 = vcmp.gt.f32.partialorder %v1380_v57, 0.0  ;;  %v6007_v63 = vld [vmem:[%s7928_s0 + $0x154] ss:$8 sps:$4 sm:$0xff]  }
 0x8d5   :  { %v1381_v4 = vadd.f32 %v1372_v36, %v1361_v62  ;;  %v1403_v18 = vsel %vm1387_vm2, %v1379_v56, %v1395_v2  ;;  %v6001_v56 = vld [vmem:[%s7928_s0 + $0x134] ss:$8 sps:$4 sm:$0xff]   ;;  %v6002_v62 = vld [vmem:[%s7928_s0 + $0x140] ss:$8 sps:$4 sm:$0xff]   ;;  %v6010_v2 = vld [vmem:[%s7928_s0 + $0x164] ss:$8 sps:$4 sm:$0xff]  }
 0x8d6   :  { %v1382_v7 = vadd.f32 %v1376_v41, %v1362_v1  ;;  %v1348_v8 = vpop.f32.mrb[16].mxu1  ;;  %v1404_v22 = vsel %vm1388_vm8, %v1380_v57, %v1396_v5  ;;  %v5999_v57 = vld [vmem:[%s7928_s0 + $0x130] ss:$8 sps:$4 sm:$0xff]   ;;  %v6013_v5 = vld [vmem:[%s7928_s0 + $0x174] ss:$8 sps:$4 sm:$0xff]   ;;  %vm2325_vm8 = vcmask 523264  }
 0x8d7   :  { %vm1389_vm12 = vcmp.gt.f32.partialorder %v1381_v4, 0.0  ;;  %v1397_v10 = vmul.f32 0.2, %v1381_v4  ;;  %v1363_v11 = vmul.f32 %v1348_v8, %v6669_v25  ;;  %v1350_v13 = vpop.f32.mrb[17].mxu1  ;;  %v6005_v1 = vld [vmem:[%s7928_s0 + $0x150] ss:$8 sps:$4 sm:$0xff]  }
 0x8d8   :  { %vm1390_vm3 = vcmp.gt.f32.partialorder %v1382_v7, 0.0  ;;  %v1398_v14 = vmul.f32 0.2, %v1382_v7  ;;  %v1364_v17 = vmul.f32 %v1350_v13, %v6672_v27  ;;  %v6014_v8 = vld [vmem:[%s7928_s0 + $0x180] ss:$8 sps:$4 sm:$0xff]  }
 0x8d9   :  { %v1405_v20 = vsel %vm1389_vm12, %v1381_v4, %v1397_v10  ;;  %v1383_v26 = vadd.f32 %v1372_v36, %v1363_v11  ;;  %v6008_v4 = vld [vmem:[%s7928_s0 + $0x160] ss:$8 sps:$4 sm:$0xff]   ;;  %v6016_v10 = vld [vmem:[%s7928_s0 + $0x184] ss:$8 sps:$4 sm:$0xff]   ;;  %v6019_v11 = vld [vmem:[%s7928_s0 + $0x194] ss:$8 sps:$4 sm:$0xff]  }
 0x8da   :  { %v1384_v24 = vadd.f32 %v1376_v41, %v1364_v17  ;;  %v1354_v28 = vpop.f32.mrb[18].mxu1  ;;  %v1406_v30 = vsel %vm1390_vm3, %v1382_v7, %v1398_v14  ;;  %v1411_v23 = vpack.c.bf16 %v1405_v20, %v1403_v18  ;;  %v6011_v7 = vld [vmem:[%s7928_s0 + $0x170] ss:$8 sps:$4 sm:$0xff]   ;;  %v6022_v14 = vld [vmem:[%s7928_s0 + $0x4] ss:$8 sps:$4 sm:$0xff]   ;;  %vm2407_vm12 = vcmask 261120  }
 0x8db   :  { %v1365_v34 = vmul.f32 %v1354_v28, %v6675_v42  ;;  %v1356_v37 = vpop.f32.mrb[19].mxu1  ;;  %v1412_v39 = vpack.c.bf16 %v1406_v30, %v1404_v22  ;;  %v1399_v25 = vmul.f32 0.2, %v1383_v26  ;;  %vm1391_vm6 = vcmp.gt.f32.partialorder %v1383_v26, 0.0  ;;  %v6017_v13 = vld [vmem:[%s7928_s0 + $0x190] ss:$8 sps:$4 sm:$0xff]  }
 0x8dc   :  { %v1366_v40 = vmul.f32 %v1356_v37, %v6678_v44  ;;  %v1400_v27 = vmul.f32 0.2, %v1384_v24  ;;  %vm1392_vm9 = vcmp.gt.f32.partialorder %v1384_v24, 0.0 }
 0x8dd   :  { %v1385_v43 = vadd.f32 %v1372_v36, %v1365_v34  ;;  %1432 = vmatprep.subr.bf16.mxu1 %v1412_v39  ;;  %1949 = vmatprep.subr.bf16.mxu0 %v1412_v39  ;;  %v1407_v42 = vsel %vm1391_vm6, %v1383_v26, %v1399_v25  ;;  %v5992_v36 = vld [vmem:[%s7928_s0 + $0x104] ss:$8 sps:$4 sm:$0xff]  }
 0x8de   :  { %v1386_v31 = vadd.f32 %v1376_v41, %v1366_v40  ;;  %1433 = vmatpush1.bf16.msra.mxu1 %v1411_v23  ;;  %1950 = vmatpush1.bf16.msra.mxu0 %v1411_v23  ;;  %v1408_v49 = vsel %vm1392_vm9, %v1384_v24, %v1400_v27  ;;  %v5995_v41 = vld [vmem:[%s7928_s0 + $0x114] ss:$8 sps:$4 sm:$0xff]  }
 0x8df   :  { %vm1393_vm13 = vcmp.gt.f32.partialorder %v1385_v43, 0.0  ;;  %v1401_v47 = vmul.f32 0.2, %v1385_v43 }
 0x8e0   :  { %vm1394_vm14 = vcmp.gt.f32.partialorder %v1386_v31, 0.0  ;;  %v1402_v32 = vmul.f32 0.2, %v1386_v31 }
 0x8e1   :  { %v1409_v48 = vsel %vm1393_vm13, %v1385_v43, %v1401_v47 }
 0x8e2   :  { %v1410_v33 = vsel %vm1394_vm14, %v1386_v31, %v1402_v32  ;;  %v1413_v44 = vpack.c.bf16 %v1409_v48, %v1407_v42  ;;  %v6020_v32 = vld [vmem:[%s7928_s0] ss:$8 sps:$4 sm:$0xff]   ;;  %v6025_v42 = vld [vmem:[%s7928_s0 + $0x14] ss:$8 sps:$4 sm:$0xff]   ;;  %v6023_v48 = vld [vmem:[%s7928_s0 + $0x10] ss:$8 sps:$4 sm:$0xff]  }
 0x8e3   :  { %v1414_v50 = vpack.c.bf16 %v1410_v33, %v1408_v49  ;;  %v6028_v49 = vld [vmem:[%s7928_s0 + $0x24] ss:$8 sps:$4 sm:$0xff]   ;;  %v6026_v33 = vld [vmem:[%s7928_s0 + $0x20] ss:$8 sps:$4 sm:$0xff]  }
 0x8e4   :  { %v1427_v52 = vsel %vm1425_vm15, %v1413_v44, 0  ;;  %v6031_v44 = vld [vmem:[%s7928_s0 + $0x34] ss:$8 sps:$4 sm:$0xff]  }
 0x8e5   :  { %4938 = vmatprep.subr.msk.bf16.mxu1 %vm1425_vm15, %v1414_v50  ;;  %5028 = vmatprep.subr.msk.bf16.mxu0 %vm1425_vm15, %v1414_v50 }
 0x8e6   :  { %1435 = vmatpush1.bf16.msra.mxu1 %v1427_v52  ;;  %1952 = vmatpush1.bf16.msra.mxu0 %v1427_v52 }
 0x8e7   :  { %1514 = vmatprep.subr.bf16.mxu1 %v1412_v39 }
 0x8e9   :  { %4939 = vmatmul.mubr.msk.bf16.vlgmr.msra.gmra.mrb[20].mxu1 %vm646_vm10, %v5978_v55  ;;  %5029 = vmatmul.mubr.msk.bf16.vlgmr.msra.gmra.mrb[28].mxu0 %vm646_vm10, %v5980_v58  ;;  %v6032_v55 = vld [vmem:[%s7928_s0 + $0x40] ss:$8 sps:$4 sm:$0xff]   ;;  %v6037_v58 = vld [vmem:[%s7928_s0 + $0x54] ss:$8 sps:$4 sm:$0xff]  }
 0x8ea   :  { %1515 = vmatpush1.bf16.msra.mxu1 %v1411_v23  ;;  %1546 = vmatprep.mubr.bf16.mxu1 %v6179_v16 }
 0x8eb   :  { %4943 = vmatprep.subr.msk.bf16.mxu1 %vm1425_vm15, %v1414_v50  ;;  %2294 = vmatprep.mubr.f32.mxu0 %v6180_v45  ;;  %v6029_v50 = vld [vmem:[%s7928_s0 + $0x30] ss:$8 sps:$4 sm:$0xff]  }
 0x8ee   :  { %1517 = vmatpush1.bf16.msra.mxu1 %v1427_v52  ;;  %v6034_v52 = vld [vmem:[%s7928_s0 + $0x44] ss:$8 sps:$4 sm:$0xff]  }
 0x8ef   :  { %1719 = vmatprep.subr.bf16.mxu1 %v5983_v61  ;;  %v6035_v61 = vld [vmem:[%s7928_s0 + $0x50] ss:$8 sps:$4 sm:$0xff]  }
 0x8f1   :  { %4944 = vmatmul.mubr.msk.bf16.vlgmr.msra.gmra.mrb[24].mxu1 %vm646_vm10, %v5979_v0  ;;  %v6040_v0 = vld [vmem:[%s7928_s0 + $0x64] ss:$8 sps:$4 sm:$0xff]  }
 0x8f2   :  { %1720 = vmatpush1.bf16.msra.mxu1 %v5981_v3  ;;  %v6038_v3 = vld [vmem:[%s7928_s0 + $0x60] ss:$8 sps:$4 sm:$0xff]  }
 0x8f3   :  { %1721 = vmatprep.subr.bf16.mxu1 %v5986_v6  ;;  %v6043_v6 = vld [vmem:[%s7928_s0 + $0x74] ss:$8 sps:$4 sm:$0xff]  }
 0x8f6   :  { %1722 = vmatpush1.bf16.msra.mxu1 %v5984_v9  ;;  %v6041_v9 = vld [vmem:[%s7928_s0 + $0x70] ss:$8 sps:$4 sm:$0xff]  }
 0x8f7   :  { %1723 = vmatprep.subr.bf16.mxu1 %v5989_v12  ;;  %v6046_v12 = vld [vmem:[%s7928_s0 + $0x84] ss:$8 sps:$4 sm:$0xff]  }
 0x8fa   :  { %1724 = vmatpush1.bf16.msra.mxu1 %v5987_v19  ;;  %v6044_v19 = vld [vmem:[%s7928_s0 + $0x80] ss:$8 sps:$4 sm:$0xff]  }
 0x8fb   :  { %1725 = vmatprep.subr.bf16.mxu1 %v5992_v36  ;;  %v6049_v36 = vld [vmem:[%s7928_s0 + $0x94] ss:$8 sps:$4 sm:$0xff]  }
 0x8fe   :  { %1726 = vmatpush1.bf16.msra.mxu1 %v5990_v38  ;;  %v6047_v38 = vld [vmem:[%s7928_s0 + $0x90] ss:$8 sps:$4 sm:$0xff]  }
 0x8ff   :  { %1727 = vmatprep.subr.bf16.mxu1 %v5995_v41  ;;  %v6052_v41 = vld [vmem:[%s7928_s0 + $0xa4] ss:$8 sps:$4 sm:$0xff]  }
 0x902   :  { %1728 = vmatpush1.bf16.msra.mxu1 %v5993_v51  ;;  %v6050_v51 = vld [vmem:[%s7928_s0 + $0xa0] ss:$8 sps:$4 sm:$0xff]  }
 0x903   :  { %1729 = vmatprep.subr.bf16.mxu1 %v5998_v53  ;;  %v6055_v53 = vld [vmem:[%s7928_s0 + $0xb4] ss:$8 sps:$4 sm:$0xff]  }
 0x906   :  { %1730 = vmatpush1.bf16.msra.mxu1 %v5996_v54  ;;  %v6053_v54 = vld [vmem:[%s7928_s0 + $0xb0] ss:$8 sps:$4 sm:$0xff]  }
 0x907   :  { %1731 = vmatprep.subr.bf16.mxu1 %v6001_v56  ;;  %v6058_v56 = vld [vmem:[%s7928_s0 + $0xc4] ss:$8 sps:$4 sm:$0xff]  }
 0x90a   :  { %1732 = vmatpush1.bf16.msra.mxu1 %v5999_v57  ;;  %v6056_v57 = vld [vmem:[%s7928_s0 + $0xc0] ss:$8 sps:$4 sm:$0xff]  }
 0x90b   :  { %1733 = vmatprep.subr.bf16.mxu1 %v6004_v59  ;;  %v6061_v59 = vld [vmem:[%s7928_s0 + $0x1a4] ss:$8 sps:$4 sm:$0xff]  }
 0x90e   :  { %1734 = vmatpush1.bf16.msra.mxu1 %v6002_v62  ;;  %v6059_v62 = vld [vmem:[%s7928_s0 + $0x1a0] ss:$8 sps:$4 sm:$0xff]  }
 0x90f   :  { %1735 = vmatprep.subr.bf16.mxu1 %v6007_v63  ;;  %v6064_v63 = vld [vmem:[%s7928_s0 + $0x1b4] ss:$8 sps:$4 sm:$0xff]  }
 0x912   :  { %1736 = vmatpush1.bf16.msra.mxu1 %v6005_v1  ;;  %v6062_v1 = vld [vmem:[%s7928_s0 + $0x1b0] ss:$8 sps:$4 sm:$0xff]  }
 0x913   :  { %1737 = vmatprep.subr.bf16.mxu1 %v6010_v2  ;;  %v6067_v2 = vld [vmem:[%s7928_s0 + $0x1c4] ss:$8 sps:$4 sm:$0xff]  }
 0x916   :  { %1738 = vmatpush1.bf16.msra.mxu1 %v6008_v4  ;;  %v6065_v4 = vld [vmem:[%s7928_s0 + $0x1c0] ss:$8 sps:$4 sm:$0xff]  }
 0x917   :  { %1739 = vmatprep.subr.bf16.mxu1 %v6013_v5  ;;  %v6070_v5 = vld [vmem:[%s7928_s0 + $0x1d4] ss:$8 sps:$4 sm:$0xff]  }
 0x91a   :  { %1740 = vmatpush1.bf16.msra.mxu1 %v6011_v7  ;;  %v6068_v7 = vld [vmem:[%s7928_s0 + $0x1d0] ss:$8 sps:$4 sm:$0xff]  }
 0x91b   :  { %1741 = vmatprep.subr.bf16.mxu1 %v6016_v10  ;;  %v6071_v10 = vld [vmem:[%s7928_s0 + $0x1e0] ss:$8 sps:$4 sm:$0xff]  }
 0x91e   :  { %1742 = vmatpush1.bf16.msra.mxu1 %v6014_v8  ;;  %v6073_v8 = vld [vmem:[%s7928_s0 + $0x1e4] ss:$8 sps:$4 sm:$0xff]  }
 0x91f   :  { %1743 = vmatprep.subr.bf16.mxu1 %v6019_v11  ;;  %v6076_v11 = vld [vmem:[%s7928_s0 + $0x1f4] ss:$8 sps:$4 sm:$0xff]  }
 0x922   :  { %1744 = vmatpush1.bf16.msra.mxu1 %v6017_v13  ;;  %v6074_v13 = vld [vmem:[%s7928_s0 + $0x1f0] ss:$8 sps:$4 sm:$0xff]  }
 0x923   :  { %1895 = vmatprep.subr.bf16.mxu1 %v6022_v14  ;;  %v6079_v14 = vld [vmem:[%s7928_s0 + $0x204] ss:$8 sps:$4 sm:$0xff]  }
 0x9bc   :  { %v6859_v17 = vpop.f32.mrb[20].mxu1  ;;  %v6861_v18 = vpop.f32.mrb[28].mxu0 }
 0x9bd   :  { %v1468_v20 = vpop.f32.mrb[21].mxu1  ;;  %v6863_v26 = vpop.f32.mrb[29].mxu0 }
 0x9be   :  { %v6865_v24 = vpop.f32.mrb[22].mxu1  ;;  %v6867_v28 = vpop.f32.mrb[30].mxu0 }
 0x9bf   :  { %v1475_v22 = vpack.c.bf16 %v6865_v24, %v6859_v17  ;;  %v1472_v30 = vpop.f32.mrb[23].mxu1  ;;  %v1992_v23 = vpack.c.bf16 %v6867_v28, %v6861_v18  ;;  %v6873_v34 = vpop.f32.mrb[31].mxu0  ;;  %v6077_v17 = vld [vmem:[%s7928_s0 + $0x200] ss:$8 sps:$4 sm:$0xff]   ;;  %v6085_v24 = vld [vmem:[%s7928_s0 + $0x224] ss:$8 sps:$4 sm:$0xff]  }
 0x9c0   :  { %v1476_v37 = vpack.c.bf16 %v1472_v30, %v1468_v20  ;;  %v1993_v39 = vpack.c.bf16 %v6873_v34, %v6863_v26  ;;  %v6082_v20 = vld [vmem:[%s7928_s0 + $0x214] ss:$8 sps:$4 sm:$0xff]   ;;  %v6080_v26 = vld [vmem:[%s7928_s0 + $0x210] ss:$8 sps:$4 sm:$0xff]  }
 0x9c1   :  { %v6088_v30 = vld [vmem:[%s7928_s0 + $0x234] ss:$8 sps:$4 sm:$0xff]   ;;  %v6086_v34 = vld [vmem:[%s7928_s0 + $0x230] ss:$8 sps:$4 sm:$0xff]  }
 0x9c4   :  { %v1548_v40 = vpop.f32.mrb[24].mxu1 }
 0x9c5   :  { %v1550_v25 = vpop.f32.mrb[25].mxu1 }
 0x9c6   :  { %v1552_v43 = vpop.f32.mrb[26].mxu1 }
 0x9c7   :  { %v1557_v27 = vpack.c.bf16 %v1552_v43, %v1548_v40  ;;  %v1554_v31 = vpop.f32.mrb[27].mxu1  ;;  %v6094_v40 = vld [vmem:[%s7928_s0 + $0x254] ss:$8 sps:$4 sm:$0xff]   ;;  %v6097_v43 = vld [vmem:[%s7928_s0 + $0x264] ss:$8 sps:$4 sm:$0xff]  }
 0x9c8   :  { %v1558_v47 = vpack.c.bf16 %v1554_v31, %v1550_v25  ;;  %v6092_v25 = vld [vmem:[%s7928_s0 + $0x250] ss:$8 sps:$4 sm:$0xff]   ;;  %v2201_v31 = vmul.u32 6, %v6540_v21 }
 0x9ca   :  { %4997 = vmatprep.mubr.msk.bf16.mxu1 %vm754_vm11, %v1558_v47  ;;  %v2203_v47 = vadd.s32 6, %v2201_v31  ;;  %vm2202_vm10 = vcmp.ge.s32.totalorder %v6555_v29, %v2201_v31 }
 0x9cb   :  { %1752 = vmatmul.mubr.bf16.vlgmr.msra.gmra.mrb[28].mxu1 %v1557_v27  ;;  %v6095_v27 = vld [vmem:[%s7928_s0 + $0x260] ss:$8 sps:$4 sm:$0xff]  }
 0x9cc   :  { %1896 = vmatpush1.bf16.msra.mxu1 %v6020_v32  ;;  %5024 = vmatprep.mubr.msk.bf16.mxu1 %vm754_vm11, %v1476_v37  ;;  %v6091_v37 = vld [vmem:[%s7928_s0 + $0x244] ss:$8 sps:$4 sm:$0xff]  }
 0x9cd   :  { %1897 = vmatprep.subr.bf16.mxu1 %v6025_v42 }
 0x9d0   :  { %1898 = vmatpush1.bf16.msra.mxu1 %v6023_v48 }
 0x9d1   :  { %1899 = vmatprep.subr.bf16.mxu1 %v6028_v49 }
 0x9d4   :  { %1900 = vmatpush1.bf16.msra.mxu1 %v6026_v33  ;;  %v2301_v33 = vld [vmem:[%s7931_s8] sm:$0xff] }
 0x9d5   :  { %1901 = vmatprep.subr.bf16.mxu1 %v6031_v44  ;;  %v2302_v44 = vld [vmem:[%s7931_s8 + $0x8] sm:$0xff] }
 0x9d8   :  { %1902 = vmatpush1.bf16.msra.mxu1 %v6029_v50 }
 0x9d9   :  { %1903 = vmatprep.subr.bf16.mxu1 %v6034_v52  ;;  %v7077_v52 = vpack.c.bf16 %v2302_v44, %v2301_v33 }
 0x9dc   :  { %1904 = vmatpush1.bf16.msra.mxu1 %v6032_v55  ;;  %v2303_v55 = vld [vmem:[%s7931_s8 + $0x10] sm:$0xff] }
 0x9dd   :  { %1905 = vmatprep.subr.bf16.mxu1 %v6037_v58  ;;  %v2304_v58 = vld [vmem:[%s7931_s8 + $0x18] sm:$0xff] }
 0x9e0   :  { %1906 = vmatpush1.bf16.msra.mxu1 %v6035_v61  ;;  %v7089_v61 = vpack.c.bf16 %v2304_v58, %v2303_v55  ;;  %v2208_v55 = vmul.u32 6, %v6555_v29 }
 0x9e1   :  { %1907 = vmatprep.subr.bf16.mxu1 %v6040_v0  ;;  %v2305_v0 = vld [vmem:[%s7931_s8 + $0x20] sm:$0xff] }
 0x9e2   :  { %v2211_v58 = vadd.s32 6, %v2208_v55  ;;  %vm2209_vm3 = vcmp.ge.s32.totalorder %v6540_v21, %v2208_v55  ;;  %vm2210_vm13 = vcmp.ge.s32.totalorder %v6616_v60, %v2208_v55  ;;  %v2929_v55 = vld [vmem:[%s7882_s14] sm:$0x3] }
 0x9e4   :  { %1908 = vmatpush1.bf16.msra.mxu1 %v6038_v3  ;;  %v2306_v3 = vld [vmem:[%s7931_s8 + $0x28] sm:$0xff]  ;;  %vm2212_vm6 = vcmp.lt.s32.totalorder %v6540_v21, %v2211_v58  ;;  %vm2213_vm14 = vcmp.lt.s32.totalorder %v6616_v60, %v2211_v58  ;;  %v6098_v58 = vld [vmem:[%s7880_s15 + $0x60] sm:$0xff]  }
 0x9e5   :  { %1909 = vmatprep.subr.bf16.mxu1 %v6043_v6  ;;  %v7099_v6 = vpack.c.bf16 %v2306_v3, %v2305_v0  ;;  %vm2214_vm9 = vmand %vm2209_vm3, %vm2212_vm6  ;;  %vm7934_vm3 = vcmask 1045504  }
 0x9e6   :  { %vm7935_vm6 = vmmov %vm7934_vm3 }
 0x9e8   :  { %1910 = vmatpush1.bf16.msra.mxu1 %v6041_v9  ;;  %v2307_v9 = vld [vmem:[%s7931_s8 + $0x30] sm:$0xff] }
 0x9e9   :  { %1911 = vmatprep.subr.bf16.mxu1 %v6046_v12  ;;  %v2308_v12 = vld [vmem:[%s7931_s8 + $0x38] sm:$0xff] }
 0x9ec   :  { %1912 = vmatpush1.bf16.msra.mxu1 %v6044_v19  ;;  %v7109_v19 = vpack.c.bf16 %v2308_v12, %v2307_v9  ;;  %v7239_v9 = vsel %vm2214_vm9, 1.0, %v6180_v45  ;;  %vm7936_vm9 = vmmov %vm7934_vm3 }
 0x9ed   :  { %1913 = vmatprep.subr.bf16.mxu1 %v6049_v36  ;;  %v2309_v36 = vld [vmem:[%s7931_s8 + $0x40] sm:$0xff] }
 0x9f0   :  { %1914 = vmatpush1.bf16.msra.mxu1 %v6047_v38  ;;  %v2310_v38 = vld [vmem:[%s7931_s8 + $0x48] sm:$0xff] }
 0x9f1   :  { %1915 = vmatprep.subr.bf16.mxu1 %v6052_v41  ;;  %v7119_v41 = vpack.c.bf16 %v2310_v38, %v2309_v36 }
 0x9f4   :  { %1916 = vmatpush1.bf16.msra.mxu1 %v6050_v51  ;;  %v2311_v51 = vld [vmem:[%s7931_s8 + $0x50] sm:$0xff] }
 0x9f5   :  { %1917 = vmatprep.subr.bf16.mxu1 %v6055_v53  ;;  %v2312_v53 = vld [vmem:[%s7931_s8 + $0x58] sm:$0xff] }
 0x9f8   :  { %1918 = vmatpush1.bf16.msra.mxu1 %v6053_v54  ;;  %v7129_v54 = vpack.c.bf16 %v2312_v53, %v2311_v51 }
 0x9f9   :  { %1919 = vmatprep.subr.bf16.mxu1 %v6058_v56  ;;  %v2313_v56 = vld [vmem:[%s7931_s8 + $0x60] sm:$0xff] }
 0x9fc   :  { %1920 = vmatpush1.bf16.msra.mxu1 %v6056_v57  ;;  %v2314_v57 = vld [vmem:[%s7931_s8 + $0x68] sm:$0xff] }
 0x9fd   :  { %2154 = vmatprep.subr.bf16.mxu1 %v6061_v59  ;;  %v7139_v59 = vpack.c.bf16 %v2314_v57, %v2313_v56 }
 0x9ff   :  { %1928 = vmatmul.mubr.bf16.vlgmr.msra.gmra.mrb[28].mxu1 %v1475_v22  ;;  %v6083_v22 = vld [vmem:[%s7928_s0 + $0x220] ss:$8 sps:$4 sm:$0xff]  }
 0xa00   :  { %2155 = vmatpush1.bf16.msra.mxu1 %v6059_v62  ;;  %5082 = vmatprep.mubr.msk.bf16.mxu1 %vm754_vm11, %v1993_v39  ;;  %v6089_v39 = vld [vmem:[%s7928_s0 + $0x240] ss:$8 sps:$4 sm:$0xff]   ;;  %vm2204_vm11 = vcmp.lt.s32.totalorder %v6555_v29, %v2203_v47  ;;  %v2315_v62 = vld [vmem:[%s7931_s8 + $0x70] sm:$0xff] }
 0xa01   :  { %2156 = vmatprep.subr.bf16.mxu1 %v6064_v63  ;;  %vm2205_vm2 = vmand %vm2202_vm10, %vm2204_vm11  ;;  %v2316_v63 = vld [vmem:[%s7931_s8 + $0x78] sm:$0xff]  ;;  %v2403_v47 = vld [vmem:[%s7932_s10 + $0x20] sm:$0xff] }
 0xa02   :  { %v7075_v50 = vsel %vm2205_vm2, 1.0, %v6180_v45  ;;  %vm2215_vm10 = vmand %vm2210_vm13, %vm2213_vm14 }
 0xa03   :  { %v7247_v12 = vsel %vm2215_vm10, 1.0, %v6180_v45  ;;  %vm7937_vm13 = vmmov %vm7934_vm3 }
 0xa04   :  { %2157 = vmatpush1.bf16.msra.mxu1 %v6062_v1  ;;  %v7149_v1 = vpack.c.bf16 %v2316_v63, %v2315_v62 }
 0xa05   :  { %2158 = vmatprep.subr.bf16.mxu1 %v6067_v2  ;;  %v2317_v2 = vld [vmem:[%s7931_s8 + $0x80] sm:$0xff] }
 0xa08   :  { %2159 = vmatpush1.bf16.msra.mxu1 %v6065_v4  ;;  %v2318_v4 = vld [vmem:[%s7931_s8 + $0x88] sm:$0xff] }
 0xa09   :  { %2160 = vmatprep.subr.bf16.mxu1 %v6070_v5  ;;  %v7159_v5 = vpack.c.bf16 %v2318_v4, %v2317_v2 }
 0xa0c   :  { %2161 = vmatpush1.bf16.msra.mxu1 %v6068_v7  ;;  %v2319_v7 = vld [vmem:[%s7931_s8 + $0x90] sm:$0xff] }
 0xa0d   :  { %2162 = vmatprep.subr.bf16.mxu1 %v6073_v8  ;;  %v2320_v8 = vld [vmem:[%s7931_s8 + $0x98] sm:$0xff] }
 0xa10   :  { %2163 = vmatpush1.bf16.msra.mxu1 %v6071_v10  ;;  %v7169_v10 = vpack.c.bf16 %v2320_v8, %v2319_v7 }
 0xa11   :  { %2164 = vmatprep.subr.bf16.mxu1 %v6076_v11  ;;  %v2321_v11 = vld [vmem:[%s7931_s8 + $0xa0] sm:$0xff] }
 0xa14   :  { %2165 = vmatpush1.bf16.msra.mxu1 %v6074_v13  ;;  %v2322_v13 = vld [vmem:[%s7931_s8 + $0xa8] sm:$0xff] }
 0xa15   :  { %2166 = vmatprep.subr.bf16.mxu1 %v6079_v14  ;;  %v7179_v14 = vpack.c.bf16 %v2322_v13, %v2321_v11 }
 0xa18   :  { %2167 = vmatpush1.bf16.msra.mxu1 %v6077_v17  ;;  %v2323_v17 = vld [vmem:[%s7931_s8 + $0xb0] sm:$0xff] }
 0xa19   :  { %2168 = vmatprep.subr.bf16.mxu1 %v6082_v20  ;;  %v2324_v20 = vld [vmem:[%s7931_s8 + $0xb8] sm:$0xff] }
 0xa1c   :  { %2169 = vmatpush1.bf16.msra.mxu1 %v6080_v26  ;;  %v7190_v26 = vpack.c.bf16 %v2324_v20, %v2323_v17 }
 0xa1d   :  { %2170 = vmatprep.subr.bf16.mxu1 %v6085_v24  ;;  %v2400_v24 = vld [vmem:[%s7932_s10 + $0x8] sm:$0xff] }
 0xa20   :  { %2171 = vmatpush1.bf16.msra.mxu1 %v6083_v22  ;;  %v2402_v22 = vld [vmem:[%s7932_s10 + $0x18] sm:$0xff] }
 0xa21   :  { %2172 = vmatprep.subr.bf16.mxu1 %v6088_v30  ;;  %v7199_v30 = vpack.c.bf16 %v2402_v22, %v2400_v24 }
 0xa24   :  { %2173 = vmatpush1.bf16.msra.mxu1 %v6086_v34  ;;  %v2399_v34 = vld [vmem:[%s7932_s10] sm:$0xff] }
 0xa25   :  { %2174 = vmatprep.subr.bf16.mxu1 %v6091_v37  ;;  %v2401_v37 = vld [vmem:[%s7932_s10 + $0x10] sm:$0xff] }
 0xa28   :  { %2175 = vmatpush1.bf16.msra.mxu1 %v6089_v39  ;;  %v2404_v39 = vld [vmem:[%s7932_s10 + $0x28] sm:$0xff] }
 0xa29   :  { %2176 = vmatprep.subr.bf16.mxu1 %v6094_v40  ;;  %v2406_v40 = vld [vmem:[%s7932_s10 + $0x38] sm:$0xff] }
 0xa2a   :  { %v7216_v31 = vpack.c.bf16 %v2406_v40, %v2404_v39 }
 0xa2c   :  { %2177 = vmatpush1.bf16.msra.mxu1 %v6092_v25 }
 0xa2d   :  { %2178 = vmatprep.subr.bf16.mxu1 %v6097_v43  ;;  %v7214_v43 = vpack.c.bf16 %v2401_v37, %v2399_v34 }
 0xa30   :  { %2179 = vmatpush1.bf16.msra.mxu1 %v6095_v27 }
 0xa33   :  { %2187 = vmatmul.mubr.bf16.vlgmr.msra.gmra.mrb[28].mxu1 %v1992_v23 }
 0xa34   :  { %2971 = vmatprep.mubr.bf16.mxu1 %v6179_v16 }
 0xb06   :  { %v7044_v32 = vpop.f32.mrb[28].mxu1 }
 0xb07   :  { %v7046_v42 = vpop.f32.mrb[29].mxu1 }
 0xb08   :  { %v7050_v48 = vpop.f32.mrb[30].mxu1 }
 0xb09   :  { %v5741_v49 = vpack.c.bf16 %v7050_v48, %v7044_v32  ;;  %v7054_v18 = vpop.f32.mrb[31].mxu1 }
 0xb0a   :  { %v5738_v23 = vpack.c.bf16 %v7054_v18, %v7046_v42 }
 0xb0c   :  { %5740 = vmatprep.subr.msk.bf16.mxu0 %vm7058_vm0, %v5738_v23 }
 0xb0d   :  { %5743 = vmatpush1.bf16.msk.msra.mxu0 %vm7058_vm0, %v5741_v49  ;;  %v2405_v49 = vld [vmem:[%s7932_s10 + $0x30] sm:$0xff] }
 0xb0e   :  { %5744 = vmatprep.subr.bf16.mxu0 %v6181_v46  ;;  %v7226_v23 = vpack.c.bf16 %v2405_v49, %v2403_v47 }
 0xb10   :  { %5088 = vmatmul.mubr.msk.f32.vlgmr.msra.gmra.mrb[32].mxu0 %vm2220_vm7, %v7075_v50 }
 0xb11   :  { %5746 = vmatpush1.bf16.msra.mxu0 %v7077_v52 }
 0xb12   :  { %5747 = vmatprep.subr.bf16.mxu0 %v6181_v46 }
 0xb15   :  { %5749 = vmatpush1.bf16.msra.mxu0 %v7089_v61 }
 0xb16   :  { %5750 = vmatprep.subr.bf16.mxu0 %v6181_v46 }
 0xb19   :  { %5752 = vmatpush1.bf16.msra.mxu0 %v7099_v6 }
 0xb1a   :  { %5753 = vmatprep.subr.bf16.mxu0 %v6181_v46 }
 0xb1d   :  { %5755 = vmatpush1.bf16.msra.mxu0 %v7109_v19 }
 0xb1e   :  { %5756 = vmatprep.subr.bf16.mxu0 %v6181_v46 }
 0xb21   :  { %5758 = vmatpush1.bf16.msra.mxu0 %v7119_v41 }
 0xb22   :  { %5759 = vmatprep.subr.bf16.mxu0 %v6181_v46 }
 0xb25   :  { %5761 = vmatpush1.bf16.msra.mxu0 %v7129_v54 }
 0xb26   :  { %5762 = vmatprep.subr.bf16.mxu0 %v6181_v46 }
 0xb29   :  { %5764 = vmatpush1.bf16.msra.mxu0 %v7139_v59 }
 0xb2a   :  { %5765 = vmatprep.subr.bf16.mxu0 %v6181_v46 }
 0xb2d   :  { %5767 = vmatpush1.bf16.msra.mxu0 %v7149_v1 }
 0xb2e   :  { %5768 = vmatprep.subr.bf16.mxu0 %v6181_v46 }
 0xb31   :  { %5770 = vmatpush1.bf16.msra.mxu0 %v7159_v5 }
 0xb32   :  { %5771 = vmatprep.subr.bf16.mxu0 %v6181_v46 }
 0xb35   :  { %5773 = vmatpush1.bf16.msra.mxu0 %v7169_v10 }
 0xb36   :  { %5774 = vmatprep.subr.bf16.mxu0 %v6181_v46 }
 0xb39   :  { %5776 = vmatpush1.bf16.msra.mxu0 %v7179_v14 }
 0xb3a   :  { %5777 = vmatprep.subr.bf16.mxu0 %v6181_v46 }
 0xb3d   :  { %5779 = vmatpush1.bf16.msra.mxu0 %v7190_v26 }
 0xb3e   :  { %5781 = vmatprep.subr.bf16.mxu0 %v7199_v30 }
 0xbe3   :  { %v2296_v25 = vpop.f32.mrb[32].mxu0 }
 0xbe4   :  { %v2298_v27 = vpop.f32.mrb[33].mxu0 }
 0xbe5   :  { %5089 = vmatprep.mubr.msk.f32.mxu0 %vm2325_vm8, %v2298_v27 }
 0xbe6   :  { %2394 = vmatmul.mubr.f32.vlgmr.msra.gmra.mrb[34].mxu0 %v2296_v25 }
 0xbe7   :  { %5783 = vmatpush1.bf16.msra.mxu0 %v7214_v43  ;;  %2475 = vmatprep.mubr.f32.mxu0 %v6180_v45 }
 0xbe8   :  { %5785 = vmatprep.subr.bf16.mxu0 %v7216_v31 }
 0xbeb   :  { %5787 = vmatpush1.bf16.msra.mxu0 %v7226_v23 }
 0xcb9   :  { %v2395_v33 = vpop.f32.mrb[34].mxu0 }
 0xcba   :  { %v2397_v44 = vpop.f32.mrb[35].mxu0  ;;  %5090 = vmatmul.mubr.msk.f32.vlgmr.msra.gmra.mrb[36].mxu0 %vm2407_vm12, %v2395_v33 }
 0xcbb   :  { %2558 = vmatprep.mubr.f32.mxu0 %v6180_v45  ;;  %v5107_v44 = vld [vmem:[%s7882_s14 + $0x2] sm:$0x3] }
 0xd8d   :  { %v2477_v0 = vpop.f32.mrb[36].mxu0 }
 0xd8e   :  { %v2479_v3 = vpop.f32.mrb[37].mxu0 }
 0xd8f   :  { %5091 = vmatprep.subr.msk.mxu0 %vm650_vm4, %v2479_v3  ;;  %v5160_v3 = vld [vmem:[%s7882_s14 + $0x4] sm:$0x3] }
 0xd90   :  { %5092 = vmatpush1.msk.msra.mxu0 %vm650_vm4, %v2477_v0  ;;  %v6099_v0 = vld [vmem:[%s7880_s15 + $0x68] sm:$0xff]  }
 0xd91   :  { %5093 = vmatmul.mubr.msk.f32.vlgmr.msra.gmra.mrb[38].mxu0 %vm907_vm5, %v7239_v9 }
 0xd92   :  { %2564 = vmatprep.mubr.f32.mxu0 %v6180_v45 }
 0xd95   :  { %5094 = vmatmul.mubr.msk.f32.gmra.mrb[40].mxu0 %vm907_vm5, %v7247_v12 }
 0xd96   :  { %2649 = vmatprep.mubr.f32.mxu0 %v6180_v45 }
 0xe64   :  { %v2560_v60 = vpop.f32.mrb[38].mxu0 }
 0xe65   :  { %v7253_v36 = vsub.f32 %v7044_v32, %v2560_v60  ;;  %v2562_v38 = vpop.f32.mrb[39].mxu0  ;;  %v6102_v60 = vld [vmem:[%s7880_s15 + $0x80] sm:$0xff]  }
 0xe66   :  { %v7256_v51 = vsub.f32 %v7046_v42, %v2562_v38  ;;  %v6104_v38 = vld [vmem:[%s7880_s15 + $0x90] sm:$0xff]  }
 0xe67   :  { %v2575_v42 = vmul.f32 %v7253_v36, %v7253_v36 }
 0xe68   :  { %v2566_v53 = vpop.f32.mrb[40].mxu0  ;;  %v2576_v2 = vmul.f32 %v7256_v51, %v7256_v51 }
 0xe69   :  { %v7259_v56 = vsub.f32 %v7050_v48, %v2566_v53  ;;  %v2568_v57 = vpop.f32.mrb[41].mxu0  ;;  %v6106_v53 = vld [vmem:[%s7880_s15 + $0xa0] sm:$0xff]  }
 0xe6a   :  { %v7262_v62 = vsub.f32 %v7054_v18, %v2568_v57  ;;  %v6108_v57 = vld [vmem:[%s7880_s15 + $0xb0] sm:$0xff]  }
 0xe6b   :  { %v2577_v63 = vmul.f32 %v7259_v56, %v7259_v56 }
 0xe6c   :  { %v2578_v32 = vmul.f32 %v7262_v62, %v7262_v62 }
 0xe6d   :  { %v5791_v7 = vpack.c.bf16 %v2577_v63, %v2575_v42 }
 0xe6e   :  { %v5788_v4 = vpack.c.bf16 %v2578_v32, %v2576_v2 }
 0xe70   :  { %5790 = vmatprep.subr.msk.bf16.mxu0 %vm7058_vm0, %v5788_v4 }
 0xe71   :  { %5793 = vmatpush1.bf16.msk.msra.mxu0 %vm7058_vm0, %v5791_v7 }
 0xe72   :  { %5794 = vmatprep.subr.bf16.mxu0 %v6181_v46 }
 0xe74   :  { %5097 = vmatmul.mubr.msk.f32.vlgmr.msra.gmra.mrb[42].mxu0 %vm2220_vm7, %v7075_v50 }
 0xe75   :  { %5796 = vmatpush1.bf16.msra.mxu0 %v7077_v52 }
 0xe76   :  { %5797 = vmatprep.subr.bf16.mxu0 %v6181_v46 }
 0xe79   :  { %5799 = vmatpush1.bf16.msra.mxu0 %v7089_v61  ;;  %v5099_v61 = vld [vmem:[%s7933_s7] ss:$0 sm:$0xff] }
 0xe7a   :  { %5800 = vmatprep.subr.bf16.mxu0 %v6181_v46 }
 0xe7d   :  { %5802 = vmatpush1.bf16.msra.mxu0 %v7099_v6 }
 0xe7e   :  { %5803 = vmatprep.subr.bf16.mxu0 %v6181_v46 }
 0xe81   :  { %5805 = vmatpush1.bf16.msra.mxu0 %v7109_v19 }
 0xe82   :  { %5806 = vmatprep.subr.bf16.mxu0 %v6181_v46 }
 0xe85   :  { %5808 = vmatpush1.bf16.msra.mxu0 %v7119_v41 }
 0xe86   :  { %5809 = vmatprep.subr.bf16.mxu0 %v6181_v46 }
 0xe89   :  { %5811 = vmatpush1.bf16.msra.mxu0 %v7129_v54 }
 0xe8a   :  { %5812 = vmatprep.subr.bf16.mxu0 %v6181_v46 }
 0xe8d   :  { %5814 = vmatpush1.bf16.msra.mxu0 %v7139_v59  ;;  %v2899_v59 = vld [vmem:[%s7881_s13] sm:$0x3] }
 0xe8e   :  { %5815 = vmatprep.subr.bf16.mxu0 %v6181_v46  ;;  %v2908_v8 = vrot.slane %v2899_v59, %v6748_v35 }
 0xe91   :  { %5817 = vmatpush1.bf16.msra.mxu0 %v7149_v1  ;;  %v2904_v1 = vrot.slane %v2899_v59, %v6742_v15 }
 0xe92   :  { %5818 = vmatprep.subr.bf16.mxu0 %v6181_v46 }
 0xe95   :  { %5820 = vmatpush1.bf16.msra.mxu0 %v7159_v5 }
 0xe96   :  { %5821 = vmatprep.subr.bf16.mxu0 %v6181_v46 }
 0xe99   :  { %5823 = vmatpush1.bf16.msra.mxu0 %v7169_v10 }
 0xe9a   :  { %5824 = vmatprep.subr.bf16.mxu0 %v6181_v46 }
 0xe9d   :  { %5826 = vmatpush1.bf16.msra.mxu0 %v7179_v14 }
 0xe9e   :  { %5827 = vmatprep.subr.bf16.mxu0 %v6181_v46 }
 0xea1   :  { %5829 = vmatpush1.bf16.msra.mxu0 %v7190_v26 }
 0xea2   :  { %5831 = vmatprep.subr.bf16.mxu0 %v7199_v30 }
 0xf47   :  { %v2651_v48 = vpop.f32.mrb[42].mxu0 }
 0xf48   :  { %v2653_v18 = vpop.f32.mrb[43].mxu0 }
 0xf49   :  { %5098 = vmatprep.mubr.msk.f32.mxu0 %vm2325_vm8, %v2653_v18 }
 0xf4a   :  { %2724 = vmatmul.mubr.f32.vlgmr.msra.gmra.mrb[44].mxu0 %v2651_v48  ;;  %v6110_v48 = vld [vmem:[%s7880_s15] sm:$0xff]  }
 0xf4b   :  { %5833 = vmatpush1.bf16.msra.mxu0 %v7214_v43  ;;  %2805 = vmatprep.mubr.f32.mxu0 %v6180_v45 }
 0xf4c   :  { %5835 = vmatprep.subr.bf16.mxu0 %v7216_v31 }
 0xf4f   :  { %5837 = vmatpush1.bf16.msra.mxu0 %v7226_v23 }
0x101d   :  { %v2725_v28 = vpop.f32.mrb[44].mxu0 }
0x101e   :  { %v2726_v50 = vadd.f32 1e-05, %v2725_v28  ;;  %v2727_v52 = vpop.f32.mrb[45].mxu0 }
0x1020   :  { %6175 = vrsqrt.f32 %v2726_v50 }
0x102a   :  { %v6176_v6 = vpop.eup %6175 }
0x102b   :  { %v2737_v19 = vmul.f32 %v6176_v6, %v5099_v61  ;;  %v6111_v6 = vld [vmem:[%s7880_s15 + $0x8] sm:$0xff]  }
0x102d   :  { %5100 = vmatmul.mubr.msk.f32.vlgmr.msra.gmra.mrb[46].mxu0 %vm2407_vm12, %v2737_v19 }
0x102e   :  { %2882 = vmatprep.mubr.f32.mxu0 %v6180_v45 }
0x1100   :  { %v2807_v41 = vpop.f32.mrb[46].mxu0 }
0x1101   :  { %v2809_v54 = vpop.f32.mrb[47].mxu0 }
0x1102   :  { %5101 = vmatprep.subr.msk.mxu0 %vm650_vm4, %v2809_v54  ;;  %v6112_v54 = vld [vmem:[%s7880_s15 + $0x10] sm:$0xff]  }
0x1103   :  { %5102 = vmatpush1.msk.msra.mxu0 %vm650_vm4, %v2807_v41 }
0x1104   :  { %5103 = vmatmul.mubr.msk.f32.vlgmr.msra.gmra.mrb[48].mxu0 %vm907_vm5, %v7239_v9  ;;  %v6100_v9 = vld [vmem:[%s7880_s15 + $0x70] sm:$0xff]  }
0x1105   :  { %2888 = vmatprep.mubr.f32.mxu0 %v6180_v45 }
0x1108   :  { %5104 = vmatmul.mubr.msk.f32.gmra.mrb[50].mxu0 %vm907_vm5, %v7247_v12  ;;  %v6101_v12 = vld [vmem:[%s7880_s15 + $0x78] sm:$0xff]  }
0x1109   :  { %3043 = vmatprep.mubr.bf16.mxu0 %v6179_v16 }
0x11d7   :  { %v2884_v5 = vpop.f32.mrb[48].mxu0 }
0x11d8   :  { %v2895_v10 = vmul.f32 %v2884_v5, %v7253_v36  ;;  %v2886_v11 = vpop.f32.mrb[49].mxu0  ;;  %v6103_v36 = vld [vmem:[%s7880_s15 + $0x88] sm:$0xff]   ;;  %v6113_v5 = vld [vmem:[%s7880_s15 + $0x18] sm:$0xff]  }
0x11d9   :  { %v2896_v13 = vmul.f32 %v2886_v11, %v7256_v51  ;;  %v6105_v51 = vld [vmem:[%s7880_s15 + $0x98] sm:$0xff]   ;;  %v6116_v11 = vld [vmem:[%s7880_s15 + $0x30] sm:$0xff]  }
0x11da   :  { %v2911_v14 = vadd.f32 %v2904_v1, %v2895_v10  ;;  %v6115_v10 = vld [vmem:[%s7880_s15 + $0x28] sm:$0xff]  }
0x11db   :  { %v2912_v17 = vadd.f32 %v2908_v8, %v2896_v13  ;;  %v2890_v20 = vpop.f32.mrb[50].mxu0  ;;  %v6117_v13 = vld [vmem:[%s7880_s15 + $0x38] sm:$0xff]  }
0x11dc   :  { %v2897_v26 = vmul.f32 %v2890_v20, %v7259_v56  ;;  %v2892_v24 = vpop.f32.mrb[51].mxu0  ;;  %v2919_v30 = vmul.f32 0.2, %v2911_v14  ;;  %vm2915_vm11 = vcmp.gt.f32.partialorder %v2911_v14, 0.0  ;;  %v6107_v56 = vld [vmem:[%s7880_s15 + $0xa8] sm:$0xff]   ;;  %v6120_v20 = vld [vmem:[%s7880_s15 + $0x50] sm:$0xff]  }
0x11dd   :  { %v2898_v22 = vmul.f32 %v2892_v24, %v7262_v62  ;;  %v2920_v37 = vmul.f32 0.2, %v2912_v17  ;;  %vm2916_vm0 = vcmp.gt.f32.partialorder %v2912_v17, 0.0  ;;  %v6109_v62 = vld [vmem:[%s7880_s15 + $0xb8] sm:$0xff]  }
0x11de   :  { %v2913_v34 = vadd.f32 %v2904_v1, %v2897_v26  ;;  %v2923_v43 = vsel %vm2915_vm11, %v2911_v14, %v2919_v30  ;;  %v6118_v14 = vld [vmem:[%s7880_s15 + $0x40] sm:$0xff]   ;;  %v6121_v26 = vld [vmem:[%s7880_s15 + $0x58] sm:$0xff]  }
0x11df   :  { %v2914_v39 = vadd.f32 %v2908_v8, %v2898_v22  ;;  %v2924_v31 = vsel %vm2916_vm0, %v2912_v17, %v2920_v37  ;;  %v6114_v8 = vld [vmem:[%s7880_s15 + $0x20] sm:$0xff]   ;;  %v6119_v17 = vld [vmem:[%s7880_s15 + $0x48] sm:$0xff]   ;;  %v6124_v37 = vld [vmem:[%s7880_s15 + $0xd0] sm:$0xff]   ;;  %vm3512_vm0 = vcmask 31744  }
0x11e0   :  { %vm2917_vm2 = vcmp.gt.f32.partialorder %v2913_v34, 0.0  ;;  %v2921_v40 = vmul.f32 0.2, %v2913_v34  ;;  %v6122_v22 = vld [vmem:[%s7880_s15 + $0xc0] sm:$0xff]  }
0x11e1   :  { %vm2918_vm12 = vcmp.gt.f32.partialorder %v2914_v39, 0.0  ;;  %v2922_v25 = vmul.f32 0.2, %v2914_v39 }
0x11e2   :  { %v2925_v27 = vsel %vm2917_vm2, %v2913_v34, %v2921_v40  ;;  %v6123_v34 = vld [vmem:[%s7880_s15 + $0xc8] sm:$0xff]   ;;  %v6126_v40 = vld [vmem:[%s7880_s15 + $0xe0] sm:$0xff]  }
0x11e3   :  { %v2926_v47 = vsel %vm2918_vm12, %v2914_v39, %v2922_v25  ;;  %v2927_v49 = vpack.c.bf16 %v2925_v27, %v2923_v43  ;;  %v6125_v39 = vld [vmem:[%s7880_s15 + $0xd8] sm:$0xff]   ;;  %v6127_v25 = vld [vmem:[%s7880_s15 + $0xe8] sm:$0xff]   ;;  %v6128_v43 = vld [vmem:[%s7880_s15 + $0xf0] sm:$0xff]  }
0x11e4   :  { %v2928_v23 = vpack.c.bf16 %v2926_v47, %v2924_v31  ;;  %v6129_v27 = vld [vmem:[%s7880_s15 + $0xf8] sm:$0xff]   ;;  %v6130_v31 = vld [vmem:[%s7880_s15 + $0x100] sm:$0xff]   ;;  %v6131_v47 = vld [vmem:[%s7880_s15 + $0x108] sm:$0xff]  }
0x11e5   :  { %v2934_v33 = vsel %vm7934_vm3, %v2927_v49, 0  ;;  %v6132_v49 = vld [vmem:[%s7880_s15 + $0x110] sm:$0xff]  }
0x11e6   :  { %5105 = vmatprep.subr.msk.bf16.mxu1 %vm7935_vm6, %v2928_v23  ;;  %5108 = vmatprep.subr.msk.bf16.mxu0 %vm7936_vm9, %v2928_v23  ;;  %vm4850_vm9 = vcmask 1024  }
0x11e7   :  { %2940 = vmatpush1.bf16.msra.mxu1 %v2934_v33  ;;  %3012 = vmatpush1.bf16.msra.mxu0 %v2934_v33 }
0x11e8   :  { %5161 = vmatprep.subr.msk.bf16.mxu0 %vm7937_vm13, %v2928_v23  ;;  %3154 = vmatprep.subr.bf16.mxu1 %v6179_v16  ;;  %v6133_v23 = vld [vmem:[%s7880_s15 + $0x118] sm:$0xff]  }
0x11ea   :  { %5109 = vmatmul.mubr.msk.bf16.vlgmr.msra.gmra.mrb[52].mxu0 %vm2220_vm7, %v5107_v44  ;;  %5106 = vmatmul.mubr.msk.bf16.vlgmr.msra.gmra.mrb[32].mxu1 %vm2220_vm7, %v2929_v55  ;;  %v7505_v44 = vmul.u32 2, %v6540_v21 }
0x11eb   :  { %3315 = vmatpush1.bf16.msra.mxu0 %v2934_v33  ;;  %3346 = vmatprep.mubr.bf16.mxu0 %v6179_v16 }
0x11ec   :  { %3155 = vmatpush1.bf16.msra.mxu1 %v6098_v58  ;;  %5442 = vmatprep.subr.mxu0 %v6180_v45  ;;  %v3500_v55 = vadd.s32 2, %v7505_v44  ;;  %vm3499_vm14 = vcmp.ge.s32.totalorder %v6555_v29, %v7505_v44  ;;  %v3589_v58 = vld [vmem:[%s7883_s16] sm:$0xff] }
0x11ed   :  { %3156 = vmatprep.subr.bf16.mxu1 %v6179_v16 }
0x11ee   :  { %vm3501_vm10 = vcmp.lt.s32.totalorder %v6555_v29, %v3500_v55 }
0x11ef   :  { %vm3502_vm11 = vmand %vm3499_vm14, %vm3501_vm10 }
0x11f0   :  { %3157 = vmatpush1.bf16.msra.mxu1 %v6099_v0  ;;  %v3590_v0 = vld [vmem:[%s7883_s16 + $0x8] sm:$0xff] }
0x11f1   :  { %3158 = vmatprep.subr.bf16.mxu1 %v6179_v16 }
0x11f2   :  { %5162 = vmatmul.mubr.msk.bf16.vlgmr.msra.gmra.mrb[56].mxu0 %vm2220_vm7, %v5160_v3  ;;  %vm6183_vm7 = vmmov 0   ;;  %v7518_v3 = vsel %vm3502_vm11, 1.0, %v6180_v45 }
0x11f3   :  { %5444 = vmatprep.mubr.msk.f32.mxu0 %vm6183_vm7, %v6180_v45 }
0x11f4   :  { %3159 = vmatpush1.bf16.msra.mxu1 %v6100_v9  ;;  %v7520_v9 = vpack.c.bf16 %v3590_v0, %v3589_v58 }
0x11f5   :  { %3160 = vmatprep.subr.bf16.mxu1 %v6179_v16 }
0x11f8   :  { %3161 = vmatpush1.bf16.msra.mxu1 %v6101_v12 }
0x11f9   :  { %3162 = vmatprep.subr.bf16.mxu1 %v6179_v16 }
0x11fc   :  { %3163 = vmatpush1.bf16.msra.mxu1 %v6102_v60  ;;  %v3591_v60 = vld [vmem:[%s7883_s16 + $0x10] sm:$0xff] }
0x11fd   :  { %3164 = vmatprep.subr.bf16.mxu1 %v6179_v16 }
0x1200   :  { %3165 = vmatpush1.bf16.msra.mxu1 %v6103_v36  ;;  %v3592_v36 = vld [vmem:[%s7883_s16 + $0x18] sm:$0xff] }
0x1201   :  { %3166 = vmatprep.subr.bf16.mxu1 %v6179_v16 }
0x1204   :  { %3167 = vmatpush1.bf16.msra.mxu1 %v6104_v38 }
0x1205   :  { %3168 = vmatprep.subr.bf16.mxu1 %v6179_v16 }
0x1208   :  { %3169 = vmatpush1.bf16.msra.mxu1 %v6105_v51 }
0x1209   :  { %3170 = vmatprep.subr.bf16.mxu1 %v6179_v16 }
0x120c   :  { %3171 = vmatpush1.bf16.msra.mxu1 %v6106_v53 }
0x120d   :  { %3172 = vmatprep.subr.bf16.mxu1 %v6179_v16 }
0x1210   :  { %3173 = vmatpush1.bf16.msra.mxu1 %v6107_v56  ;;  %v7536_v56 = vpack.c.bf16 %v3592_v36, %v3591_v60  ;;  %v6135_v36 = vld [vmem:[%s7886_s22] sm:$0xff]  }
0x1211   :  { %3174 = vmatprep.subr.bf16.mxu1 %v6179_v16 }
0x1214   :  { %3175 = vmatpush1.bf16.msra.mxu1 %v6108_v57  ;;  %v3593_v57 = vld [vmem:[%s7883_s16 + $0x20] sm:$0xff] }
0x1215   :  { %3176 = vmatprep.subr.bf16.mxu1 %v6179_v16 }
0x1218   :  { %3177 = vmatpush1.bf16.msra.mxu1 %v6109_v62  ;;  %v3594_v62 = vld [vmem:[%s7883_s16 + $0x28] sm:$0xff] }
0x1219   :  { %3269 = vmatprep.subr.bf16.mxu1 %v6179_v16 }
0x12bd   :  { %v3045_v63 = vpop.f32.mrb[52].mxu0  ;;  %v2973_v2 = vpop.f32.mrb[32].mxu1 }
0x12be   :  { %v3047_v32 = vpop.f32.mrb[53].mxu0  ;;  %v2975_v42 = vpop.f32.mrb[33].mxu1  ;;  %v3052_v50 = vpack.c.bf16 %v3045_v63, %v3045_v63  ;;  %v2980_v24 = vpack.c.bf16 %v2973_v2, %v2973_v2  ;;  %v7548_v63 = vpack.c.bf16 %v3594_v62, %v3593_v57  ;;  %v3595_v2 = vld [vmem:[%s7883_s16 + $0x30] sm:$0xff]  ;;  %v6145_v57 = vld [vmem:[%s7886_s22 + $0x28] sm:$0xff]  }
0x12bf   :  { %v3053_v4 = vpack.c.bf16 %v3047_v32, %v3047_v32  ;;  %v3049_v7 = vpop.f32.mrb[54].mxu0  ;;  %v2981_v18 = vpack.c.bf16 %v2975_v42, %v2975_v42  ;;  %v2977_v28 = vpop.f32.mrb[34].mxu1  ;;  %v3596_v32 = vld [vmem:[%s7883_s16 + $0x38] sm:$0xff]  ;;  %v6147_v62 = vld [vmem:[%s7886_s22 + $0x30] sm:$0xff]  }
0x12c0   :  { %v3050_v52 = vpop.f32.mrb[55].mxu0  ;;  %v2978_v61 = vpop.f32.mrb[35].mxu1  ;;  %v7558_v42 = vpack.c.bf16 %v3596_v32, %v3595_v2  ;;  %v3598_v7 = vld [vmem:[%s7883_s16 + $0x48] sm:$0xff]  ;;  %v3600_v28 = vld [vmem:[%s7883_s16 + $0x58] sm:$0xff]  ;;  %v5213_v2 = vld [vmem:[%s7887_s19] ss:$0 sm:$0xff] }
0x12c1   :  { %5146 = vmatprep.mubr.msk.bf16.mxu1 %vm2325_vm8, %v3053_v4  ;;  %v3597_v4 = vld [vmem:[%s7883_s16 + $0x40] sm:$0xff]  ;;  %v3602_v61 = vld [vmem:[%s7883_s16 + $0x68] sm:$0xff] }
0x12c2   :  { %3187 = vmatmul.mubr.bf16.vlgmr.msra.gmra.mrb[36].mxu1 %v3052_v50  ;;  %v3601_v52 = vld [vmem:[%s7883_s16 + $0x60] sm:$0xff] }
0x12c3   :  { %3270 = vmatpush1.bf16.msra.mxu1 %v6110_v48  ;;  %5159 = vmatprep.mubr.msk.bf16.mxu1 %vm2325_vm8, %v2981_v18  ;;  %v7568_v48 = vpack.c.bf16 %v3598_v7, %v3597_v4  ;;  %v3599_v18 = vld [vmem:[%s7883_s16 + $0x50] sm:$0xff]  ;;  %v4240_v7 = vadd.s32 1, %v7505_v44 }
0x12c4   :  { %3271 = vmatprep.subr.bf16.mxu1 %v6179_v16  ;;  %v7578_v50 = vpack.c.bf16 %v3600_v28, %v3599_v18 }
0x12c5   :  { %v7406_v19 = vpop.f32.mrb[56].mxu0  ;;  %vm4241_vm6 = vcmp.eq.s32.totalorder %v6555_v29, %v4240_v7  ;;  %v6170_v7 = vld [vmem:[%s7891_s25 + $0x8] sm:$0xff]  }
0x12c6   :  { %v3350_v41 = vpop.f32.mrb[57].mxu0  ;;  %v3355_v33 = vpack.c.bf16 %v7406_v19, %v7406_v19  ;;  %v3603_v19 = vld [vmem:[%s7883_s16 + $0x70] sm:$0xff] }
0x12c7   :  { %3272 = vmatpush1.bf16.msra.mxu1 %v6111_v6  ;;  %v3352_v59 = vpop.f32.mrb[58].mxu0  ;;  %v3356_v30 = vpack.c.bf16 %v3350_v41, %v3350_v41  ;;  %v7588_v6 = vpack.c.bf16 %v3602_v61, %v3601_v52  ;;  %v3604_v41 = vld [vmem:[%s7883_s16 + $0x78] sm:$0xff]  ;;  %v6138_v52 = vld [vmem:[%s7886_s22 + $0x50] sm:$0xff]  }
0x12c8   :  { %3273 = vmatprep.subr.bf16.mxu1 %v6179_v16  ;;  %v3353_v1 = vpop.f32.mrb[59].mxu0  ;;  %v3675_v59 = vld [vmem:[%s7884_s17] sm:$0xff]  ;;  %v6140_v61 = vld [vmem:[%s7886_s22 + $0x58] sm:$0xff]  }
0x12c9   :  { %v3676_v1 = vld [vmem:[%s7884_s17 + $0x8] sm:$0xff] }
0x12cb   :  { %3274 = vmatpush1.bf16.msra.mxu1 %v6112_v54  ;;  %v7598_v54 = vpack.c.bf16 %v3604_v41, %v3603_v19  ;;  %v6144_v19 = vld [vmem:[%s7886_s22 + $0x68] sm:$0xff]   ;;  %v6146_v41 = vld [vmem:[%s7886_s22 + $0x70] sm:$0xff]  }
0x12cc   :  { %3275 = vmatprep.subr.bf16.mxu1 %v6179_v16 }
0x12cf   :  { %3276 = vmatpush1.bf16.msra.mxu1 %v6113_v5  ;;  %v7609_v5 = vpack.c.bf16 %v3676_v1, %v3675_v59  ;;  %v6148_v59 = vld [vmem:[%s7886_s22 + $0x78] sm:$0xff]   ;;  %v6150_v1 = vld [vmem:[%s7888_s20 + $0x4] ss:$8 sps:$4 sm:$0x1f]  }
0x12d0   :  { %3277 = vmatprep.subr.bf16.mxu1 %v6179_v16 }
0x12d3   :  { %3278 = vmatpush1.bf16.msra.mxu1 %v6114_v8  ;;  %v3677_v8 = vld [vmem:[%s7884_s17 + $0x10] sm:$0xff] }
0x12d4   :  { %3279 = vmatprep.subr.bf16.mxu1 %v6179_v16 }
0x12d7   :  { %3280 = vmatpush1.bf16.msra.mxu1 %v6115_v10  ;;  %v3678_v10 = vld [vmem:[%s7884_s17 + $0x18] sm:$0xff] }
0x12d8   :  { %3281 = vmatprep.subr.bf16.mxu1 %v6179_v16 }
0x12db   :  { %3282 = vmatpush1.bf16.msra.mxu1 %v6116_v11 }
0x12dc   :  { %3283 = vmatprep.subr.bf16.mxu1 %v6179_v16 }
0x12df   :  { %3284 = vmatpush1.bf16.msra.mxu1 %v6117_v13 }
0x12e0   :  { %3285 = vmatprep.subr.bf16.mxu1 %v6179_v16 }
0x12e3   :  { %3286 = vmatpush1.bf16.msra.mxu1 %v6118_v14  ;;  %v5866_v14 = vpack.c.bf16 %v3678_v10, %v3677_v8  ;;  %v6154_v10 = vld [vmem:[%s7889_s23] sm:$0xff]  }
0x12e4   :  { %3287 = vmatprep.subr.bf16.mxu1 %v6179_v16 }
0x12e7   :  { %3288 = vmatpush1.bf16.msra.mxu1 %v6119_v17  ;;  %v3679_v17 = vld [vmem:[%s7884_s17 + $0x20] sm:$0xff] }
0x12e8   :  { %3289 = vmatprep.subr.bf16.mxu1 %v6179_v16 }
0x12eb   :  { %3290 = vmatpush1.bf16.msra.mxu1 %v6120_v20  ;;  %v3680_v20 = vld [vmem:[%s7884_s17 + $0x28] sm:$0xff] }
0x12ec   :  { %3291 = vmatprep.subr.bf16.mxu1 %v6179_v16 }
0x12ef   :  { %3292 = vmatpush1.bf16.msra.mxu1 %v6121_v26  ;;  %v5869_v26 = vpack.c.bf16 %v3680_v20, %v3679_v17  ;;  %v6155_v17 = vld [vmem:[%s7889_s23 + $0x48] sm:$0xff]  }
0x12f0   :  { %3457 = vmatprep.subr.bf16.mxu1 %v6179_v16 }
0x12f2   :  { %3302 = vmatmul.mubr.bf16.vlgmr.msra.gmra.mrb[36].mxu1 %v2980_v24  ;;  %v3681_v24 = vld [vmem:[%s7884_s17 + $0x30] sm:$0xff] }
0x12f3   :  { %3458 = vmatpush1.bf16.msra.mxu1 %v6122_v22  ;;  %5199 = vmatprep.mubr.msk.bf16.mxu1 %vm2325_vm8, %v3356_v30  ;;  %v3682_v22 = vld [vmem:[%s7884_s17 + $0x38] sm:$0xff] }
0x12f4   :  { %3459 = vmatprep.subr.bf16.mxu1 %v6179_v16  ;;  %v5872_v30 = vpack.c.bf16 %v3682_v22, %v3681_v24 }
0x12f7   :  { %3460 = vmatpush1.bf16.msra.mxu1 %v6123_v34 }
0x12f8   :  { %3461 = vmatprep.subr.bf16.mxu1 %v6179_v16 }
0x12fb   :  { %3462 = vmatpush1.bf16.msra.mxu1 %v6124_v37 }
0x12fc   :  { %3463 = vmatprep.subr.bf16.mxu1 %v6179_v16 }
0x12ff   :  { %3464 = vmatpush1.bf16.msra.mxu1 %v6125_v39  ;;  %v3505_v39 = vmul.u32 2, %v6555_v29 }
0x1300   :  { %3465 = vmatprep.subr.bf16.mxu1 %v6179_v16 }
0x1301   :  { %vm3506_vm2 = vcmp.ge.s32.totalorder %v6540_v21, %v3505_v39 }
0x1303   :  { %3466 = vmatpush1.bf16.msra.mxu1 %v6126_v40  ;;  %v3507_v40 = vadd.s32 2, %v3505_v39  ;;  %v6159_v39 = vld [vmem:[%s7889_s23 + $0x58] sm:$0xff]  }
0x1304   :  { %3467 = vmatprep.subr.bf16.mxu1 %v6179_v16 }
0x1305   :  { %vm3508_vm12 = vcmp.lt.s32.totalorder %v6540_v21, %v3507_v40  ;;  %v4511_v40 = vld [vmem:[%s7890_s1] sm:$0x1] }
0x1306   :  { %vm3509_vm3 = vmand %vm3506_vm2, %vm3508_vm12 }
0x1307   :  { %3468 = vmatpush1.bf16.msra.mxu1 %v6127_v25  ;;  %v5201_v25 = vsel %vm3509_vm3, 1.0, %v6180_v45 }
0x1308   :  { %3469 = vmatprep.subr.bf16.mxu1 %v6179_v16 }
0x130b   :  { %3470 = vmatpush1.bf16.msra.mxu1 %v6128_v43 }
0x130c   :  { %3471 = vmatprep.subr.bf16.mxu1 %v6179_v16 }
0x130f   :  { %3472 = vmatpush1.bf16.msra.mxu1 %v6129_v27 }
0x1310   :  { %3473 = vmatprep.subr.bf16.mxu1 %v6179_v16 }
0x1313   :  { %3474 = vmatpush1.bf16.msra.mxu1 %v6130_v31 }
0x1314   :  { %3475 = vmatprep.subr.bf16.mxu1 %v6179_v16 }
0x1317   :  { %3476 = vmatpush1.bf16.msra.mxu1 %v6131_v47 }
0x1318   :  { %3477 = vmatprep.subr.bf16.mxu1 %v6179_v16 }
0x131b   :  { %3478 = vmatpush1.bf16.msra.mxu1 %v6132_v49 }
0x131c   :  { %3479 = vmatprep.subr.bf16.mxu1 %v6179_v16 }
0x131f   :  { %3480 = vmatpush1.bf16.msra.mxu1 %v6133_v23 }
0x1320   :  { %5600 = vmatprep.subr.bf16.mxu1 %v6180_v45 }
0x1322   :  { %3490 = vmatmul.mubr.bf16.vlgmr.msra.gmra.mrb[36].mxu1 %v3355_v33 }
0x1323   :  { %5616 = vmatprep.mubr.msk.bf16.mxu1 %vm6183_vm7, %v6180_v45  ;;  %5601 = vmatpush3.bf16.msra.mxu1 %v6135_v36  ;;  %v4514_v36 = vld [vmem:[%s7892_s21] sm:$0x3] }
0x1324   :  { %5602 = vmatprep.subr.bf16.mxu1 %v6180_v45 }
0x13f5   :  { %v7522_v12 = vpop.f32.mrb[36].mxu1 }
0x13f6   :  { %v3493_v38 = vpop.f32.mrb[37].mxu1  ;;  %5443 = vmatpush3.msk.msra.mxu0 %vm138_vm1, %v7522_v12 }
0x13f7   :  { %v3494_v51 = vpop.f32.mrb[38].mxu1  ;;  %5445 = vmatmul.mubr.msk.f32.vlgmr.msra.gmra.mrb[60].mxu0 %vm3512_vm0, %v7518_v3  ;;  %5838 = vmatprep.subr.bf16.mxu0 %v6181_v46  ;;  %v6137_v38 = vld [vmem:[%s7886_s22 + $0x8] sm:$0xff]  }
0x13f8   :  { %v3495_v53 = vpop.f32.mrb[39].mxu1  ;;  %5840 = vmatpush3.bf16.msra.mxu0 %v7520_v9  ;;  %5479 = vmatprep.mubr.msk.f32.mxu0 %vm6183_vm7, %v6180_v45  ;;  %v6139_v51 = vld [vmem:[%s7886_s22 + $0x10] sm:$0xff]  }
0x13f9   :  { %5841 = vmatprep.subr.bf16.mxu0 %v6181_v46  ;;  %5603 = vmatpush3.bf16.msra.mxu1 %v6137_v38  ;;  %v6141_v53 = vld [vmem:[%s7886_s22 + $0x18] sm:$0xff]  }
0x13fa   :  { %5604 = vmatprep.subr.bf16.mxu1 %v6180_v45 }
0x13fc   :  { %5843 = vmatpush3.bf16.msra.mxu0 %v7536_v56 }
0x13fd   :  { %5844 = vmatprep.subr.bf16.mxu0 %v6181_v46  ;;  %5605 = vmatpush3.bf16.msra.mxu1 %v6139_v51  ;;  %v4519_v51 = vrot.slane %v4514_v36, %v6742_v15  ;;  %v6171_v15 = vld [vmem:[%s7891_s25 + $0x10] sm:$0xff]  }
0x13fe   :  { %5606 = vmatprep.subr.bf16.mxu1 %v6180_v45 }
0x1400   :  { %5846 = vmatpush3.bf16.msra.mxu0 %v7548_v63 }
0x1401   :  { %5847 = vmatprep.subr.bf16.mxu0 %v6181_v46  ;;  %5607 = vmatpush3.bf16.msra.mxu1 %v6141_v53  ;;  %v4523_v53 = vrot.slane %v4514_v36, %v6748_v35  ;;  %v6172_v35 = vld [vmem:[%s7891_s25 + $0x18] sm:$0xff]  }
0x1402   :  { %5608 = vmatprep.subr.bf16.mxu1 %v6180_v45 }
0x1404   :  { %5849 = vmatpush3.bf16.msra.mxu0 %v7558_v42 }
0x1405   :  { %5850 = vmatprep.subr.bf16.mxu0 %v6181_v46 }
0x1408   :  { %5852 = vmatpush3.bf16.msra.mxu0 %v7568_v48 }
0x1409   :  { %5853 = vmatprep.subr.bf16.mxu0 %v6181_v46 }
0x140c   :  { %5855 = vmatpush3.bf16.msra.mxu0 %v7578_v50 }
0x140d   :  { %5856 = vmatprep.subr.bf16.mxu0 %v6181_v46 }
0x1410   :  { %5858 = vmatpush3.bf16.msra.mxu0 %v7588_v6 }
0x1411   :  { %5859 = vmatprep.subr.bf16.mxu0 %v6181_v46 }
0x1414   :  { %5861 = vmatpush3.bf16.msra.mxu0 %v7598_v54 }
0x1415   :  { %5862 = vmatprep.subr.bf16.mxu0 %v6181_v46 }
0x14ca   :  { %v3585_v11 = vpop.f32.mrb[60].mxu0 }
0x14cb   :  { %5480 = vmatmul.mubr.f32.vlgmr.msra.gmra.mrb[62].mxu0 %v3585_v11  ;;  %v5446_v13 = vpop.f32.mrb[61].mxu0 }
0x14cc   :  { %5864 = vmatpush3.bf16.msra.mxu0 %v7609_v5  ;;  %5498 = vmatprep.mubr.msk.f32.mxu0 %vm6183_vm7, %v6180_v45 }
0x14cd   :  { %5865 = vmatprep.subr.bf16.mxu0 %v6181_v46 }
0x14d0   :  { %5867 = vmatpush3.bf16.msra.mxu0 %v5866_v14 }
0x14d1   :  { %5868 = vmatprep.subr.bf16.mxu0 %v6181_v46 }
0x14d4   :  { %5870 = vmatpush3.bf16.msra.mxu0 %v5869_v26 }
0x14d5   :  { %5871 = vmatprep.subr.bf16.mxu0 %v6181_v46 }
0x14d8   :  { %5873 = vmatpush3.bf16.msra.mxu0 %v5872_v30 }
0x14d9   :  { %5501 = vmatprep.subr.mxu0 %v6180_v45 }
0x159e   :  { %v3671_v34 = vpop.f32.mrb[62].mxu0 }
0x159f   :  { %5499 = vmatmul.mubr.msk.f32.vlgmr.msra.gmra.mrb[64].mxu0 %vm2325_vm8, %v3671_v34  ;;  %v5481_v37 = vpop.f32.mrb[63].mxu0  ;;  %v6157_v34 = vld [vmem:[%s7889_s23 + $0x50] sm:$0xff]  }
0x15a0   :  { %5503 = vmatprep.mubr.msk.f32.mxu0 %vm6183_vm7, %v6180_v45  ;;  %v6158_v37 = vld [vmem:[%s7889_s23 + $0x10] sm:$0xff]  }
0x1672   :  { %v3752_v43 = vpop.f32.mrb[64].mxu0 }
0x1673   :  { %5502 = vmatpush3.msk.msra.mxu0 %vm650_vm4, %v3752_v43  ;;  %v5500_v27 = vpop.f32.mrb[65].mxu0  ;;  %v6162_v43 = vld [vmem:[%s7889_s23 + $0x20] sm:$0xff]  }
0x1674   :  { %5504 = vmatmul.mubr.msk.f32.vlgmr.msra.gmra.mrb[66].mxu0 %vm907_vm5, %v5201_v25  ;;  %5506 = vmatprep.subr.mxu0 %v6180_v45  ;;  %v6163_v27 = vld [vmem:[%s7889_s23 + $0x68] sm:$0xff]  }
0x1675   :  { %5508 = vmatprep.mubr.msk.f32.mxu0 %vm6183_vm7, %v6180_v45 }
0x1747   :  { %v3828_v31 = vpop.f32.mrb[66].mxu0 }
0x1748   :  { %v7649_v47 = vsub.f32 %v7522_v12, %v3828_v31  ;;  %v5505_v49 = vpop.f32.mrb[67].mxu0  ;;  %v6164_v31 = vld [vmem:[%s7889_s23 + $0x28] sm:$0xff]  }
0x1749   :  { %v6166_v49 = vld [vmem:[%s7889_s23 + $0x30] sm:$0xff]  }
0x174a   :  { %v3833_v21 = vmul.f32 %v7649_v47, %v7649_v47 }
0x174c   :  { %5507 = vmatpush3.msk.msra.mxu0 %vm138_vm1, %v3833_v21  ;;  %v6167_v21 = vld [vmem:[%s7889_s23 + $0x78] sm:$0xff]  }
0x174d   :  { %5509 = vmatmul.mubr.msk.f32.vlgmr.msra.gmra.mrb[68].mxu0 %vm3512_vm0, %v7518_v3  ;;  %5874 = vmatprep.subr.bf16.mxu0 %v6181_v46  ;;  %v5209_v3 = vld [vmem:[%s7885_s18] ss:$0 sm:$0xff] }
0x174e   :  { %5876 = vmatpush3.bf16.msra.mxu0 %v7520_v9  ;;  %5543 = vmatprep.mubr.msk.f32.mxu0 %vm6183_vm7, %v6180_v45 }
0x174f   :  { %5877 = vmatprep.subr.bf16.mxu0 %v6181_v46 }
0x1752   :  { %5879 = vmatpush3.bf16.msra.mxu0 %v7536_v56  ;;  %v6143_v56 = vld [vmem:[%s7886_s22 + $0x20] sm:$0xff]  }
0x1753   :  { %5880 = vmatprep.subr.bf16.mxu0 %v6181_v46  ;;  %5609 = vmatpush3.bf16.msra.mxu1 %v6143_v56 }
0x1754   :  { %5610 = vmatprep.subr.bf16.mxu1 %v6180_v45 }
0x1756   :  { %5882 = vmatpush3.bf16.msra.mxu0 %v7548_v63 }
0x1757   :  { %5883 = vmatprep.subr.bf16.mxu0 %v6181_v46  ;;  %5611 = vmatpush3.bf16.msra.mxu1 %v6145_v57 }
0x1758   :  { %5612 = vmatprep.subr.bf16.mxu1 %v6180_v45 }
0x175a   :  { %5885 = vmatpush3.bf16.msra.mxu0 %v7558_v42 }
0x175b   :  { %5886 = vmatprep.subr.bf16.mxu0 %v6181_v46  ;;  %5613 = vmatpush3.bf16.msra.mxu1 %v6147_v62 }
0x175c   :  { %5614 = vmatprep.subr.bf16.mxu1 %v6180_v45 }
0x175e   :  { %5888 = vmatpush3.bf16.msra.mxu0 %v7568_v48 }
0x175f   :  { %5889 = vmatprep.subr.bf16.mxu0 %v6181_v46 }
0x1762   :  { %5891 = vmatpush3.bf16.msra.mxu0 %v7578_v50  ;;  %v6134_v50 = vld [vmem:[%s7886_s22 + $0x40] sm:$0xff]  }
0x1763   :  { %5892 = vmatprep.subr.bf16.mxu0 %v6181_v46 }
0x1766   :  { %5894 = vmatpush3.bf16.msra.mxu0 %v7588_v6  ;;  %v6142_v6 = vld [vmem:[%s7886_s22 + $0x60] sm:$0xff]  }
0x1767   :  { %5895 = vmatprep.subr.bf16.mxu0 %v6181_v46 }
0x176a   :  { %5897 = vmatpush3.bf16.msra.mxu0 %v7598_v54  ;;  %v6149_v54 = vld [vmem:[%s7886_s22 + $0x38] sm:$0xff]  }
0x176b   :  { %5898 = vmatprep.subr.bf16.mxu0 %v6181_v46  ;;  %5615 = vmatpush3.bf16.msra.mxu1 %v6149_v54 }
0x1820   :  { %v3903_v23 = vpop.f32.mrb[68].mxu0 }
0x1821   :  { %5544 = vmatmul.mubr.f32.vlgmr.msra.gmra.mrb[70].mxu0 %v3903_v23  ;;  %v5510_v33 = vpop.f32.mrb[69].mxu0  ;;  %v6168_v23 = vld [vmem:[%s7889_s23 + $0x38] sm:$0xff]  }
0x1822   :  { %5900 = vmatpush3.bf16.msra.mxu0 %v7609_v5  ;;  %5562 = vmatprep.mubr.msk.f32.mxu0 %vm6183_vm7, %v6180_v45  ;;  %v6153_v5 = vld [vmem:[%s7889_s23 + $0x40] sm:$0xff]  }
0x1823   :  { %5901 = vmatprep.subr.bf16.mxu0 %v6181_v46  ;;  %5379 = vmatprep.subr.bf16.mxu1 %v6153_v5  ;;  %v6169_v33 = vld [vmem:[%s7891_s25] sm:$0xff]  }
0x1826   :  { %5903 = vmatpush3.bf16.msra.mxu0 %v5866_v14  ;;  %v6152_v14 = vld [vmem:[%s7888_s20] ss:$8 sps:$4 sm:$0x1f]  }
0x1827   :  { %5904 = vmatprep.subr.bf16.mxu0 %v6181_v46  ;;  %v4539_v22 = vsel %vm1425_vm15, %v6152_v14, 0 }
0x182a   :  { %5906 = vmatpush3.bf16.msra.mxu0 %v5869_v26 }
0x182b   :  { %5907 = vmatprep.subr.bf16.mxu0 %v6181_v46 }
0x182e   :  { %5909 = vmatpush3.bf16.msra.mxu0 %v5872_v30  ;;  %v6156_v30 = vld [vmem:[%s7889_s23 + $0x8] sm:$0xff]  }
0x182f   :  { %5565 = vmatprep.subr.mxu0 %v6180_v45 }
0x18f4   :  { %v3973_v55 = vpop.f32.mrb[70].mxu0 }
0x18f5   :  { %v3974_v58 = vadd.f32 1e-05, %v3973_v55  ;;  %v5545_v0 = vpop.f32.mrb[71].mxu0 }
0x18f7   :  { %6177 = vrsqrt.f32 %v3974_v58 }
0x1901   :  { %v6178_v9 = vpop.eup %6177 }
0x1902   :  { %v3985_v12 = vmul.f32 %v6178_v9, %v5209_v3 }
0x1904   :  { %5563 = vmatmul.mubr.msk.f32.vlgmr.msra.gmra.mrb[72].mxu0 %vm2325_vm8, %v3985_v12 }
0x1905   :  { %5567 = vmatprep.mubr.msk.f32.mxu0 %vm6183_vm7, %v6180_v45 }
0x19d7   :  { %v4055_v60 = vpop.f32.mrb[72].mxu0 }
0x19d8   :  { %5566 = vmatpush3.msk.msra.mxu0 %vm650_vm4, %v4055_v60  ;;  %v5564_v46 = vpop.f32.mrb[73].mxu0  ;;  %vm4144_vm4 = vcmp.eq.s32.totalorder %v6555_v29, %v7505_v44  ;;  %v5217_v44 = vsel %vm4241_vm6, 1.0, %v6180_v45  ;;  %v6136_v29 = vld [vmem:[%s7886_s22 + $0x48] sm:$0xff]  }
0x19d9   :  { %5568 = vmatmul.mubr.msk.f32.vlgmr.msra.gmra.mrb[74].mxu0 %vm907_vm5, %v5201_v25  ;;  %5570 = vmatprep.subr.mxu0 %v6180_v45  ;;  %v5214_v18 = vsel %vm4144_vm4, 1.0, %v6180_v45  ;;  %v6161_v25 = vld [vmem:[%s7889_s23 + $0x60] sm:$0xff]  }
0x19da   :  { %5572 = vmatprep.mubr.msk.f32.mxu0 %vm6183_vm7, %v6180_v45 }
0x1aac   :  { %v4128_v63 = vpop.f32.mrb[74].mxu0 }
0x1aad   :  { %v4132_v32 = vmul.f32 %v4128_v63, %v7649_v47  ;;  %v5569_v42 = vpop.f32.mrb[75].mxu0  ;;  %v6165_v47 = vld [vmem:[%s7889_s23 + $0x70] sm:$0xff]  }
0x1aaf   :  { %v4140_v4 = vadd.f32 %v5213_v2, %v4132_v32 }
0x1ab1   :  { %vm4141_vm5 = vcmp.gt.f32.partialorder %v4140_v4, 0.0  ;;  %v4142_v48 = vmul.f32 0.2, %v4140_v4 }
0x1ab3   :  { %v4143_v28 = vsel %vm4141_vm5, %v4140_v4, %v4142_v48  ;;  %v32_v48 = vstv %s7893_s26 }
0x1ab4   :  { %5571 = vmatpush3.msk.msra.mxu0 %vm138_vm1, %v4143_v28  ;;  %33 = vst [vmem:[#allocation2] sm:$0x1] %v32_v48 }
0x1ab5   :  { %5573 = vmatmul.mubr.msk.f32.vlgmr.msra.gmra.mrb[76].mxu0 %vm3512_vm0, %v5214_v18  ;;  %5575 = vmatprep.subr.mxu0 %v6180_v45 }
0x1ab6   :  { %5576 = vmatpush3.msk.msra.mxu0 %vm138_vm1, %v4143_v28  ;;  %5577 = vmatprep.mubr.msk.f32.mxu0 %vm6183_vm7, %v6180_v45  ;;  %vm4534_vm1 = vcmask 80896  }
0x1ab7   :  { %5580 = vmatprep.subr.bf16.mxu0 %v6180_v45 }
0x1ab9   :  { %5578 = vmatmul.mubr.msk.f32.vlgmr.msra.gmra.mrb[78].mxu0 %vm3512_vm0, %v5217_v44 }
0x1aba   :  { %5581 = vmatpush3.bf16.msra.mxu0 %v6134_v50  ;;  %5596 = vmatprep.mubr.msk.bf16.mxu0 %vm6183_vm7, %v6180_v45 }
0x1abb   :  { %5582 = vmatprep.subr.bf16.mxu0 %v6180_v45  ;;  %v5273_v54 = vld [vmem:[#allocation2] ss:$0 sm:$0xff] }
0x1abe   :  { %5583 = vmatpush3.bf16.msra.mxu0 %v6136_v29  ;;  %v5272_v29 = vld [vmem:[%s7894_s24] ss:$0 sm:$0xff] }
0x1abf   :  { %5584 = vmatprep.subr.bf16.mxu0 %v6180_v45 }
0x1ac2   :  { %5585 = vmatpush3.bf16.msra.mxu0 %v6138_v52 }
0x1ac3   :  { %5586 = vmatprep.subr.bf16.mxu0 %v6180_v45 }
0x1ac6   :  { %5587 = vmatpush3.bf16.msra.mxu0 %v6140_v61 }
0x1ac7   :  { %5588 = vmatprep.subr.bf16.mxu0 %v6180_v45 }
0x1aca   :  { %5589 = vmatpush3.bf16.msra.mxu0 %v6142_v6 }
0x1acb   :  { %5590 = vmatprep.subr.bf16.mxu0 %v6180_v45 }
0x1ace   :  { %5591 = vmatpush3.bf16.msra.mxu0 %v6144_v19 }
0x1acf   :  { %5592 = vmatprep.subr.bf16.mxu0 %v6180_v45 }
0x1ad2   :  { %5593 = vmatpush3.bf16.msra.mxu0 %v6146_v41 }
0x1ad3   :  { %5594 = vmatprep.subr.bf16.mxu0 %v6180_v45 }
0x1ad6   :  { %5595 = vmatpush3.bf16.msra.mxu0 %v6148_v59 }
0x1ad7   :  { %5254 = vmatprep.subr.msk.bf16.mxu0 %vm1425_vm15, %v6150_v1 }
0x1b88   :  { %v4219_v8 = vpop.f32.mrb[76].mxu0 }
0x1b89   :  { %v4223_v11 = vpack.c.bf16 %v4219_v8, %v4219_v8  ;;  %v5574_v13 = vpop.f32.mrb[77].mxu0 }
0x1b8b   :  { %5617 = vmatmul.mubr.bf16.vlgmr.msra.gmra.mrb[40].mxu1 %v4223_v11 }
0x1b8c   :  { %v4313_v20 = vpop.f32.mrb[78].mxu0  ;;  %5380 = vmatpush3.bf16.msra.mxu1 %v6154_v10 }
0x1b8d   :  { %v4317_v26 = vpack.c.bf16 %v4313_v20, %v4313_v20  ;;  %v5579_v24 = vpop.f32.mrb[79].mxu0  ;;  %5381 = vmatprep.subr.bf16.mxu1 %v6155_v17 }
0x1b8f   :  { %5597 = vmatmul.mubr.bf16.vlgmr.msra.gmra.mrb[80].mxu0 %v4317_v26 }
0x1b90   :  { %4545 = vmatpush1.bf16.msra.mxu0 %v4539_v22  ;;  %4576 = vmatprep.mubr.bf16.mxu0 %v6179_v16  ;;  %v6160_v16 = vld [vmem:[%s7889_s23 + $0x18] sm:$0xff]  }
0x1b91   :  { %5382 = vmatpush3.bf16.msra.mxu1 %v6156_v30  ;;  %5620 = vmatprep.subr.bf16.mxu0 %v6180_v45 }
0x1b92   :  { %5383 = vmatprep.subr.bf16.mxu1 %v6157_v34 }
0x1b95   :  { %5384 = vmatpush3.bf16.msra.mxu1 %v6158_v37 }
0x1b96   :  { %5385 = vmatprep.subr.bf16.mxu1 %v6159_v39 }
0x1b97   :  { %5255 = vmatmul.mubr.msk.bf16.vlgmr.msra.gmra.mrb[84].mxu0 %vm4534_vm1, %v4511_v40 }
0x1b98   :  { %5628 = vmatprep.mubr.msk.bf16.mxu0 %vm6183_vm7, %v6180_v45  ;;  %5621 = vmatpush3.bf16.msra.mxu0 %v6169_v33 }
0x1b99   :  { %5386 = vmatpush3.bf16.msra.mxu1 %v6160_v16  ;;  %5622 = vmatprep.subr.bf16.mxu0 %v6180_v45 }
0x1b9a   :  { %5387 = vmatprep.subr.bf16.mxu1 %v6161_v25 }
0x1b9c   :  { %5623 = vmatpush3.bf16.msra.mxu0 %v6170_v7 }
0x1b9d   :  { %5388 = vmatpush3.bf16.msra.mxu1 %v6162_v43  ;;  %5624 = vmatprep.subr.bf16.mxu0 %v6180_v45 }
0x1b9e   :  { %5389 = vmatprep.subr.bf16.mxu1 %v6163_v27 }
0x1ba0   :  { %5625 = vmatpush3.bf16.msra.mxu0 %v6171_v15 }
0x1ba1   :  { %5390 = vmatpush3.bf16.msra.mxu1 %v6164_v31  ;;  %5626 = vmatprep.subr.bf16.mxu0 %v6180_v45 }
0x1ba2   :  { %5391 = vmatprep.subr.bf16.mxu1 %v6165_v47 }
0x1ba4   :  { %5627 = vmatpush3.bf16.msra.mxu0 %v6172_v35 }
0x1ba5   :  { %5392 = vmatpush3.bf16.msra.mxu1 %v6166_v49 }
0x1ba6   :  { %5393 = vmatprep.subr.bf16.mxu1 %v6167_v21 }
0x1ba9   :  { %5394 = vmatpush3.bf16.msra.mxu1 %v6168_v23 }
0x1c5e   :  { %v4505_v55 = vpop.f32.mrb[40].mxu1 }
0x1c5f   :  { %v5618_v58 = vpop.f32.mrb[41].mxu1 }
0x1c60   :  { %v4508_v0 = vpop.f32.mrb[42].mxu1 }
0x1c61   :  { %v5619_v3 = vpop.f32.mrb[43].mxu1 }
0x1c62   :  { %v4417_v9 = vpop.f32.mrb[80].mxu0 }
0x1c63   :  { %v4506_v12 = vadd.f32 %v4505_v55, %v4417_v9  ;;  %v5598_v60 = vpop.f32.mrb[81].mxu0 }
0x1c64   :  { %v4420_v46 = vpop.f32.mrb[82].mxu0 }
0x1c65   :  { %v5599_v38 = vpop.f32.mrb[83].mxu0 }
0x1c6a   :  { %v4578_v56 = vpop.f32.mrb[84].mxu0 }
0x1c6b   :  { %v4579_v57 = vadd.f32 %v4578_v56, %v4519_v51  ;;  %v4580_v62 = vpop.f32.mrb[85].mxu0 }
0x1c6c   :  { %v4581_v63 = vadd.f32 %v4580_v62, %v4523_v53  ;;  %v4582_v2 = vpop.f32.mrb[86].mxu0 }
0x1c6d   :  { %v4583_v32 = vpop.f32.mrb[87].mxu0  ;;  %v4585_v4 = vpack.c.bf16 %v4579_v57, %v4579_v57 }
0x1c6e   :  { %v4586_v42 = vpack.c.bf16 %v4581_v63, %v4581_v63 }
0x1c70   :  { %4747 = vmatprep.mubr.bf16.mxu1 %v4586_v42 }
0x1c71   :  { %4748 = vmatmul.mubr.bf16.vlgmr.msra.gmra.mrb[44].mxu1 %v4585_v4 }
0x1d44   :  { %v5395_v18 = vpop.f32.mrb[44].mxu1 }
0x1d45   :  { %v5396_v28 = vpop.f32.mrb[45].mxu1 }
0x1d46   :  { %v5397_v44 = vadd.f32 %v5396_v28, %v5395_v18  ;;  %v5398_v50 = vpop.f32.mrb[46].mxu1 }
0x1d47   :  { %v5399_v52 = vpop.f32.mrb[47].mxu1 }
0x1d48   :  { %v4755_v45 = vadd.f32 %v5397_v44, %v4506_v12 }
0x1d4a   :  { %v4763_v61 = vadd.f32 %v5272_v29, %v4755_v45 }
0x1d4c   :  { %vm4764_vm15 = vcmp.gt.f32.partialorder %v4763_v61, 0.0  ;;  %v4765_v6 = vmul.f32 0.2, %v4763_v61 }
0x1d4e   :  { %v4766_v19 = vsel %vm4764_vm15, %v4763_v61, %v4765_v6 }
0x1d4f   :  { %v4767_v41 = vpack.c.bf16 %v4766_v19, %v4766_v19 }
0x1d51   :  { %5629 = vmatmul.mubr.msk.bf16.vlgmr.msra.gmra.mrb[88].mxu0 %vm2325_vm8, %v4767_v41 }
0x1e24   :  { %v4844_v59 = vpop.f32.mrb[88].mxu0 }
0x1e25   :  { %v4845_v1 = vadd.f32 %v5273_v54, %v4844_v59  ;;  %v5630_v5 = vpop.f32.mrb[89].mxu0 }
0x1e26   :  { %v4847_v8 = vpop.f32.mrb[90].mxu0 }
0x1e27   :  { %4851 = vst.msk [vmem:[%s7895_s27] sm:$0x3] %vm4850_vm9, %v4845_v1  ;;  %v5631_v10 = vpop.f32.mrb[91].mxu0 }

</bundles_post_ra>
